<compile_context>
chip_gen: v6e
topology: v6e:2x2x1
jax: 0.10.0
libtpu: 0.0.40
codegen_flags: <defaults>
</compile_context>

<pallas_src>
import functools

import jax
import jax.numpy as jnp
from jax import lax
from jax.experimental import pallas as pl
from jax.experimental.pallas import tpu as pltpu


HIDDEN = 50
NUM_LAYERS = 3
HP = 128          # padded per-gate width (lane-aligned)


def _round_up(x, m):
    return ((x + m - 1) // m) * m


# ----------------------------------------------------------------------------
# Fused kernel: 3 LSTM layers (time loop in-kernel, fully unrolled) + fc + ReLU.
# ----------------------------------------------------------------------------
def _fused_lstm_fc_kernel(num_layers, hp, *refs):
    x_ref = refs[0]                               # (T*Bp, Fp)     bf16
    layer_refs = refs[1:1 + 3 * num_layers]       # per layer: wih(bf16), whh(bf16), bias(f32)
    fcw_ref = refs[1 + 3 * num_layers]            # (hp, 128)      bf16
    fcb_ref = refs[2 + 3 * num_layers]            # (1, 128)       f32
    out_ref = refs[3 + 3 * num_layers]            # (Bp, 128)      f32
    hseq_scr = refs[4 + 3 * num_layers]           # (T, Bp, hp)    f32
    gx_scr = refs[5 + 3 * num_layers]             # (T, Bp, 4*hp)  f32

    T, Bp, _ = hseq_scr.shape

    h_last = None
    for l in range(num_layers):                   # static, unrolled layer loop
        wih_ref = layer_refs[3 * l + 0]           # (in_pad, 4*hp)
        whh_ref = layer_refs[3 * l + 1]           # (hp, 4*hp)
        b_ref = layer_refs[3 * l + 2]             # (1, 4*hp)
        is_last = (l == num_layers - 1)

        # ---- Hoisted, time-independent input projection: ONE big matmul. ----
        if l == 0:
            src_flat = x_ref[...]                                    # (T*Bp, Fp) bf16
        else:
            # Read the COMPLETE previous-layer sequence before this layer's
            # time loop starts overwriting hseq_scr (gx_scr is separate, so
            # there is no WAR hazard).
            src_flat = hseq_scr[...].reshape(T * Bp, hp).astype(jnp.bfloat16)
        gx = jnp.dot(src_flat, wih_ref[...], preferred_element_type=jnp.float32)
        gx_scr[...] = (gx + b_ref[...]).reshape(T, Bp, 4 * hp)       # bias folded in

        whh = whh_ref[...]                        # (hp, 4*hp) bf16, loop-invariant

        def step(t, carry, whh=whh, is_last=is_last):
            h, c = carry
            gates = gx_scr[t] + jnp.dot(h.astype(jnp.bfloat16), whh,
                                        preferred_element_type=jnp.float32)
            ifo = jax.nn.sigmoid(gates[:, : 3 * hp])   # one contiguous EUP slice
            g_g = jnp.tanh(gates[:, 3 * hp:])
            i_g = ifo[:, 0 * hp:1 * hp]
            f_g = ifo[:, 1 * hp:2 * hp]
            o_g = ifo[:, 2 * hp:3 * hp]
            c_new = f_g * c + i_g * g_g
            h_new = o_g * jnp.tanh(c_new)
            if not is_last:
                hseq_scr[t] = h_new               # next layer's input sequence
            return (h_new, c_new)

        init = (jnp.zeros((Bp, hp), jnp.float32),
                jnp.zeros((Bp, hp), jnp.float32))
        # T is static and small -> full unroll of the serial recurrence.
        h_last, _ = lax.fori_loop(0, T, step, init, unroll=True)

    # lstm_out[:, -1, :] -> (dropout: identity) -> fc -> ReLU, lane-dense block.
    y = jnp.dot(h_last.astype(jnp.bfloat16), fcw_ref[...],
                preferred_element_type=jnp.float32) + fcb_ref[...]
    out_ref[...] = jnp.maximum(y, 0.0)


# ----------------------------------------------------------------------------
# Parameter init (deterministic, mimics PyTorch LSTM/Linear uniform init).
# Logical params use PyTorch gate order [i, f, g, o] and unpadded shapes.
# ----------------------------------------------------------------------------
def init_params(key, nb_features, hidden=HIDDEN, num_layers=NUM_LAYERS):
    params = {"lstm": []}
    bound = 1.0 / jnp.sqrt(hidden)
    for layer in range(num_layers):
        in_dim = nb_features if layer == 0 else hidden
        key, k1, k2, k3, k4 = jax.random.split(key, 5)
        w_ih = jax.random.uniform(k1, (4 * hidden, in_dim), jnp.float32, -bound, bound)
        w_hh = jax.random.uniform(k2, (4 * hidden, hidden), jnp.float32, -bound, bound)
        b_ih = jax.random.uniform(k3, (4 * hidden,), jnp.float32, -bound, bound)
        b_hh = jax.random.uniform(k4, (4 * hidden,), jnp.float32, -bound, bound)
        params["lstm"].append(
            (w_ih.T, w_hh.T, (b_ih + b_hh).reshape(1, 4 * hidden))
        )
    key, k5, k6 = jax.random.split(key, 3)
    fc_bound = 1.0 / jnp.sqrt(hidden)
    fc_w = jax.random.uniform(k5, (1, hidden), jnp.float32, -fc_bound, fc_bound)
    fc_b = jax.random.uniform(k6, (1,), jnp.float32, -fc_bound, fc_bound)
    params["fc_w"] = fc_w.T              # (H, 1)
    params["fc_b"] = fc_b.reshape(1, 1)  # (1, 1)
    return params


# ----------------------------------------------------------------------------
# Weight prep: reorder gates [i,f,g,o] -> [i,f,o,g], pad each gate to 128 lanes,
# pad contraction dims to 128; matmul weights cast to bf16 (f32 accumulation in
# the kernel); biases stay f32.  fc is a lane-dense (128,128)/(1,128) block.
# ----------------------------------------------------------------------------
def _reorder_and_pad_gates(w, h, hp):
    """w: (rows, 4h), cols [i|f|g|o] -> (rows, 4*hp), cols [i|f|o|g], zero padded."""
    i_b = w[:, 0 * h:1 * h]
    f_b = w[:, 1 * h:2 * h]
    g_b = w[:, 2 * h:3 * h]
    o_b = w[:, 3 * h:4 * h]
    pad = lambda blk: jnp.pad(blk, ((0, 0), (0, hp - h)))
    return jnp.concatenate([pad(i_b), pad(f_b), pad(o_b), pad(g_b)], axis=1)


def prepare_params(params, hp=HP):
    H = HIDDEN
    prepped = {"layers": []}
    for (w_ih_t, w_hh_t, bias) in params["lstm"]:
        in_dim = w_ih_t.shape[0]
        in_pad = _round_up(in_dim, 128)
        wih = jnp.pad(_reorder_and_pad_gates(w_ih_t, H, hp),
                      ((0, in_pad - in_dim), (0, 0))).astype(jnp.bfloat16)   # (in_pad, 4*hp)
        whh = jnp.pad(_reorder_and_pad_gates(w_hh_t, H, hp),
                      ((0, hp - H), (0, 0))).astype(jnp.bfloat16)            # (hp, 4*hp)
        b = _reorder_and_pad_gates(bias, H, hp)                              # (1, 4*hp) f32
        prepped["layers"].append((wih, whh, b))
    prepped["fc_w"] = jnp.pad(
        params["fc_w"],
        ((0, hp - H), (0, 128 - params["fc_w"].shape[1]))).astype(jnp.bfloat16)   # (hp, 128)
    prepped["fc_b"] = jnp.pad(
        params["fc_b"], ((0, 0), (0, 128 - params["fc_b"].shape[1])))             # (1, 128) f32
    return prepped


# ----------------------------------------------------------------------------
# Full model forward (matches LSTMModel.forward in eval mode).
# ----------------------------------------------------------------------------
def lstm_model_forward(x_btf, prepped, hp=HP):
    """x_btf: (B, T, F) float32 -> (B, 1) float32."""
    B, T, F = x_btf.shape
    Bp = _round_up(max(B, 8), 8)
    Fp = prepped["layers"][0][0].shape[0]      # padded feature dim (rows of layer-0 W_ih)

    # Pad to (T, Bp, Fp), go time-major, flatten to (T*Bp, Fp) for the hoisted
    # input projection, and cast to bf16 (matmul operand dtype).
    x_pad = jnp.zeros((T, Bp, Fp), jnp.bfloat16).at[:, :B, :F].set(
        jnp.transpose(x_btf, (1, 0, 2)).astype(jnp.bfloat16)
    ).reshape(T * Bp, Fp)

    flat = [x_pad]
    for (wih, whh, b) in prepped["layers"]:
        flat += [wih, whh, b]
    flat += [prepped["fc_w"], prepped["fc_b"]]

    kernel = functools.partial(_fused_lstm_fc_kernel, len(prepped["layers"]), hp)
    vmem_spec = pl.BlockSpec(memory_space=pltpu.MemorySpace.VMEM)

    out = pl.pallas_call(
        kernel,
        out_shape=jax.ShapeDtypeStruct((Bp, 128), jnp.float32),
        in_specs=[vmem_spec] * len(flat),
        out_specs=vmem_spec,
        scratch_shapes=[
            pltpu.VMEM((T, Bp, hp), jnp.float32),       # per-layer h sequence
            pltpu.VMEM((T, Bp, 4 * hp), jnp.float32),   # hoisted input projection (gates_x)
        ],
    )(*flat)

    # nn.Dropout layers: identity at inference. Slice the lane/sublane padding.
    return out[:B, :1]


# ----------------------------------------------------------------------------
# Pure-JAX reference (unpadded, PyTorch gate order).  matmul_dtype=jnp.bfloat16
# mirrors the kernel's bf16 matmul operands with f32 accumulation.
# ----------------------------------------------------------------------------
def _ref_forward(x_btf, params, matmul_dtype=jnp.float32):
    B = x_btf.shape[0]
    H = HIDDEN

    def mm(a, b):
        return jnp.dot(a.astype(matmul_dtype), b.astype(matmul_dtype),
                       preferred_element_type=jnp.float32)

    layer_in = x_btf.astype(jnp.float32)
    for (w_ih_t, w_hh_t, bias) in params["lstm"]:
        h = jnp.zeros((B, H), jnp.float32)
        c = jnp.zeros((B, H), jnp.float32)
        outs = []
        for t in range(layer_in.shape[1]):
            g = mm(layer_in[:, t, :], w_ih_t) + mm(h, w_hh_t) + bias
            i_g = jax.nn.sigmoid(g[:, 0 * H:1 * H])
            f_g = jax.nn.sigmoid(g[:, 1 * H:2 * H])
            g_g = jnp.tanh(g[:, 2 * H:3 * H])
            o_g = jax.nn.sigmoid(g[:, 3 * H:4 * H])
            c = f_g * c + i_g * g_g
            h = o_g * jnp.tanh(c)
            outs.append(h)
        layer_in = jnp.stack(outs, axis=1)
    last = layer_in[:, -1, :]
    return jnp.maximum(mm(last, params["fc_w"]) + params["fc_b"], 0.0)


if __name__ == "__main__":
    B, T, F = 4, 8, 17   # small shapes; module defaults are seq=30, features=17
    key = jax.random.PRNGKey(0)
    key, kx = jax.random.split(key)
    x = jax.random.normal(kx, (B, T, F), jnp.float32)

    params = init_params(key, nb_features=F)
    prepped = prepare_params(params)

    fwd = jax.jit(lstm_model_forward)
    out = jax.block_until_ready(fwd(x, prepped))
    assert out.shape == (B, 1), out.shape

    # Tight check vs a reference that rounds matmul operands to bf16 exactly
    # like the kernel (f32 accumulation, f32 elementwise everywhere else).
    ref_bf16 = _ref_forward(x, params, matmul_dtype=jnp.bfloat16)
    assert jnp.allclose(out, ref_bf16, atol=2e-3, rtol=2e-3), (out, ref_bf16)

    # Loose sanity check vs the exact f32 (PyTorch-semantics) reference.
    ref_f32 = _ref_forward(x, params, matmul_dtype=jnp.float32)
    assert jnp.allclose(out, ref_f32, atol=5e-2, rtol=5e-2), (out, ref_f32)

    print("KERNEL_OK")
</pallas_src>

<mosaic_0001>
module attributes {stable_mosaic.version = 11 : i64} {
  func.func @_fused_lstm_fc_kernel(%arg0: memref<64x128xbf16, #tpu.memory_space<vmem>>, %arg1: memref<128x512xbf16, #tpu.memory_space<vmem>>, %arg2: memref<128x512xbf16, #tpu.memory_space<vmem>>, %arg3: memref<1x512xf32, #tpu.memory_space<vmem>>, %arg4: memref<128x512xbf16, #tpu.memory_space<vmem>>, %arg5: memref<128x512xbf16, #tpu.memory_space<vmem>>, %arg6: memref<1x512xf32, #tpu.memory_space<vmem>>, %arg7: memref<128x512xbf16, #tpu.memory_space<vmem>>, %arg8: memref<128x512xbf16, #tpu.memory_space<vmem>>, %arg9: memref<1x512xf32, #tpu.memory_space<vmem>>, %arg10: memref<128x128xbf16, #tpu.memory_space<vmem>>, %arg11: memref<1x128xf32, #tpu.memory_space<vmem>>, %arg12: memref<8x128xf32, #tpu.memory_space<vmem>>, %arg13: memref<8x8x128xf32, #tpu.memory_space<vmem>>, %arg14: memref<8x8x512xf32, #tpu.memory_space<vmem>>) attributes {dimension_semantics = [], scalar_prefetch = 0 : i64, scratch_operands = 2 : i64, tpu.core_type = #tpu.core_type<tc>} {
    %c0 = arith.constant 0 : index
    %c0_0 = arith.constant 0 : index
    %0 = vector.load %arg0[%c0, %c0_0] : memref<64x128xbf16, #tpu.memory_space<vmem>>, vector<64x128xbf16>
    %c0_1 = arith.constant 0 : index
    %c0_2 = arith.constant 0 : index
    %1 = vector.load %arg1[%c0_1, %c0_2] : memref<128x512xbf16, #tpu.memory_space<vmem>>, vector<128x512xbf16>
    %cst = arith.constant dense<0.000000e+00> : vector<64x512xf32>
    %2 = tpu.matmul %0, %1, %cst {dimension_numbers = #tpu.dot_dimension_numbers<[1], [0], [0], [1], [0, 0, 1, 1], [], []>} : vector<64x128xbf16>, vector<128x512xbf16>, vector<64x512xf32> -> vector<64x512xf32>
    %c0_3 = arith.constant 0 : index
    %c0_4 = arith.constant 0 : index
    %3 = vector.load %arg3[%c0_3, %c0_4] : memref<1x512xf32, #tpu.memory_space<vmem>>, vector<1x512xf32>
    %4 = vector.broadcast %3 : vector<1x512xf32> to vector<64x512xf32>
    %5 = arith.addf %2, %4 : vector<64x512xf32>
    %6 = vector.shape_cast %5 : vector<64x512xf32> to vector<8x8x512xf32>
    %c0_5 = arith.constant 0 : index
    %c0_6 = arith.constant 0 : index
    %c0_7 = arith.constant 0 : index
    %7 = vector.load %arg14[%c0_5, %c0_6, %c0_7] : memref<8x8x512xf32, #tpu.memory_space<vmem>>, vector<8x8x512xf32>
    tpu.vector_store %arg14[%c0_5, %c0_6, %c0_7], %6 {strides = array<i32>} : memref<8x8x512xf32, #tpu.memory_space<vmem>>, vector<8x8x512xf32>,
    %c0_8 = arith.constant 0 : index
    %c0_9 = arith.constant 0 : index
    %8 = vector.load %arg2[%c0_8, %c0_9] : memref<128x512xbf16, #tpu.memory_space<vmem>>, vector<128x512xbf16>
    %cst_10 = arith.constant 0.000000e+00 : f32
    %9 = vector.broadcast %cst_10 : f32 to vector<8x128xf32>
    %cst_11 = arith.constant 0.000000e+00 : f32
    %10 = vector.broadcast %cst_11 : f32 to vector<8x128xf32>
    %c0_i32 = arith.constant 0 : i32
    %11 = arith.index_cast %c0_i32 : i32 to index
    %c0_12 = arith.constant 0 : index
    %c0_13 = arith.constant 0 : index
    %12 = vector.load %arg14[%11, %c0_12, %c0_13] : memref<8x8x512xf32, #tpu.memory_space<vmem>>, vector<1x8x512xf32>
    %13 = vector.shape_cast %12 : vector<1x8x512xf32> to vector<8x512xf32>
    %14 = arith.truncf %9 : vector<8x128xf32> to vector<8x128xbf16>
    %cst_14 = arith.constant dense<0.000000e+00> : vector<8x512xf32>
    %15 = tpu.matmul %14, %8, %cst_14 {dimension_numbers = #tpu.dot_dimension_numbers<[1], [0], [0], [1], [0, 0, 1, 1], [], []>} : vector<8x128xbf16>, vector<128x512xbf16>, vector<8x512xf32> -> vector<8x512xf32>
    %16 = arith.addf %13, %15 : vector<8x512xf32>
    %17 = vector.extract_strided_slice %16 {offsets = [0, 0], sizes = [8, 384], strides = [1, 1]} : vector<8x512xf32> to vector<8x384xf32>
    %18 = arith.negf %17 : vector<8x384xf32>
    %19 = math.exp %18 : vector<8x384xf32>
    %cst_15 = arith.constant 1.000000e+00 : f32
    %20 = vector.broadcast %cst_15 : f32 to vector<8x384xf32>
    %21 = arith.addf %20, %19 : vector<8x384xf32>
    %22 = arith.divf %20, %21 : vector<8x384xf32>
    %23 = vector.extract_strided_slice %16 {offsets = [0, 384], sizes = [8, 128], strides = [1, 1]} : vector<8x512xf32> to vector<8x128xf32>
    %24 = math.tanh %23 : vector<8x128xf32>
    %25 = vector.extract_strided_slice %22 {offsets = [0, 0], sizes = [8, 128], strides = [1, 1]} : vector<8x384xf32> to vector<8x128xf32>
    %26 = vector.extract_strided_slice %22 {offsets = [0, 128], sizes = [8, 128], strides = [1, 1]} : vector<8x384xf32> to vector<8x128xf32>
    %27 = vector.extract_strided_slice %22 {offsets = [0, 256], sizes = [8, 128], strides = [1, 1]} : vector<8x384xf32> to vector<8x128xf32>
    %28 = arith.mulf %26, %10 : vector<8x128xf32>
    %29 = arith.mulf %25, %24 : vector<8x128xf32>
    %30 = arith.addf %28, %29 : vector<8x128xf32>
    %31 = math.tanh %30 : vector<8x128xf32>
    %32 = arith.mulf %27, %31 : vector<8x128xf32>
    %33 = arith.index_cast %c0_i32 : i32 to index
    %c0_16 = arith.constant 0 : index
    %c0_17 = arith.constant 0 : index
    %34 = vector.load %arg13[%33, %c0_16, %c0_17] : memref<8x8x128xf32, #tpu.memory_space<vmem>>, vector<1x8x128xf32>
    %35 = vector.shape_cast %34 : vector<1x8x128xf32> to vector<8x128xf32>
    %36 = vector.shape_cast %32 : vector<8x128xf32> to vector<1x8x128xf32>
    tpu.vector_store %arg13[%33, %c0_16, %c0_17], %36 {strides = array<i32>} : memref<8x8x128xf32, #tpu.memory_space<vmem>>, vector<1x8x128xf32>,
    %c1_i32 = arith.constant 1 : i32
    %37 = arith.index_cast %c1_i32 : i32 to index
    %c0_18 = arith.constant 0 : index
    %c0_19 = arith.constant 0 : index
    %38 = vector.load %arg14[%37, %c0_18, %c0_19] : memref<8x8x512xf32, #tpu.memory_space<vmem>>, vector<1x8x512xf32>
    %39 = vector.shape_cast %38 : vector<1x8x512xf32> to vector<8x512xf32>
    %40 = arith.truncf %32 : vector<8x128xf32> to vector<8x128xbf16>
    %cst_20 = arith.constant dense<0.000000e+00> : vector<8x512xf32>
    %41 = tpu.matmul %40, %8, %cst_20 {dimension_numbers = #tpu.dot_dimension_numbers<[1], [0], [0], [1], [0, 0, 1, 1], [], []>} : vector<8x128xbf16>, vector<128x512xbf16>, vector<8x512xf32> -> vector<8x512xf32>
    %42 = arith.addf %39, %41 : vector<8x512xf32>
    %43 = vector.extract_strided_slice %42 {offsets = [0, 0], sizes = [8, 384], strides = [1, 1]} : vector<8x512xf32> to vector<8x384xf32>
    %44 = arith.negf %43 : vector<8x384xf32>
    %45 = math.exp %44 : vector<8x384xf32>
    %cst_21 = arith.constant 1.000000e+00 : f32
    %46 = vector.broadcast %cst_21 : f32 to vector<8x384xf32>
    %47 = arith.addf %46, %45 : vector<8x384xf32>
    %48 = arith.divf %46, %47 : vector<8x384xf32>
    %49 = vector.extract_strided_slice %42 {offsets = [0, 384], sizes = [8, 128], strides = [1, 1]} : vector<8x512xf32> to vector<8x128xf32>
    %50 = math.tanh %49 : vector<8x128xf32>
    %51 = vector.extract_strided_slice %48 {offsets = [0, 0], sizes = [8, 128], strides = [1, 1]} : vector<8x384xf32> to vector<8x128xf32>
    %52 = vector.extract_strided_slice %48 {offsets = [0, 128], sizes = [8, 128], strides = [1, 1]} : vector<8x384xf32> to vector<8x128xf32>
    %53 = vector.extract_strided_slice %48 {offsets = [0, 256], sizes = [8, 128], strides = [1, 1]} : vector<8x384xf32> to vector<8x128xf32>
    %54 = arith.mulf %52, %30 : vector<8x128xf32>
    %55 = arith.mulf %51, %50 : vector<8x128xf32>
    %56 = arith.addf %54, %55 : vector<8x128xf32>
    %57 = math.tanh %56 : vector<8x128xf32>
    %58 = arith.mulf %53, %57 : vector<8x128xf32>
    %59 = arith.index_cast %c1_i32 : i32 to index
    %c0_22 = arith.constant 0 : index
    %c0_23 = arith.constant 0 : index
    %60 = vector.load %arg13[%59, %c0_22, %c0_23] : memref<8x8x128xf32, #tpu.memory_space<vmem>>, vector<1x8x128xf32>
    %61 = vector.shape_cast %60 : vector<1x8x128xf32> to vector<8x128xf32>
    %62 = vector.shape_cast %58 : vector<8x128xf32> to vector<1x8x128xf32>
    tpu.vector_store %arg13[%59, %c0_22, %c0_23], %62 {strides = array<i32>} : memref<8x8x128xf32, #tpu.memory_space<vmem>>, vector<1x8x128xf32>,
    %c2_i32 = arith.constant 2 : i32
    %63 = arith.index_cast %c2_i32 : i32 to index
    %c0_24 = arith.constant 0 : index
    %c0_25 = arith.constant 0 : index
    %64 = vector.load %arg14[%63, %c0_24, %c0_25] : memref<8x8x512xf32, #tpu.memory_space<vmem>>, vector<1x8x512xf32>
    %65 = vector.shape_cast %64 : vector<1x8x512xf32> to vector<8x512xf32>
    %66 = arith.truncf %58 : vector<8x128xf32> to vector<8x128xbf16>
    %cst_26 = arith.constant dense<0.000000e+00> : vector<8x512xf32>
    %67 = tpu.matmul %66, %8, %cst_26 {dimension_numbers = #tpu.dot_dimension_numbers<[1], [0], [0], [1], [0, 0, 1, 1], [], []>} : vector<8x128xbf16>, vector<128x512xbf16>, vector<8x512xf32> -> vector<8x512xf32>
    %68 = arith.addf %65, %67 : vector<8x512xf32>
    %69 = vector.extract_strided_slice %68 {offsets = [0, 0], sizes = [8, 384], strides = [1, 1]} : vector<8x512xf32> to vector<8x384xf32>
    %70 = arith.negf %69 : vector<8x384xf32>
    %71 = math.exp %70 : vector<8x384xf32>
    %cst_27 = arith.constant 1.000000e+00 : f32
    %72 = vector.broadcast %cst_27 : f32 to vector<8x384xf32>
    %73 = arith.addf %72, %71 : vector<8x384xf32>
    %74 = arith.divf %72, %73 : vector<8x384xf32>
    %75 = vector.extract_strided_slice %68 {offsets = [0, 384], sizes = [8, 128], strides = [1, 1]} : vector<8x512xf32> to vector<8x128xf32>
    %76 = math.tanh %75 : vector<8x128xf32>
    %77 = vector.extract_strided_slice %74 {offsets = [0, 0], sizes = [8, 128], strides = [1, 1]} : vector<8x384xf32> to vector<8x128xf32>
    %78 = vector.extract_strided_slice %74 {offsets = [0, 128], sizes = [8, 128], strides = [1, 1]} : vector<8x384xf32> to vector<8x128xf32>
    %79 = vector.extract_strided_slice %74 {offsets = [0, 256], sizes = [8, 128], strides = [1, 1]} : vector<8x384xf32> to vector<8x128xf32>
    %80 = arith.mulf %78, %56 : vector<8x128xf32>
    %81 = arith.mulf %77, %76 : vector<8x128xf32>
    %82 = arith.addf %80, %81 : vector<8x128xf32>
    %83 = math.tanh %82 : vector<8x128xf32>
    %84 = arith.mulf %79, %83 : vector<8x128xf32>
    %85 = arith.index_cast %c2_i32 : i32 to index
    %c0_28 = arith.constant 0 : index
    %c0_29 = arith.constant 0 : index
    %86 = vector.load %arg13[%85, %c0_28, %c0_29] : memref<8x8x128xf32, #tpu.memory_space<vmem>>, vector<1x8x128xf32>
    %87 = vector.shape_cast %86 : vector<1x8x128xf32> to vector<8x128xf32>
    %88 = vector.shape_cast %84 : vector<8x128xf32> to vector<1x8x128xf32>
    tpu.vector_store %arg13[%85, %c0_28, %c0_29], %88 {strides = array<i32>} : memref<8x8x128xf32, #tpu.memory_space<vmem>>, vector<1x8x128xf32>,
    %c3_i32 = arith.constant 3 : i32
    %89 = arith.index_cast %c3_i32 : i32 to index
    %c0_30 = arith.constant 0 : index
    %c0_31 = arith.constant 0 : index
    %90 = vector.load %arg14[%89, %c0_30, %c0_31] : memref<8x8x512xf32, #tpu.memory_space<vmem>>, vector<1x8x512xf32>
    %91 = vector.shape_cast %90 : vector<1x8x512xf32> to vector<8x512xf32>
    %92 = arith.truncf %84 : vector<8x128xf32> to vector<8x128xbf16>
    %cst_32 = arith.constant dense<0.000000e+00> : vector<8x512xf32>
    %93 = tpu.matmul %92, %8, %cst_32 {dimension_numbers = #tpu.dot_dimension_numbers<[1], [0], [0], [1], [0, 0, 1, 1], [], []>} : vector<8x128xbf16>, vector<128x512xbf16>, vector<8x512xf32> -> vector<8x512xf32>
    %94 = arith.addf %91, %93 : vector<8x512xf32>
    %95 = vector.extract_strided_slice %94 {offsets = [0, 0], sizes = [8, 384], strides = [1, 1]} : vector<8x512xf32> to vector<8x384xf32>
    %96 = arith.negf %95 : vector<8x384xf32>
    %97 = math.exp %96 : vector<8x384xf32>
    %cst_33 = arith.constant 1.000000e+00 : f32
    %98 = vector.broadcast %cst_33 : f32 to vector<8x384xf32>
    %99 = arith.addf %98, %97 : vector<8x384xf32>
    %100 = arith.divf %98, %99 : vector<8x384xf32>
    %101 = vector.extract_strided_slice %94 {offsets = [0, 384], sizes = [8, 128], strides = [1, 1]} : vector<8x512xf32> to vector<8x128xf32>
    %102 = math.tanh %101 : vector<8x128xf32>
    %103 = vector.extract_strided_slice %100 {offsets = [0, 0], sizes = [8, 128], strides = [1, 1]} : vector<8x384xf32> to vector<8x128xf32>
    %104 = vector.extract_strided_slice %100 {offsets = [0, 128], sizes = [8, 128], strides = [1, 1]} : vector<8x384xf32> to vector<8x128xf32>
    %105 = vector.extract_strided_slice %100 {offsets = [0, 256], sizes = [8, 128], strides = [1, 1]} : vector<8x384xf32> to vector<8x128xf32>
    %106 = arith.mulf %104, %82 : vector<8x128xf32>
    %107 = arith.mulf %103, %102 : vector<8x128xf32>
    %108 = arith.addf %106, %107 : vector<8x128xf32>
    %109 = math.tanh %108 : vector<8x128xf32>
    %110 = arith.mulf %105, %109 : vector<8x128xf32>
    %111 = arith.index_cast %c3_i32 : i32 to index
    %c0_34 = arith.constant 0 : index
    %c0_35 = arith.constant 0 : index
    %112 = vector.load %arg13[%111, %c0_34, %c0_35] : memref<8x8x128xf32, #tpu.memory_space<vmem>>, vector<1x8x128xf32>
    %113 = vector.shape_cast %112 : vector<1x8x128xf32> to vector<8x128xf32>
    %114 = vector.shape_cast %110 : vector<8x128xf32> to vector<1x8x128xf32>
    tpu.vector_store %arg13[%111, %c0_34, %c0_35], %114 {strides = array<i32>} : memref<8x8x128xf32, #tpu.memory_space<vmem>>, vector<1x8x128xf32>,
    %c4_i32 = arith.constant 4 : i32
    %115 = arith.index_cast %c4_i32 : i32 to index
    %c0_36 = arith.constant 0 : index
    %c0_37 = arith.constant 0 : index
    %116 = vector.load %arg14[%115, %c0_36, %c0_37] : memref<8x8x512xf32, #tpu.memory_space<vmem>>, vector<1x8x512xf32>
    %117 = vector.shape_cast %116 : vector<1x8x512xf32> to vector<8x512xf32>
    %118 = arith.truncf %110 : vector<8x128xf32> to vector<8x128xbf16>
    %cst_38 = arith.constant dense<0.000000e+00> : vector<8x512xf32>
    %119 = tpu.matmul %118, %8, %cst_38 {dimension_numbers = #tpu.dot_dimension_numbers<[1], [0], [0], [1], [0, 0, 1, 1], [], []>} : vector<8x128xbf16>, vector<128x512xbf16>, vector<8x512xf32> -> vector<8x512xf32>
    %120 = arith.addf %117, %119 : vector<8x512xf32>
    %121 = vector.extract_strided_slice %120 {offsets = [0, 0], sizes = [8, 384], strides = [1, 1]} : vector<8x512xf32> to vector<8x384xf32>
    %122 = arith.negf %121 : vector<8x384xf32>
    %123 = math.exp %122 : vector<8x384xf32>
    %cst_39 = arith.constant 1.000000e+00 : f32
    %124 = vector.broadcast %cst_39 : f32 to vector<8x384xf32>
    %125 = arith.addf %124, %123 : vector<8x384xf32>
    %126 = arith.divf %124, %125 : vector<8x384xf32>
    %127 = vector.extract_strided_slice %120 {offsets = [0, 384], sizes = [8, 128], strides = [1, 1]} : vector<8x512xf32> to vector<8x128xf32>
    %128 = math.tanh %127 : vector<8x128xf32>
    %129 = vector.extract_strided_slice %126 {offsets = [0, 0], sizes = [8, 128], strides = [1, 1]} : vector<8x384xf32> to vector<8x128xf32>
    %130 = vector.extract_strided_slice %126 {offsets = [0, 128], sizes = [8, 128], strides = [1, 1]} : vector<8x384xf32> to vector<8x128xf32>
    %131 = vector.extract_strided_slice %126 {offsets = [0, 256], sizes = [8, 128], strides = [1, 1]} : vector<8x384xf32> to vector<8x128xf32>
    %132 = arith.mulf %130, %108 : vector<8x128xf32>
    %133 = arith.mulf %129, %128 : vector<8x128xf32>
    %134 = arith.addf %132, %133 : vector<8x128xf32>
    %135 = math.tanh %134 : vector<8x128xf32>
    %136 = arith.mulf %131, %135 : vector<8x128xf32>
    %137 = arith.index_cast %c4_i32 : i32 to index
    %c0_40 = arith.constant 0 : index
    %c0_41 = arith.constant 0 : index
    %138 = vector.load %arg13[%137, %c0_40, %c0_41] : memref<8x8x128xf32, #tpu.memory_space<vmem>>, vector<1x8x128xf32>
    %139 = vector.shape_cast %138 : vector<1x8x128xf32> to vector<8x128xf32>
    %140 = vector.shape_cast %136 : vector<8x128xf32> to vector<1x8x128xf32>
    tpu.vector_store %arg13[%137, %c0_40, %c0_41], %140 {strides = array<i32>} : memref<8x8x128xf32, #tpu.memory_space<vmem>>, vector<1x8x128xf32>,
    %c5_i32 = arith.constant 5 : i32
    %141 = arith.index_cast %c5_i32 : i32 to index
    %c0_42 = arith.constant 0 : index
    %c0_43 = arith.constant 0 : index
    %142 = vector.load %arg14[%141, %c0_42, %c0_43] : memref<8x8x512xf32, #tpu.memory_space<vmem>>, vector<1x8x512xf32>
    %143 = vector.shape_cast %142 : vector<1x8x512xf32> to vector<8x512xf32>
    %144 = arith.truncf %136 : vector<8x128xf32> to vector<8x128xbf16>
    %cst_44 = arith.constant dense<0.000000e+00> : vector<8x512xf32>
    %145 = tpu.matmul %144, %8, %cst_44 {dimension_numbers = #tpu.dot_dimension_numbers<[1], [0], [0], [1], [0, 0, 1, 1], [], []>} : vector<8x128xbf16>, vector<128x512xbf16>, vector<8x512xf32> -> vector<8x512xf32>
    %146 = arith.addf %143, %145 : vector<8x512xf32>
    %147 = vector.extract_strided_slice %146 {offsets = [0, 0], sizes = [8, 384], strides = [1, 1]} : vector<8x512xf32> to vector<8x384xf32>
    %148 = arith.negf %147 : vector<8x384xf32>
    %149 = math.exp %148 : vector<8x384xf32>
    %cst_45 = arith.constant 1.000000e+00 : f32
    %150 = vector.broadcast %cst_45 : f32 to vector<8x384xf32>
    %151 = arith.addf %150, %149 : vector<8x384xf32>
    %152 = arith.divf %150, %151 : vector<8x384xf32>
    %153 = vector.extract_strided_slice %146 {offsets = [0, 384], sizes = [8, 128], strides = [1, 1]} : vector<8x512xf32> to vector<8x128xf32>
    %154 = math.tanh %153 : vector<8x128xf32>
    %155 = vector.extract_strided_slice %152 {offsets = [0, 0], sizes = [8, 128], strides = [1, 1]} : vector<8x384xf32> to vector<8x128xf32>
    %156 = vector.extract_strided_slice %152 {offsets = [0, 128], sizes = [8, 128], strides = [1, 1]} : vector<8x384xf32> to vector<8x128xf32>
    %157 = vector.extract_strided_slice %152 {offsets = [0, 256], sizes = [8, 128], strides = [1, 1]} : vector<8x384xf32> to vector<8x128xf32>
    %158 = arith.mulf %156, %134 : vector<8x128xf32>
    %159 = arith.mulf %155, %154 : vector<8x128xf32>
    %160 = arith.addf %158, %159 : vector<8x128xf32>
    %161 = math.tanh %160 : vector<8x128xf32>
    %162 = arith.mulf %157, %161 : vector<8x128xf32>
    %163 = arith.index_cast %c5_i32 : i32 to index
    %c0_46 = arith.constant 0 : index
    %c0_47 = arith.constant 0 : index
    %164 = vector.load %arg13[%163, %c0_46, %c0_47] : memref<8x8x128xf32, #tpu.memory_space<vmem>>, vector<1x8x128xf32>
    %165 = vector.shape_cast %164 : vector<1x8x128xf32> to vector<8x128xf32>
    %166 = vector.shape_cast %162 : vector<8x128xf32> to vector<1x8x128xf32>
    tpu.vector_store %arg13[%163, %c0_46, %c0_47], %166 {strides = array<i32>} : memref<8x8x128xf32, #tpu.memory_space<vmem>>, vector<1x8x128xf32>,
    %c6_i32 = arith.constant 6 : i32
    %167 = arith.index_cast %c6_i32 : i32 to index
    %c0_48 = arith.constant 0 : index
    %c0_49 = arith.constant 0 : index
    %168 = vector.load %arg14[%167, %c0_48, %c0_49] : memref<8x8x512xf32, #tpu.memory_space<vmem>>, vector<1x8x512xf32>
    %169 = vector.shape_cast %168 : vector<1x8x512xf32> to vector<8x512xf32>
    %170 = arith.truncf %162 : vector<8x128xf32> to vector<8x128xbf16>
    %cst_50 = arith.constant dense<0.000000e+00> : vector<8x512xf32>
    %171 = tpu.matmul %170, %8, %cst_50 {dimension_numbers = #tpu.dot_dimension_numbers<[1], [0], [0], [1], [0, 0, 1, 1], [], []>} : vector<8x128xbf16>, vector<128x512xbf16>, vector<8x512xf32> -> vector<8x512xf32>
    %172 = arith.addf %169, %171 : vector<8x512xf32>
    %173 = vector.extract_strided_slice %172 {offsets = [0, 0], sizes = [8, 384], strides = [1, 1]} : vector<8x512xf32> to vector<8x384xf32>
    %174 = arith.negf %173 : vector<8x384xf32>
    %175 = math.exp %174 : vector<8x384xf32>
    %cst_51 = arith.constant 1.000000e+00 : f32
    %176 = vector.broadcast %cst_51 : f32 to vector<8x384xf32>
    %177 = arith.addf %176, %175 : vector<8x384xf32>
    %178 = arith.divf %176, %177 : vector<8x384xf32>
    %179 = vector.extract_strided_slice %172 {offsets = [0, 384], sizes = [8, 128], strides = [1, 1]} : vector<8x512xf32> to vector<8x128xf32>
    %180 = math.tanh %179 : vector<8x128xf32>
    %181 = vector.extract_strided_slice %178 {offsets = [0, 0], sizes = [8, 128], strides = [1, 1]} : vector<8x384xf32> to vector<8x128xf32>
    %182 = vector.extract_strided_slice %178 {offsets = [0, 128], sizes = [8, 128], strides = [1, 1]} : vector<8x384xf32> to vector<8x128xf32>
    %183 = vector.extract_strided_slice %178 {offsets = [0, 256], sizes = [8, 128], strides = [1, 1]} : vector<8x384xf32> to vector<8x128xf32>
    %184 = arith.mulf %182, %160 : vector<8x128xf32>
    %185 = arith.mulf %181, %180 : vector<8x128xf32>
    %186 = arith.addf %184, %185 : vector<8x128xf32>
    %187 = math.tanh %186 : vector<8x128xf32>
    %188 = arith.mulf %183, %187 : vector<8x128xf32>
    %189 = arith.index_cast %c6_i32 : i32 to index
    %c0_52 = arith.constant 0 : index
    %c0_53 = arith.constant 0 : index
    %190 = vector.load %arg13[%189, %c0_52, %c0_53] : memref<8x8x128xf32, #tpu.memory_space<vmem>>, vector<1x8x128xf32>
    %191 = vector.shape_cast %190 : vector<1x8x128xf32> to vector<8x128xf32>
    %192 = vector.shape_cast %188 : vector<8x128xf32> to vector<1x8x128xf32>
    tpu.vector_store %arg13[%189, %c0_52, %c0_53], %192 {strides = array<i32>} : memref<8x8x128xf32, #tpu.memory_space<vmem>>, vector<1x8x128xf32>,
    %c7_i32 = arith.constant 7 : i32
    %193 = arith.index_cast %c7_i32 : i32 to index
    %c0_54 = arith.constant 0 : index
    %c0_55 = arith.constant 0 : index
    %194 = vector.load %arg14[%193, %c0_54, %c0_55] : memref<8x8x512xf32, #tpu.memory_space<vmem>>, vector<1x8x512xf32>
    %195 = vector.shape_cast %194 : vector<1x8x512xf32> to vector<8x512xf32>
    %196 = arith.truncf %188 : vector<8x128xf32> to vector<8x128xbf16>
    %cst_56 = arith.constant dense<0.000000e+00> : vector<8x512xf32>
    %197 = tpu.matmul %196, %8, %cst_56 {dimension_numbers = #tpu.dot_dimension_numbers<[1], [0], [0], [1], [0, 0, 1, 1], [], []>} : vector<8x128xbf16>, vector<128x512xbf16>, vector<8x512xf32> -> vector<8x512xf32>
    %198 = arith.addf %195, %197 : vector<8x512xf32>
    %199 = vector.extract_strided_slice %198 {offsets = [0, 0], sizes = [8, 384], strides = [1, 1]} : vector<8x512xf32> to vector<8x384xf32>
    %200 = arith.negf %199 : vector<8x384xf32>
    %201 = math.exp %200 : vector<8x384xf32>
    %cst_57 = arith.constant 1.000000e+00 : f32
    %202 = vector.broadcast %cst_57 : f32 to vector<8x384xf32>
    %203 = arith.addf %202, %201 : vector<8x384xf32>
    %204 = arith.divf %202, %203 : vector<8x384xf32>
    %205 = vector.extract_strided_slice %198 {offsets = [0, 384], sizes = [8, 128], strides = [1, 1]} : vector<8x512xf32> to vector<8x128xf32>
    %206 = math.tanh %205 : vector<8x128xf32>
    %207 = vector.extract_strided_slice %204 {offsets = [0, 0], sizes = [8, 128], strides = [1, 1]} : vector<8x384xf32> to vector<8x128xf32>
    %208 = vector.extract_strided_slice %204 {offsets = [0, 128], sizes = [8, 128], strides = [1, 1]} : vector<8x384xf32> to vector<8x128xf32>
    %209 = vector.extract_strided_slice %204 {offsets = [0, 256], sizes = [8, 128], strides = [1, 1]} : vector<8x384xf32> to vector<8x128xf32>
    %210 = arith.mulf %208, %186 : vector<8x128xf32>
    %211 = arith.mulf %207, %206 : vector<8x128xf32>
    %212 = arith.addf %210, %211 : vector<8x128xf32>
    %213 = math.tanh %212 : vector<8x128xf32>
    %214 = arith.mulf %209, %213 : vector<8x128xf32>
    %215 = arith.index_cast %c7_i32 : i32 to index
    %c0_58 = arith.constant 0 : index
    %c0_59 = arith.constant 0 : index
    %216 = vector.load %arg13[%215, %c0_58, %c0_59] : memref<8x8x128xf32, #tpu.memory_space<vmem>>, vector<1x8x128xf32>
    %217 = vector.shape_cast %216 : vector<1x8x128xf32> to vector<8x128xf32>
    %218 = vector.shape_cast %214 : vector<8x128xf32> to vector<1x8x128xf32>
    tpu.vector_store %arg13[%215, %c0_58, %c0_59], %218 {strides = array<i32>} : memref<8x8x128xf32, #tpu.memory_space<vmem>>, vector<1x8x128xf32>,
    %c8_i32 = arith.constant 8 : i32
    %c0_60 = arith.constant 0 : index
    %c0_61 = arith.constant 0 : index
    %c0_62 = arith.constant 0 : index
    %219 = vector.load %arg13[%c0_60, %c0_61, %c0_62] : memref<8x8x128xf32, #tpu.memory_space<vmem>>, vector<8x8x128xf32>
    %220 = vector.shape_cast %219 : vector<8x8x128xf32> to vector<64x128xf32>
    %221 = arith.truncf %220 : vector<64x128xf32> to vector<64x128xbf16>
    %c0_63 = arith.constant 0 : index
    %c0_64 = arith.constant 0 : index
    %222 = vector.load %arg4[%c0_63, %c0_64] : memref<128x512xbf16, #tpu.memory_space<vmem>>, vector<128x512xbf16>
    %cst_65 = arith.constant dense<0.000000e+00> : vector<64x512xf32>
    %223 = tpu.matmul %221, %222, %cst_65 {dimension_numbers = #tpu.dot_dimension_numbers<[1], [0], [0], [1], [0, 0, 1, 1], [], []>} : vector<64x128xbf16>, vector<128x512xbf16>, vector<64x512xf32> -> vector<64x512xf32>
    %c0_66 = arith.constant 0 : index
    %c0_67 = arith.constant 0 : index
    %224 = vector.load %arg6[%c0_66, %c0_67] : memref<1x512xf32, #tpu.memory_space<vmem>>, vector<1x512xf32>
    %225 = vector.broadcast %224 : vector<1x512xf32> to vector<64x512xf32>
    %226 = arith.addf %223, %225 : vector<64x512xf32>
    %227 = vector.shape_cast %226 : vector<64x512xf32> to vector<8x8x512xf32>
    %c0_68 = arith.constant 0 : index
    %c0_69 = arith.constant 0 : index
    %c0_70 = arith.constant 0 : index
    %228 = vector.load %arg14[%c0_68, %c0_69, %c0_70] : memref<8x8x512xf32, #tpu.memory_space<vmem>>, vector<8x8x512xf32>
    tpu.vector_store %arg14[%c0_68, %c0_69, %c0_70], %227 {strides = array<i32>} : memref<8x8x512xf32, #tpu.memory_space<vmem>>, vector<8x8x512xf32>,
    %c0_71 = arith.constant 0 : index
    %c0_72 = arith.constant 0 : index
    %229 = vector.load %arg5[%c0_71, %c0_72] : memref<128x512xbf16, #tpu.memory_space<vmem>>, vector<128x512xbf16>
    %cst_73 = arith.constant 0.000000e+00 : f32
    %230 = vector.broadcast %cst_73 : f32 to vector<8x128xf32>
    %cst_74 = arith.constant 0.000000e+00 : f32
    %231 = vector.broadcast %cst_74 : f32 to vector<8x128xf32>
    %c0_i32_75 = arith.constant 0 : i32
    %232 = arith.index_cast %c0_i32_75 : i32 to index
    %c0_76 = arith.constant 0 : index
    %c0_77 = arith.constant 0 : index
    %233 = vector.load %arg14[%232, %c0_76, %c0_77] : memref<8x8x512xf32, #tpu.memory_space<vmem>>, vector<1x8x512xf32>
    %234 = vector.shape_cast %233 : vector<1x8x512xf32> to vector<8x512xf32>
    %235 = arith.truncf %230 : vector<8x128xf32> to vector<8x128xbf16>
    %cst_78 = arith.constant dense<0.000000e+00> : vector<8x512xf32>
    %236 = tpu.matmul %235, %229, %cst_78 {dimension_numbers = #tpu.dot_dimension_numbers<[1], [0], [0], [1], [0, 0, 1, 1], [], []>} : vector<8x128xbf16>, vector<128x512xbf16>, vector<8x512xf32> -> vector<8x512xf32>
    %237 = arith.addf %234, %236 : vector<8x512xf32>
    %238 = vector.extract_strided_slice %237 {offsets = [0, 0], sizes = [8, 384], strides = [1, 1]} : vector<8x512xf32> to vector<8x384xf32>
    %239 = arith.negf %238 : vector<8x384xf32>
    %240 = math.exp %239 : vector<8x384xf32>
    %cst_79 = arith.constant 1.000000e+00 : f32
    %241 = vector.broadcast %cst_79 : f32 to vector<8x384xf32>
    %242 = arith.addf %241, %240 : vector<8x384xf32>
    %243 = arith.divf %241, %242 : vector<8x384xf32>
    %244 = vector.extract_strided_slice %237 {offsets = [0, 384], sizes = [8, 128], strides = [1, 1]} : vector<8x512xf32> to vector<8x128xf32>
    %245 = math.tanh %244 : vector<8x128xf32>
    %246 = vector.extract_strided_slice %243 {offsets = [0, 0], sizes = [8, 128], strides = [1, 1]} : vector<8x384xf32> to vector<8x128xf32>
    %247 = vector.extract_strided_slice %243 {offsets = [0, 128], sizes = [8, 128], strides = [1, 1]} : vector<8x384xf32> to vector<8x128xf32>
    %248 = vector.extract_strided_slice %243 {offsets = [0, 256], sizes = [8, 128], strides = [1, 1]} : vector<8x384xf32> to vector<8x128xf32>
    %249 = arith.mulf %247, %231 : vector<8x128xf32>
    %250 = arith.mulf %246, %245 : vector<8x128xf32>
    %251 = arith.addf %249, %250 : vector<8x128xf32>
    %252 = math.tanh %251 : vector<8x128xf32>
    %253 = arith.mulf %248, %252 : vector<8x128xf32>
    %254 = arith.index_cast %c0_i32_75 : i32 to index
    %c0_80 = arith.constant 0 : index
    %c0_81 = arith.constant 0 : index
    %255 = vector.load %arg13[%254, %c0_80, %c0_81] : memref<8x8x128xf32, #tpu.memory_space<vmem>>, vector<1x8x128xf32>
    %256 = vector.shape_cast %255 : vector<1x8x128xf32> to vector<8x128xf32>
    %257 = vector.shape_cast %253 : vector<8x128xf32> to vector<1x8x128xf32>
    tpu.vector_store %arg13[%254, %c0_80, %c0_81], %257 {strides = array<i32>} : memref<8x8x128xf32, #tpu.memory_space<vmem>>, vector<1x8x128xf32>,
    %c1_i32_82 = arith.constant 1 : i32
    %258 = arith.index_cast %c1_i32_82 : i32 to index
    %c0_83 = arith.constant 0 : index
    %c0_84 = arith.constant 0 : index
    %259 = vector.load %arg14[%258, %c0_83, %c0_84] : memref<8x8x512xf32, #tpu.memory_space<vmem>>, vector<1x8x512xf32>
    %260 = vector.shape_cast %259 : vector<1x8x512xf32> to vector<8x512xf32>
    %261 = arith.truncf %253 : vector<8x128xf32> to vector<8x128xbf16>
    %cst_85 = arith.constant dense<0.000000e+00> : vector<8x512xf32>
    %262 = tpu.matmul %261, %229, %cst_85 {dimension_numbers = #tpu.dot_dimension_numbers<[1], [0], [0], [1], [0, 0, 1, 1], [], []>} : vector<8x128xbf16>, vector<128x512xbf16>, vector<8x512xf32> -> vector<8x512xf32>
    %263 = arith.addf %260, %262 : vector<8x512xf32>
    %264 = vector.extract_strided_slice %263 {offsets = [0, 0], sizes = [8, 384], strides = [1, 1]} : vector<8x512xf32> to vector<8x384xf32>
    %265 = arith.negf %264 : vector<8x384xf32>
    %266 = math.exp %265 : vector<8x384xf32>
    %cst_86 = arith.constant 1.000000e+00 : f32
    %267 = vector.broadcast %cst_86 : f32 to vector<8x384xf32>
    %268 = arith.addf %267, %266 : vector<8x384xf32>
    %269 = arith.divf %267, %268 : vector<8x384xf32>
    %270 = vector.extract_strided_slice %263 {offsets = [0, 384], sizes = [8, 128], strides = [1, 1]} : vector<8x512xf32> to vector<8x128xf32>
    %271 = math.tanh %270 : vector<8x128xf32>
    %272 = vector.extract_strided_slice %269 {offsets = [0, 0], sizes = [8, 128], strides = [1, 1]} : vector<8x384xf32> to vector<8x128xf32>
    %273 = vector.extract_strided_slice %269 {offsets = [0, 128], sizes = [8, 128], strides = [1, 1]} : vector<8x384xf32> to vector<8x128xf32>
    %274 = vector.extract_strided_slice %269 {offsets = [0, 256], sizes = [8, 128], strides = [1, 1]} : vector<8x384xf32> to vector<8x128xf32>
    %275 = arith.mulf %273, %251 : vector<8x128xf32>
    %276 = arith.mulf %272, %271 : vector<8x128xf32>
    %277 = arith.addf %275, %276 : vector<8x128xf32>
    %278 = math.tanh %277 : vector<8x128xf32>
    %279 = arith.mulf %274, %278 : vector<8x128xf32>
    %280 = arith.index_cast %c1_i32_82 : i32 to index
    %c0_87 = arith.constant 0 : index
    %c0_88 = arith.constant 0 : index
    %281 = vector.load %arg13[%280, %c0_87, %c0_88] : memref<8x8x128xf32, #tpu.memory_space<vmem>>, vector<1x8x128xf32>
    %282 = vector.shape_cast %281 : vector<1x8x128xf32> to vector<8x128xf32>
    %283 = vector.shape_cast %279 : vector<8x128xf32> to vector<1x8x128xf32>
    tpu.vector_store %arg13[%280, %c0_87, %c0_88], %283 {strides = array<i32>} : memref<8x8x128xf32, #tpu.memory_space<vmem>>, vector<1x8x128xf32>,
    %c2_i32_89 = arith.constant 2 : i32
    %284 = arith.index_cast %c2_i32_89 : i32 to index
    %c0_90 = arith.constant 0 : index
    %c0_91 = arith.constant 0 : index
    %285 = vector.load %arg14[%284, %c0_90, %c0_91] : memref<8x8x512xf32, #tpu.memory_space<vmem>>, vector<1x8x512xf32>
    %286 = vector.shape_cast %285 : vector<1x8x512xf32> to vector<8x512xf32>
    %287 = arith.truncf %279 : vector<8x128xf32> to vector<8x128xbf16>
    %cst_92 = arith.constant dense<0.000000e+00> : vector<8x512xf32>
    %288 = tpu.matmul %287, %229, %cst_92 {dimension_numbers = #tpu.dot_dimension_numbers<[1], [0], [0], [1], [0, 0, 1, 1], [], []>} : vector<8x128xbf16>, vector<128x512xbf16>, vector<8x512xf32> -> vector<8x512xf32>
    %289 = arith.addf %286, %288 : vector<8x512xf32>
    %290 = vector.extract_strided_slice %289 {offsets = [0, 0], sizes = [8, 384], strides = [1, 1]} : vector<8x512xf32> to vector<8x384xf32>
    %291 = arith.negf %290 : vector<8x384xf32>
    %292 = math.exp %291 : vector<8x384xf32>
    %cst_93 = arith.constant 1.000000e+00 : f32
    %293 = vector.broadcast %cst_93 : f32 to vector<8x384xf32>
    %294 = arith.addf %293, %292 : vector<8x384xf32>
    %295 = arith.divf %293, %294 : vector<8x384xf32>
    %296 = vector.extract_strided_slice %289 {offsets = [0, 384], sizes = [8, 128], strides = [1, 1]} : vector<8x512xf32> to vector<8x128xf32>
    %297 = math.tanh %296 : vector<8x128xf32>
    %298 = vector.extract_strided_slice %295 {offsets = [0, 0], sizes = [8, 128], strides = [1, 1]} : vector<8x384xf32> to vector<8x128xf32>
    %299 = vector.extract_strided_slice %295 {offsets = [0, 128], sizes = [8, 128], strides = [1, 1]} : vector<8x384xf32> to vector<8x128xf32>
    %300 = vector.extract_strided_slice %295 {offsets = [0, 256], sizes = [8, 128], strides = [1, 1]} : vector<8x384xf32> to vector<8x128xf32>
    %301 = arith.mulf %299, %277 : vector<8x128xf32>
    %302 = arith.mulf %298, %297 : vector<8x128xf32>
    %303 = arith.addf %301, %302 : vector<8x128xf32>
    %304 = math.tanh %303 : vector<8x128xf32>
    %305 = arith.mulf %300, %304 : vector<8x128xf32>
    %306 = arith.index_cast %c2_i32_89 : i32 to index
    %c0_94 = arith.constant 0 : index
    %c0_95 = arith.constant 0 : index
    %307 = vector.load %arg13[%306, %c0_94, %c0_95] : memref<8x8x128xf32, #tpu.memory_space<vmem>>, vector<1x8x128xf32>
    %308 = vector.shape_cast %307 : vector<1x8x128xf32> to vector<8x128xf32>
    %309 = vector.shape_cast %305 : vector<8x128xf32> to vector<1x8x128xf32>
    tpu.vector_store %arg13[%306, %c0_94, %c0_95], %309 {strides = array<i32>} : memref<8x8x128xf32, #tpu.memory_space<vmem>>, vector<1x8x128xf32>,
    %c3_i32_96 = arith.constant 3 : i32
    %310 = arith.index_cast %c3_i32_96 : i32 to index
    %c0_97 = arith.constant 0 : index
    %c0_98 = arith.constant 0 : index
    %311 = vector.load %arg14[%310, %c0_97, %c0_98] : memref<8x8x512xf32, #tpu.memory_space<vmem>>, vector<1x8x512xf32>
    %312 = vector.shape_cast %311 : vector<1x8x512xf32> to vector<8x512xf32>
    %313 = arith.truncf %305 : vector<8x128xf32> to vector<8x128xbf16>
    %cst_99 = arith.constant dense<0.000000e+00> : vector<8x512xf32>
    %314 = tpu.matmul %313, %229, %cst_99 {dimension_numbers = #tpu.dot_dimension_numbers<[1], [0], [0], [1], [0, 0, 1, 1], [], []>} : vector<8x128xbf16>, vector<128x512xbf16>, vector<8x512xf32> -> vector<8x512xf32>
    %315 = arith.addf %312, %314 : vector<8x512xf32>
    %316 = vector.extract_strided_slice %315 {offsets = [0, 0], sizes = [8, 384], strides = [1, 1]} : vector<8x512xf32> to vector<8x384xf32>
    %317 = arith.negf %316 : vector<8x384xf32>
    %318 = math.exp %317 : vector<8x384xf32>
    %cst_100 = arith.constant 1.000000e+00 : f32
    %319 = vector.broadcast %cst_100 : f32 to vector<8x384xf32>
    %320 = arith.addf %319, %318 : vector<8x384xf32>
    %321 = arith.divf %319, %320 : vector<8x384xf32>
    %322 = vector.extract_strided_slice %315 {offsets = [0, 384], sizes = [8, 128], strides = [1, 1]} : vector<8x512xf32> to vector<8x128xf32>
    %323 = math.tanh %322 : vector<8x128xf32>
    %324 = vector.extract_strided_slice %321 {offsets = [0, 0], sizes = [8, 128], strides = [1, 1]} : vector<8x384xf32> to vector<8x128xf32>
    %325 = vector.extract_strided_slice %321 {offsets = [0, 128], sizes = [8, 128], strides = [1, 1]} : vector<8x384xf32> to vector<8x128xf32>
    %326 = vector.extract_strided_slice %321 {offsets = [0, 256], sizes = [8, 128], strides = [1, 1]} : vector<8x384xf32> to vector<8x128xf32>
    %327 = arith.mulf %325, %303 : vector<8x128xf32>
    %328 = arith.mulf %324, %323 : vector<8x128xf32>
    %329 = arith.addf %327, %328 : vector<8x128xf32>
    %330 = math.tanh %329 : vector<8x128xf32>
    %331 = arith.mulf %326, %330 : vector<8x128xf32>
    %332 = arith.index_cast %c3_i32_96 : i32 to index
    %c0_101 = arith.constant 0 : index
    %c0_102 = arith.constant 0 : index
    %333 = vector.load %arg13[%332, %c0_101, %c0_102] : memref<8x8x128xf32, #tpu.memory_space<vmem>>, vector<1x8x128xf32>
    %334 = vector.shape_cast %333 : vector<1x8x128xf32> to vector<8x128xf32>
    %335 = vector.shape_cast %331 : vector<8x128xf32> to vector<1x8x128xf32>
    tpu.vector_store %arg13[%332, %c0_101, %c0_102], %335 {strides = array<i32>} : memref<8x8x128xf32, #tpu.memory_space<vmem>>, vector<1x8x128xf32>,
    %c4_i32_103 = arith.constant 4 : i32
    %336 = arith.index_cast %c4_i32_103 : i32 to index
    %c0_104 = arith.constant 0 : index
    %c0_105 = arith.constant 0 : index
    %337 = vector.load %arg14[%336, %c0_104, %c0_105] : memref<8x8x512xf32, #tpu.memory_space<vmem>>, vector<1x8x512xf32>
    %338 = vector.shape_cast %337 : vector<1x8x512xf32> to vector<8x512xf32>
    %339 = arith.truncf %331 : vector<8x128xf32> to vector<8x128xbf16>
    %cst_106 = arith.constant dense<0.000000e+00> : vector<8x512xf32>
    %340 = tpu.matmul %339, %229, %cst_106 {dimension_numbers = #tpu.dot_dimension_numbers<[1], [0], [0], [1], [0, 0, 1, 1], [], []>} : vector<8x128xbf16>, vector<128x512xbf16>, vector<8x512xf32> -> vector<8x512xf32>
    %341 = arith.addf %338, %340 : vector<8x512xf32>
    %342 = vector.extract_strided_slice %341 {offsets = [0, 0], sizes = [8, 384], strides = [1, 1]} : vector<8x512xf32> to vector<8x384xf32>
    %343 = arith.negf %342 : vector<8x384xf32>
    %344 = math.exp %343 : vector<8x384xf32>
    %cst_107 = arith.constant 1.000000e+00 : f32
    %345 = vector.broadcast %cst_107 : f32 to vector<8x384xf32>
    %346 = arith.addf %345, %344 : vector<8x384xf32>
    %347 = arith.divf %345, %346 : vector<8x384xf32>
    %348 = vector.extract_strided_slice %341 {offsets = [0, 384], sizes = [8, 128], strides = [1, 1]} : vector<8x512xf32> to vector<8x128xf32>
    %349 = math.tanh %348 : vector<8x128xf32>
    %350 = vector.extract_strided_slice %347 {offsets = [0, 0], sizes = [8, 128], strides = [1, 1]} : vector<8x384xf32> to vector<8x128xf32>
    %351 = vector.extract_strided_slice %347 {offsets = [0, 128], sizes = [8, 128], strides = [1, 1]} : vector<8x384xf32> to vector<8x128xf32>
    %352 = vector.extract_strided_slice %347 {offsets = [0, 256], sizes = [8, 128], strides = [1, 1]} : vector<8x384xf32> to vector<8x128xf32>
    %353 = arith.mulf %351, %329 : vector<8x128xf32>
    %354 = arith.mulf %350, %349 : vector<8x128xf32>
    %355 = arith.addf %353, %354 : vector<8x128xf32>
    %356 = math.tanh %355 : vector<8x128xf32>
    %357 = arith.mulf %352, %356 : vector<8x128xf32>
    %358 = arith.index_cast %c4_i32_103 : i32 to index
    %c0_108 = arith.constant 0 : index
    %c0_109 = arith.constant 0 : index
    %359 = vector.load %arg13[%358, %c0_108, %c0_109] : memref<8x8x128xf32, #tpu.memory_space<vmem>>, vector<1x8x128xf32>
    %360 = vector.shape_cast %359 : vector<1x8x128xf32> to vector<8x128xf32>
    %361 = vector.shape_cast %357 : vector<8x128xf32> to vector<1x8x128xf32>
    tpu.vector_store %arg13[%358, %c0_108, %c0_109], %361 {strides = array<i32>} : memref<8x8x128xf32, #tpu.memory_space<vmem>>, vector<1x8x128xf32>,
    %c5_i32_110 = arith.constant 5 : i32
    %362 = arith.index_cast %c5_i32_110 : i32 to index
    %c0_111 = arith.constant 0 : index
    %c0_112 = arith.constant 0 : index
    %363 = vector.load %arg14[%362, %c0_111, %c0_112] : memref<8x8x512xf32, #tpu.memory_space<vmem>>, vector<1x8x512xf32>
    %364 = vector.shape_cast %363 : vector<1x8x512xf32> to vector<8x512xf32>
    %365 = arith.truncf %357 : vector<8x128xf32> to vector<8x128xbf16>
    %cst_113 = arith.constant dense<0.000000e+00> : vector<8x512xf32>
    %366 = tpu.matmul %365, %229, %cst_113 {dimension_numbers = #tpu.dot_dimension_numbers<[1], [0], [0], [1], [0, 0, 1, 1], [], []>} : vector<8x128xbf16>, vector<128x512xbf16>, vector<8x512xf32> -> vector<8x512xf32>
    %367 = arith.addf %364, %366 : vector<8x512xf32>
    %368 = vector.extract_strided_slice %367 {offsets = [0, 0], sizes = [8, 384], strides = [1, 1]} : vector<8x512xf32> to vector<8x384xf32>
    %369 = arith.negf %368 : vector<8x384xf32>
    %370 = math.exp %369 : vector<8x384xf32>
    %cst_114 = arith.constant 1.000000e+00 : f32
    %371 = vector.broadcast %cst_114 : f32 to vector<8x384xf32>
    %372 = arith.addf %371, %370 : vector<8x384xf32>
    %373 = arith.divf %371, %372 : vector<8x384xf32>
    %374 = vector.extract_strided_slice %367 {offsets = [0, 384], sizes = [8, 128], strides = [1, 1]} : vector<8x512xf32> to vector<8x128xf32>
    %375 = math.tanh %374 : vector<8x128xf32>
    %376 = vector.extract_strided_slice %373 {offsets = [0, 0], sizes = [8, 128], strides = [1, 1]} : vector<8x384xf32> to vector<8x128xf32>
    %377 = vector.extract_strided_slice %373 {offsets = [0, 128], sizes = [8, 128], strides = [1, 1]} : vector<8x384xf32> to vector<8x128xf32>
    %378 = vector.extract_strided_slice %373 {offsets = [0, 256], sizes = [8, 128], strides = [1, 1]} : vector<8x384xf32> to vector<8x128xf32>
    %379 = arith.mulf %377, %355 : vector<8x128xf32>
    %380 = arith.mulf %376, %375 : vector<8x128xf32>
    %381 = arith.addf %379, %380 : vector<8x128xf32>
    %382 = math.tanh %381 : vector<8x128xf32>
    %383 = arith.mulf %378, %382 : vector<8x128xf32>
    %384 = arith.index_cast %c5_i32_110 : i32 to index
    %c0_115 = arith.constant 0 : index
    %c0_116 = arith.constant 0 : index
    %385 = vector.load %arg13[%384, %c0_115, %c0_116] : memref<8x8x128xf32, #tpu.memory_space<vmem>>, vector<1x8x128xf32>
    %386 = vector.shape_cast %385 : vector<1x8x128xf32> to vector<8x128xf32>
    %387 = vector.shape_cast %383 : vector<8x128xf32> to vector<1x8x128xf32>
    tpu.vector_store %arg13[%384, %c0_115, %c0_116], %387 {strides = array<i32>} : memref<8x8x128xf32, #tpu.memory_space<vmem>>, vector<1x8x128xf32>,
    %c6_i32_117 = arith.constant 6 : i32
    %388 = arith.index_cast %c6_i32_117 : i32 to index
    %c0_118 = arith.constant 0 : index
    %c0_119 = arith.constant 0 : index
    %389 = vector.load %arg14[%388, %c0_118, %c0_119] : memref<8x8x512xf32, #tpu.memory_space<vmem>>, vector<1x8x512xf32>
    %390 = vector.shape_cast %389 : vector<1x8x512xf32> to vector<8x512xf32>
    %391 = arith.truncf %383 : vector<8x128xf32> to vector<8x128xbf16>
    %cst_120 = arith.constant dense<0.000000e+00> : vector<8x512xf32>
    %392 = tpu.matmul %391, %229, %cst_120 {dimension_numbers = #tpu.dot_dimension_numbers<[1], [0], [0], [1], [0, 0, 1, 1], [], []>} : vector<8x128xbf16>, vector<128x512xbf16>, vector<8x512xf32> -> vector<8x512xf32>
    %393 = arith.addf %390, %392 : vector<8x512xf32>
    %394 = vector.extract_strided_slice %393 {offsets = [0, 0], sizes = [8, 384], strides = [1, 1]} : vector<8x512xf32> to vector<8x384xf32>
    %395 = arith.negf %394 : vector<8x384xf32>
    %396 = math.exp %395 : vector<8x384xf32>
    %cst_121 = arith.constant 1.000000e+00 : f32
    %397 = vector.broadcast %cst_121 : f32 to vector<8x384xf32>
    %398 = arith.addf %397, %396 : vector<8x384xf32>
    %399 = arith.divf %397, %398 : vector<8x384xf32>
    %400 = vector.extract_strided_slice %393 {offsets = [0, 384], sizes = [8, 128], strides = [1, 1]} : vector<8x512xf32> to vector<8x128xf32>
    %401 = math.tanh %400 : vector<8x128xf32>
    %402 = vector.extract_strided_slice %399 {offsets = [0, 0], sizes = [8, 128], strides = [1, 1]} : vector<8x384xf32> to vector<8x128xf32>
    %403 = vector.extract_strided_slice %399 {offsets = [0, 128], sizes = [8, 128], strides = [1, 1]} : vector<8x384xf32> to vector<8x128xf32>
    %404 = vector.extract_strided_slice %399 {offsets = [0, 256], sizes = [8, 128], strides = [1, 1]} : vector<8x384xf32> to vector<8x128xf32>
    %405 = arith.mulf %403, %381 : vector<8x128xf32>
    %406 = arith.mulf %402, %401 : vector<8x128xf32>
    %407 = arith.addf %405, %406 : vector<8x128xf32>
    %408 = math.tanh %407 : vector<8x128xf32>
    %409 = arith.mulf %404, %408 : vector<8x128xf32>
    %410 = arith.index_cast %c6_i32_117 : i32 to index
    %c0_122 = arith.constant 0 : index
    %c0_123 = arith.constant 0 : index
    %411 = vector.load %arg13[%410, %c0_122, %c0_123] : memref<8x8x128xf32, #tpu.memory_space<vmem>>, vector<1x8x128xf32>
    %412 = vector.shape_cast %411 : vector<1x8x128xf32> to vector<8x128xf32>
    %413 = vector.shape_cast %409 : vector<8x128xf32> to vector<1x8x128xf32>
    tpu.vector_store %arg13[%410, %c0_122, %c0_123], %413 {strides = array<i32>} : memref<8x8x128xf32, #tpu.memory_space<vmem>>, vector<1x8x128xf32>,
    %c7_i32_124 = arith.constant 7 : i32
    %414 = arith.index_cast %c7_i32_124 : i32 to index
    %c0_125 = arith.constant 0 : index
    %c0_126 = arith.constant 0 : index
    %415 = vector.load %arg14[%414, %c0_125, %c0_126] : memref<8x8x512xf32, #tpu.memory_space<vmem>>, vector<1x8x512xf32>
    %416 = vector.shape_cast %415 : vector<1x8x512xf32> to vector<8x512xf32>
    %417 = arith.truncf %409 : vector<8x128xf32> to vector<8x128xbf16>
    %cst_127 = arith.constant dense<0.000000e+00> : vector<8x512xf32>
    %418 = tpu.matmul %417, %229, %cst_127 {dimension_numbers = #tpu.dot_dimension_numbers<[1], [0], [0], [1], [0, 0, 1, 1], [], []>} : vector<8x128xbf16>, vector<128x512xbf16>, vector<8x512xf32> -> vector<8x512xf32>
    %419 = arith.addf %416, %418 : vector<8x512xf32>
    %420 = vector.extract_strided_slice %419 {offsets = [0, 0], sizes = [8, 384], strides = [1, 1]} : vector<8x512xf32> to vector<8x384xf32>
    %421 = arith.negf %420 : vector<8x384xf32>
    %422 = math.exp %421 : vector<8x384xf32>
    %cst_128 = arith.constant 1.000000e+00 : f32
    %423 = vector.broadcast %cst_128 : f32 to vector<8x384xf32>
    %424 = arith.addf %423, %422 : vector<8x384xf32>
    %425 = arith.divf %423, %424 : vector<8x384xf32>
    %426 = vector.extract_strided_slice %419 {offsets = [0, 384], sizes = [8, 128], strides = [1, 1]} : vector<8x512xf32> to vector<8x128xf32>
    %427 = math.tanh %426 : vector<8x128xf32>
    %428 = vector.extract_strided_slice %425 {offsets = [0, 0], sizes = [8, 128], strides = [1, 1]} : vector<8x384xf32> to vector<8x128xf32>
    %429 = vector.extract_strided_slice %425 {offsets = [0, 128], sizes = [8, 128], strides = [1, 1]} : vector<8x384xf32> to vector<8x128xf32>
    %430 = vector.extract_strided_slice %425 {offsets = [0, 256], sizes = [8, 128], strides = [1, 1]} : vector<8x384xf32> to vector<8x128xf32>
    %431 = arith.mulf %429, %407 : vector<8x128xf32>
    %432 = arith.mulf %428, %427 : vector<8x128xf32>
    %433 = arith.addf %431, %432 : vector<8x128xf32>
    %434 = math.tanh %433 : vector<8x128xf32>
    %435 = arith.mulf %430, %434 : vector<8x128xf32>
    %436 = arith.index_cast %c7_i32_124 : i32 to index
    %c0_129 = arith.constant 0 : index
    %c0_130 = arith.constant 0 : index
    %437 = vector.load %arg13[%436, %c0_129, %c0_130] : memref<8x8x128xf32, #tpu.memory_space<vmem>>, vector<1x8x128xf32>
    %438 = vector.shape_cast %437 : vector<1x8x128xf32> to vector<8x128xf32>
    %439 = vector.shape_cast %435 : vector<8x128xf32> to vector<1x8x128xf32>
    tpu.vector_store %arg13[%436, %c0_129, %c0_130], %439 {strides = array<i32>} : memref<8x8x128xf32, #tpu.memory_space<vmem>>, vector<1x8x128xf32>,
    %c8_i32_131 = arith.constant 8 : i32
    %c0_132 = arith.constant 0 : index
    %c0_133 = arith.constant 0 : index
    %c0_134 = arith.constant 0 : index
    %440 = vector.load %arg13[%c0_132, %c0_133, %c0_134] : memref<8x8x128xf32, #tpu.memory_space<vmem>>, vector<8x8x128xf32>
    %441 = vector.shape_cast %440 : vector<8x8x128xf32> to vector<64x128xf32>
    %442 = arith.truncf %441 : vector<64x128xf32> to vector<64x128xbf16>
    %c0_135 = arith.constant 0 : index
    %c0_136 = arith.constant 0 : index
    %443 = vector.load %arg7[%c0_135, %c0_136] : memref<128x512xbf16, #tpu.memory_space<vmem>>, vector<128x512xbf16>
    %cst_137 = arith.constant dense<0.000000e+00> : vector<64x512xf32>
    %444 = tpu.matmul %442, %443, %cst_137 {dimension_numbers = #tpu.dot_dimension_numbers<[1], [0], [0], [1], [0, 0, 1, 1], [], []>} : vector<64x128xbf16>, vector<128x512xbf16>, vector<64x512xf32> -> vector<64x512xf32>
    %c0_138 = arith.constant 0 : index
    %c0_139 = arith.constant 0 : index
    %445 = vector.load %arg9[%c0_138, %c0_139] : memref<1x512xf32, #tpu.memory_space<vmem>>, vector<1x512xf32>
    %446 = vector.broadcast %445 : vector<1x512xf32> to vector<64x512xf32>
    %447 = arith.addf %444, %446 : vector<64x512xf32>
    %448 = vector.shape_cast %447 : vector<64x512xf32> to vector<8x8x512xf32>
    %c0_140 = arith.constant 0 : index
    %c0_141 = arith.constant 0 : index
    %c0_142 = arith.constant 0 : index
    %449 = vector.load %arg14[%c0_140, %c0_141, %c0_142] : memref<8x8x512xf32, #tpu.memory_space<vmem>>, vector<8x8x512xf32>
    tpu.vector_store %arg14[%c0_140, %c0_141, %c0_142], %448 {strides = array<i32>} : memref<8x8x512xf32, #tpu.memory_space<vmem>>, vector<8x8x512xf32>,
    %c0_143 = arith.constant 0 : index
    %c0_144 = arith.constant 0 : index
    %450 = vector.load %arg8[%c0_143, %c0_144] : memref<128x512xbf16, #tpu.memory_space<vmem>>, vector<128x512xbf16>
    %cst_145 = arith.constant 0.000000e+00 : f32
    %451 = vector.broadcast %cst_145 : f32 to vector<8x128xf32>
    %cst_146 = arith.constant 0.000000e+00 : f32
    %452 = vector.broadcast %cst_146 : f32 to vector<8x128xf32>
    %c0_i32_147 = arith.constant 0 : i32
    %453 = arith.index_cast %c0_i32_147 : i32 to index
    %c0_148 = arith.constant 0 : index
    %c0_149 = arith.constant 0 : index
    %454 = vector.load %arg14[%453, %c0_148, %c0_149] : memref<8x8x512xf32, #tpu.memory_space<vmem>>, vector<1x8x512xf32>
    %455 = vector.shape_cast %454 : vector<1x8x512xf32> to vector<8x512xf32>
    %456 = arith.truncf %451 : vector<8x128xf32> to vector<8x128xbf16>
    %cst_150 = arith.constant dense<0.000000e+00> : vector<8x512xf32>
    %457 = tpu.matmul %456, %450, %cst_150 {dimension_numbers = #tpu.dot_dimension_numbers<[1], [0], [0], [1], [0, 0, 1, 1], [], []>} : vector<8x128xbf16>, vector<128x512xbf16>, vector<8x512xf32> -> vector<8x512xf32>
    %458 = arith.addf %455, %457 : vector<8x512xf32>
    %459 = vector.extract_strided_slice %458 {offsets = [0, 0], sizes = [8, 384], strides = [1, 1]} : vector<8x512xf32> to vector<8x384xf32>
    %460 = arith.negf %459 : vector<8x384xf32>
    %461 = math.exp %460 : vector<8x384xf32>
    %cst_151 = arith.constant 1.000000e+00 : f32
    %462 = vector.broadcast %cst_151 : f32 to vector<8x384xf32>
    %463 = arith.addf %462, %461 : vector<8x384xf32>
    %464 = arith.divf %462, %463 : vector<8x384xf32>
    %465 = vector.extract_strided_slice %458 {offsets = [0, 384], sizes = [8, 128], strides = [1, 1]} : vector<8x512xf32> to vector<8x128xf32>
    %466 = math.tanh %465 : vector<8x128xf32>
    %467 = vector.extract_strided_slice %464 {offsets = [0, 0], sizes = [8, 128], strides = [1, 1]} : vector<8x384xf32> to vector<8x128xf32>
    %468 = vector.extract_strided_slice %464 {offsets = [0, 128], sizes = [8, 128], strides = [1, 1]} : vector<8x384xf32> to vector<8x128xf32>
    %469 = vector.extract_strided_slice %464 {offsets = [0, 256], sizes = [8, 128], strides = [1, 1]} : vector<8x384xf32> to vector<8x128xf32>
    %470 = arith.mulf %468, %452 : vector<8x128xf32>
    %471 = arith.mulf %467, %466 : vector<8x128xf32>
    %472 = arith.addf %470, %471 : vector<8x128xf32>
    %473 = math.tanh %472 : vector<8x128xf32>
    %474 = arith.mulf %469, %473 : vector<8x128xf32>
    %c1_i32_152 = arith.constant 1 : i32
    %475 = arith.index_cast %c1_i32_152 : i32 to index
    %c0_153 = arith.constant 0 : index
    %c0_154 = arith.constant 0 : index
    %476 = vector.load %arg14[%475, %c0_153, %c0_154] : memref<8x8x512xf32, #tpu.memory_space<vmem>>, vector<1x8x512xf32>
    %477 = vector.shape_cast %476 : vector<1x8x512xf32> to vector<8x512xf32>
    %478 = arith.truncf %474 : vector<8x128xf32> to vector<8x128xbf16>
    %cst_155 = arith.constant dense<0.000000e+00> : vector<8x512xf32>
    %479 = tpu.matmul %478, %450, %cst_155 {dimension_numbers = #tpu.dot_dimension_numbers<[1], [0], [0], [1], [0, 0, 1, 1], [], []>} : vector<8x128xbf16>, vector<128x512xbf16>, vector<8x512xf32> -> vector<8x512xf32>
    %480 = arith.addf %477, %479 : vector<8x512xf32>
    %481 = vector.extract_strided_slice %480 {offsets = [0, 0], sizes = [8, 384], strides = [1, 1]} : vector<8x512xf32> to vector<8x384xf32>
    %482 = arith.negf %481 : vector<8x384xf32>
    %483 = math.exp %482 : vector<8x384xf32>
    %cst_156 = arith.constant 1.000000e+00 : f32
    %484 = vector.broadcast %cst_156 : f32 to vector<8x384xf32>
    %485 = arith.addf %484, %483 : vector<8x384xf32>
    %486 = arith.divf %484, %485 : vector<8x384xf32>
    %487 = vector.extract_strided_slice %480 {offsets = [0, 384], sizes = [8, 128], strides = [1, 1]} : vector<8x512xf32> to vector<8x128xf32>
    %488 = math.tanh %487 : vector<8x128xf32>
    %489 = vector.extract_strided_slice %486 {offsets = [0, 0], sizes = [8, 128], strides = [1, 1]} : vector<8x384xf32> to vector<8x128xf32>
    %490 = vector.extract_strided_slice %486 {offsets = [0, 128], sizes = [8, 128], strides = [1, 1]} : vector<8x384xf32> to vector<8x128xf32>
    %491 = vector.extract_strided_slice %486 {offsets = [0, 256], sizes = [8, 128], strides = [1, 1]} : vector<8x384xf32> to vector<8x128xf32>
    %492 = arith.mulf %490, %472 : vector<8x128xf32>
    %493 = arith.mulf %489, %488 : vector<8x128xf32>
    %494 = arith.addf %492, %493 : vector<8x128xf32>
    %495 = math.tanh %494 : vector<8x128xf32>
    %496 = arith.mulf %491, %495 : vector<8x128xf32>
    %c2_i32_157 = arith.constant 2 : i32
    %497 = arith.index_cast %c2_i32_157 : i32 to index
    %c0_158 = arith.constant 0 : index
    %c0_159 = arith.constant 0 : index
    %498 = vector.load %arg14[%497, %c0_158, %c0_159] : memref<8x8x512xf32, #tpu.memory_space<vmem>>, vector<1x8x512xf32>
    %499 = vector.shape_cast %498 : vector<1x8x512xf32> to vector<8x512xf32>
    %500 = arith.truncf %496 : vector<8x128xf32> to vector<8x128xbf16>
    %cst_160 = arith.constant dense<0.000000e+00> : vector<8x512xf32>
    %501 = tpu.matmul %500, %450, %cst_160 {dimension_numbers = #tpu.dot_dimension_numbers<[1], [0], [0], [1], [0, 0, 1, 1], [], []>} : vector<8x128xbf16>, vector<128x512xbf16>, vector<8x512xf32> -> vector<8x512xf32>
    %502 = arith.addf %499, %501 : vector<8x512xf32>
    %503 = vector.extract_strided_slice %502 {offsets = [0, 0], sizes = [8, 384], strides = [1, 1]} : vector<8x512xf32> to vector<8x384xf32>
    %504 = arith.negf %503 : vector<8x384xf32>
    %505 = math.exp %504 : vector<8x384xf32>
    %cst_161 = arith.constant 1.000000e+00 : f32
    %506 = vector.broadcast %cst_161 : f32 to vector<8x384xf32>
    %507 = arith.addf %506, %505 : vector<8x384xf32>
    %508 = arith.divf %506, %507 : vector<8x384xf32>
    %509 = vector.extract_strided_slice %502 {offsets = [0, 384], sizes = [8, 128], strides = [1, 1]} : vector<8x512xf32> to vector<8x128xf32>
    %510 = math.tanh %509 : vector<8x128xf32>
    %511 = vector.extract_strided_slice %508 {offsets = [0, 0], sizes = [8, 128], strides = [1, 1]} : vector<8x384xf32> to vector<8x128xf32>
    %512 = vector.extract_strided_slice %508 {offsets = [0, 128], sizes = [8, 128], strides = [1, 1]} : vector<8x384xf32> to vector<8x128xf32>
    %513 = vector.extract_strided_slice %508 {offsets = [0, 256], sizes = [8, 128], strides = [1, 1]} : vector<8x384xf32> to vector<8x128xf32>
    %514 = arith.mulf %512, %494 : vector<8x128xf32>
    %515 = arith.mulf %511, %510 : vector<8x128xf32>
    %516 = arith.addf %514, %515 : vector<8x128xf32>
    %517 = math.tanh %516 : vector<8x128xf32>
    %518 = arith.mulf %513, %517 : vector<8x128xf32>
    %c3_i32_162 = arith.constant 3 : i32
    %519 = arith.index_cast %c3_i32_162 : i32 to index
    %c0_163 = arith.constant 0 : index
    %c0_164 = arith.constant 0 : index
    %520 = vector.load %arg14[%519, %c0_163, %c0_164] : memref<8x8x512xf32, #tpu.memory_space<vmem>>, vector<1x8x512xf32>
    %521 = vector.shape_cast %520 : vector<1x8x512xf32> to vector<8x512xf32>
    %522 = arith.truncf %518 : vector<8x128xf32> to vector<8x128xbf16>
    %cst_165 = arith.constant dense<0.000000e+00> : vector<8x512xf32>
    %523 = tpu.matmul %522, %450, %cst_165 {dimension_numbers = #tpu.dot_dimension_numbers<[1], [0], [0], [1], [0, 0, 1, 1], [], []>} : vector<8x128xbf16>, vector<128x512xbf16>, vector<8x512xf32> -> vector<8x512xf32>
    %524 = arith.addf %521, %523 : vector<8x512xf32>
    %525 = vector.extract_strided_slice %524 {offsets = [0, 0], sizes = [8, 384], strides = [1, 1]} : vector<8x512xf32> to vector<8x384xf32>
    %526 = arith.negf %525 : vector<8x384xf32>
    %527 = math.exp %526 : vector<8x384xf32>
    %cst_166 = arith.constant 1.000000e+00 : f32
    %528 = vector.broadcast %cst_166 : f32 to vector<8x384xf32>
    %529 = arith.addf %528, %527 : vector<8x384xf32>
    %530 = arith.divf %528, %529 : vector<8x384xf32>
    %531 = vector.extract_strided_slice %524 {offsets = [0, 384], sizes = [8, 128], strides = [1, 1]} : vector<8x512xf32> to vector<8x128xf32>
    %532 = math.tanh %531 : vector<8x128xf32>
    %533 = vector.extract_strided_slice %530 {offsets = [0, 0], sizes = [8, 128], strides = [1, 1]} : vector<8x384xf32> to vector<8x128xf32>
    %534 = vector.extract_strided_slice %530 {offsets = [0, 128], sizes = [8, 128], strides = [1, 1]} : vector<8x384xf32> to vector<8x128xf32>
    %535 = vector.extract_strided_slice %530 {offsets = [0, 256], sizes = [8, 128], strides = [1, 1]} : vector<8x384xf32> to vector<8x128xf32>
    %536 = arith.mulf %534, %516 : vector<8x128xf32>
    %537 = arith.mulf %533, %532 : vector<8x128xf32>
    %538 = arith.addf %536, %537 : vector<8x128xf32>
    %539 = math.tanh %538 : vector<8x128xf32>
    %540 = arith.mulf %535, %539 : vector<8x128xf32>
    %c4_i32_167 = arith.constant 4 : i32
    %541 = arith.index_cast %c4_i32_167 : i32 to index
    %c0_168 = arith.constant 0 : index
    %c0_169 = arith.constant 0 : index
    %542 = vector.load %arg14[%541, %c0_168, %c0_169] : memref<8x8x512xf32, #tpu.memory_space<vmem>>, vector<1x8x512xf32>
    %543 = vector.shape_cast %542 : vector<1x8x512xf32> to vector<8x512xf32>
    %544 = arith.truncf %540 : vector<8x128xf32> to vector<8x128xbf16>
    %cst_170 = arith.constant dense<0.000000e+00> : vector<8x512xf32>
    %545 = tpu.matmul %544, %450, %cst_170 {dimension_numbers = #tpu.dot_dimension_numbers<[1], [0], [0], [1], [0, 0, 1, 1], [], []>} : vector<8x128xbf16>, vector<128x512xbf16>, vector<8x512xf32> -> vector<8x512xf32>
    %546 = arith.addf %543, %545 : vector<8x512xf32>
    %547 = vector.extract_strided_slice %546 {offsets = [0, 0], sizes = [8, 384], strides = [1, 1]} : vector<8x512xf32> to vector<8x384xf32>
    %548 = arith.negf %547 : vector<8x384xf32>
    %549 = math.exp %548 : vector<8x384xf32>
    %cst_171 = arith.constant 1.000000e+00 : f32
    %550 = vector.broadcast %cst_171 : f32 to vector<8x384xf32>
    %551 = arith.addf %550, %549 : vector<8x384xf32>
    %552 = arith.divf %550, %551 : vector<8x384xf32>
    %553 = vector.extract_strided_slice %546 {offsets = [0, 384], sizes = [8, 128], strides = [1, 1]} : vector<8x512xf32> to vector<8x128xf32>
    %554 = math.tanh %553 : vector<8x128xf32>
    %555 = vector.extract_strided_slice %552 {offsets = [0, 0], sizes = [8, 128], strides = [1, 1]} : vector<8x384xf32> to vector<8x128xf32>
    %556 = vector.extract_strided_slice %552 {offsets = [0, 128], sizes = [8, 128], strides = [1, 1]} : vector<8x384xf32> to vector<8x128xf32>
    %557 = vector.extract_strided_slice %552 {offsets = [0, 256], sizes = [8, 128], strides = [1, 1]} : vector<8x384xf32> to vector<8x128xf32>
    %558 = arith.mulf %556, %538 : vector<8x128xf32>
    %559 = arith.mulf %555, %554 : vector<8x128xf32>
    %560 = arith.addf %558, %559 : vector<8x128xf32>
    %561 = math.tanh %560 : vector<8x128xf32>
    %562 = arith.mulf %557, %561 : vector<8x128xf32>
    %c5_i32_172 = arith.constant 5 : i32
    %563 = arith.index_cast %c5_i32_172 : i32 to index
    %c0_173 = arith.constant 0 : index
    %c0_174 = arith.constant 0 : index
    %564 = vector.load %arg14[%563, %c0_173, %c0_174] : memref<8x8x512xf32, #tpu.memory_space<vmem>>, vector<1x8x512xf32>
    %565 = vector.shape_cast %564 : vector<1x8x512xf32> to vector<8x512xf32>
    %566 = arith.truncf %562 : vector<8x128xf32> to vector<8x128xbf16>
    %cst_175 = arith.constant dense<0.000000e+00> : vector<8x512xf32>
    %567 = tpu.matmul %566, %450, %cst_175 {dimension_numbers = #tpu.dot_dimension_numbers<[1], [0], [0], [1], [0, 0, 1, 1], [], []>} : vector<8x128xbf16>, vector<128x512xbf16>, vector<8x512xf32> -> vector<8x512xf32>
    %568 = arith.addf %565, %567 : vector<8x512xf32>
    %569 = vector.extract_strided_slice %568 {offsets = [0, 0], sizes = [8, 384], strides = [1, 1]} : vector<8x512xf32> to vector<8x384xf32>
    %570 = arith.negf %569 : vector<8x384xf32>
    %571 = math.exp %570 : vector<8x384xf32>
    %cst_176 = arith.constant 1.000000e+00 : f32
    %572 = vector.broadcast %cst_176 : f32 to vector<8x384xf32>
    %573 = arith.addf %572, %571 : vector<8x384xf32>
    %574 = arith.divf %572, %573 : vector<8x384xf32>
    %575 = vector.extract_strided_slice %568 {offsets = [0, 384], sizes = [8, 128], strides = [1, 1]} : vector<8x512xf32> to vector<8x128xf32>
    %576 = math.tanh %575 : vector<8x128xf32>
    %577 = vector.extract_strided_slice %574 {offsets = [0, 0], sizes = [8, 128], strides = [1, 1]} : vector<8x384xf32> to vector<8x128xf32>
    %578 = vector.extract_strided_slice %574 {offsets = [0, 128], sizes = [8, 128], strides = [1, 1]} : vector<8x384xf32> to vector<8x128xf32>
    %579 = vector.extract_strided_slice %574 {offsets = [0, 256], sizes = [8, 128], strides = [1, 1]} : vector<8x384xf32> to vector<8x128xf32>
    %580 = arith.mulf %578, %560 : vector<8x128xf32>
    %581 = arith.mulf %577, %576 : vector<8x128xf32>
    %582 = arith.addf %580, %581 : vector<8x128xf32>
    %583 = math.tanh %582 : vector<8x128xf32>
    %584 = arith.mulf %579, %583 : vector<8x128xf32>
    %c6_i32_177 = arith.constant 6 : i32
    %585 = arith.index_cast %c6_i32_177 : i32 to index
    %c0_178 = arith.constant 0 : index
    %c0_179 = arith.constant 0 : index
    %586 = vector.load %arg14[%585, %c0_178, %c0_179] : memref<8x8x512xf32, #tpu.memory_space<vmem>>, vector<1x8x512xf32>
    %587 = vector.shape_cast %586 : vector<1x8x512xf32> to vector<8x512xf32>
    %588 = arith.truncf %584 : vector<8x128xf32> to vector<8x128xbf16>
    %cst_180 = arith.constant dense<0.000000e+00> : vector<8x512xf32>
    %589 = tpu.matmul %588, %450, %cst_180 {dimension_numbers = #tpu.dot_dimension_numbers<[1], [0], [0], [1], [0, 0, 1, 1], [], []>} : vector<8x128xbf16>, vector<128x512xbf16>, vector<8x512xf32> -> vector<8x512xf32>
    %590 = arith.addf %587, %589 : vector<8x512xf32>
    %591 = vector.extract_strided_slice %590 {offsets = [0, 0], sizes = [8, 384], strides = [1, 1]} : vector<8x512xf32> to vector<8x384xf32>
    %592 = arith.negf %591 : vector<8x384xf32>
    %593 = math.exp %592 : vector<8x384xf32>
    %cst_181 = arith.constant 1.000000e+00 : f32
    %594 = vector.broadcast %cst_181 : f32 to vector<8x384xf32>
    %595 = arith.addf %594, %593 : vector<8x384xf32>
    %596 = arith.divf %594, %595 : vector<8x384xf32>
    %597 = vector.extract_strided_slice %590 {offsets = [0, 384], sizes = [8, 128], strides = [1, 1]} : vector<8x512xf32> to vector<8x128xf32>
    %598 = math.tanh %597 : vector<8x128xf32>
    %599 = vector.extract_strided_slice %596 {offsets = [0, 0], sizes = [8, 128], strides = [1, 1]} : vector<8x384xf32> to vector<8x128xf32>
    %600 = vector.extract_strided_slice %596 {offsets = [0, 128], sizes = [8, 128], strides = [1, 1]} : vector<8x384xf32> to vector<8x128xf32>
    %601 = vector.extract_strided_slice %596 {offsets = [0, 256], sizes = [8, 128], strides = [1, 1]} : vector<8x384xf32> to vector<8x128xf32>
    %602 = arith.mulf %600, %582 : vector<8x128xf32>
    %603 = arith.mulf %599, %598 : vector<8x128xf32>
    %604 = arith.addf %602, %603 : vector<8x128xf32>
    %605 = math.tanh %604 : vector<8x128xf32>
    %606 = arith.mulf %601, %605 : vector<8x128xf32>
    %c7_i32_182 = arith.constant 7 : i32
    %607 = arith.index_cast %c7_i32_182 : i32 to index
    %c0_183 = arith.constant 0 : index
    %c0_184 = arith.constant 0 : index
    %608 = vector.load %arg14[%607, %c0_183, %c0_184] : memref<8x8x512xf32, #tpu.memory_space<vmem>>, vector<1x8x512xf32>
    %609 = vector.shape_cast %608 : vector<1x8x512xf32> to vector<8x512xf32>
    %610 = arith.truncf %606 : vector<8x128xf32> to vector<8x128xbf16>
    %cst_185 = arith.constant dense<0.000000e+00> : vector<8x512xf32>
    %611 = tpu.matmul %610, %450, %cst_185 {dimension_numbers = #tpu.dot_dimension_numbers<[1], [0], [0], [1], [0, 0, 1, 1], [], []>} : vector<8x128xbf16>, vector<128x512xbf16>, vector<8x512xf32> -> vector<8x512xf32>
    %612 = arith.addf %609, %611 : vector<8x512xf32>
    %613 = vector.extract_strided_slice %612 {offsets = [0, 0], sizes = [8, 384], strides = [1, 1]} : vector<8x512xf32> to vector<8x384xf32>
    %614 = arith.negf %613 : vector<8x384xf32>
    %615 = math.exp %614 : vector<8x384xf32>
    %cst_186 = arith.constant 1.000000e+00 : f32
    %616 = vector.broadcast %cst_186 : f32 to vector<8x384xf32>
    %617 = arith.addf %616, %615 : vector<8x384xf32>
    %618 = arith.divf %616, %617 : vector<8x384xf32>
    %619 = vector.extract_strided_slice %612 {offsets = [0, 384], sizes = [8, 128], strides = [1, 1]} : vector<8x512xf32> to vector<8x128xf32>
    %620 = math.tanh %619 : vector<8x128xf32>
    %621 = vector.extract_strided_slice %618 {offsets = [0, 0], sizes = [8, 128], strides = [1, 1]} : vector<8x384xf32> to vector<8x128xf32>
    %622 = vector.extract_strided_slice %618 {offsets = [0, 128], sizes = [8, 128], strides = [1, 1]} : vector<8x384xf32> to vector<8x128xf32>
    %623 = vector.extract_strided_slice %618 {offsets = [0, 256], sizes = [8, 128], strides = [1, 1]} : vector<8x384xf32> to vector<8x128xf32>
    %624 = arith.mulf %622, %604 : vector<8x128xf32>
    %625 = arith.mulf %621, %620 : vector<8x128xf32>
    %626 = arith.addf %624, %625 : vector<8x128xf32>
    %627 = math.tanh %626 : vector<8x128xf32>
    %628 = arith.mulf %623, %627 : vector<8x128xf32>
    %c8_i32_187 = arith.constant 8 : i32
    %629 = arith.truncf %628 : vector<8x128xf32> to vector<8x128xbf16>
    %c0_188 = arith.constant 0 : index
    %c0_189 = arith.constant 0 : index
    %630 = vector.load %arg10[%c0_188, %c0_189] : memref<128x128xbf16, #tpu.memory_space<vmem>>, vector<128x128xbf16>
    %cst_190 = arith.constant dense<0.000000e+00> : vector<8x128xf32>
    %631 = tpu.matmul %629, %630, %cst_190 {dimension_numbers = #tpu.dot_dimension_numbers<[1], [0], [0], [1], [0, 0, 1, 1], [], []>} : vector<8x128xbf16>, vector<128x128xbf16>, vector<8x128xf32> -> vector<8x128xf32>
    %c0_191 = arith.constant 0 : index
    %c0_192 = arith.constant 0 : index
    %632 = vector.load %arg11[%c0_191, %c0_192] : memref<1x128xf32, #tpu.memory_space<vmem>>, vector<1x128xf32>
    %633 = vector.broadcast %632 : vector<1x128xf32> to vector<8x128xf32>
    %634 = arith.addf %631, %633 : vector<8x128xf32>
    %cst_193 = arith.constant 0.000000e+00 : f32
    %635 = vector.broadcast %cst_193 : f32 to vector<8x128xf32>
    %636 = arith.maximumf %634, %635 : vector<8x128xf32>
    %c0_194 = arith.constant 0 : index
    %c0_195 = arith.constant 0 : index
    %637 = vector.load %arg12[%c0_194, %c0_195] : memref<8x128xf32, #tpu.memory_space<vmem>>, vector<8x128xf32>
    tpu.vector_store %arg12[%c0_194, %c0_195], %636 {strides = array<i32>} : memref<8x128xf32, #tpu.memory_space<vmem>>, vector<8x128xf32>,
    return
  }
}

</mosaic_0001>

<bundles_post_ra>
// kernel: lstm_model_forward.1
= control target key start
LH: loop header
LB: loop body
LE: loop exit
PB: predicated region body
PF: predicated region fallthrough
CT: control target
= control target key end

     0   :  { %17 = vsyncpa [#allocation5], 0  ;;  %s7989_s0 = inlined_call_operand.vmem [shape: bf16[64,128], index: 0, kind: input, shape index: {}]   ;;  %s7990_s1 = inlined_call_operand.hbm [shape: bf16[128,512], index: 1, kind: input, shape index: {}]   ;;  %s7991_s2 = inlined_call_operand.hbm [shape: bf16[128,512], index: 2, kind: input, shape index: {}]   ;;  %s7992_s3 = inlined_call_operand.vmem [shape: f32[1,512], index: 3, kind: input, shape index: {}]   ;;  %s7993_s4 = inlined_call_operand.hbm [shape: bf16[128,512], index: 4, kind: input, shape index: {}]   ;;  %s7994_s5 = inlined_call_operand.hbm [shape: bf16[128,512], index: 5, kind: input, shape index: {}]   ;;  %s7995_s6 = inlined_call_operand.vmem [shape: f32[1,512], index: 6, kind: input, shape index: {}]   ;;  %s7996_s7 = inlined_call_operand.hbm [shape: bf16[128,512], index: 7, kind: input, shape index: {}]   ;;  %s7997_s8 = inlined_call_operand.hbm [shape: bf16[128,512], index: 8, kind: input, shape index: {}]   ;;  %s7998_s9 = inlined_call_operand.vmem [shape: f32[1,512], index: 9, kind: input, shape index: {}]   ;;  %s7999_s10 = inlined_call_operand.vmem [shape: bf16[128,128], index: 10, kind: input, shape index: {}]   ;;  %s8000_s11 = inlined_call_operand.vmem [shape: f32[1,128], index: 11, kind: input, shape index: {}]   ;;  %s8001_s12 = inlined_call_operand.vmem [shape: f32[8,128], index: 12, kind: output, shape index: {}]  }
   0x1   :  { %18 = vsyncpa [#allocation7], 0 }
   0x2   :  { %19 = vsyncpa [#allocation10], 0 }
   0x3   :  { %20 = vsyncpa [#allocation13], 0  ;;  %s6066_s21 = smov [#allocation6]   ;;  %s6067_s23 = smov [#allocation9]  }
   0x4   :  { %s40_s22 = sshll.u32 %s6066_s21, 4  ;;  %s66_s24 = sshll.u32 %s6067_s23, 4  ;;  %s41_s22 = int_to_ptr.vmem [resolvable:$true] %s40_s22  ;;  %s67_s24 = int_to_ptr.vmem [resolvable:$true] %s66_s24 }
   0x5   :  { %s5946_s25 = scalar_lea.vmem %s41_s22, 4096  ;;  %p5951_p1 = scmp.lt.s32.totalorder %s41_s22, %s41_s22 }
   0x6   :  { %p5947_p0 = scmp.ne.s32.totalorder %s41_s22, %s5946_s25  ;;  %p5952_p2 = scmp.lt.s32.totalorder %s5946_s25, %s5946_s25 }
   0x8   :  { %p5953_p3 = por %p5952_p2, %p5951_p1 }
   0xa   :  { %p5954_p4 = pnand %p5953_p3, %p5947_p0 }
   0xc   :  { %5957 = shalt.err (!%p5954_p4)
}
   0xd   :  { %s6068_s26 = smov 256   ;;  %s6069_s27 = smov 16  }
   0xe   :  { %46 = dma.hbm_to_vmem [thread:$0]  %s7991_s2, 4096, %s41_s22, [#allocation7], %s6068_s26, %s6068_s26, %s6069_s27  }
   0xf   :  { %s5966_s30 = scalar_lea.vmem %s67_s24, 4096  ;;  %p5971_p6 = scmp.lt.s32.totalorder %s67_s24, %s67_s24 }
  0x10   :  { %p5967_p5 = scmp.ne.s32.totalorder %s67_s24, %s5966_s30  ;;  %p5972_p7 = scmp.lt.s32.totalorder %s5966_s30, %s5966_s30 }
  0x12   :  { %p5973_p8 = por %p5972_p7, %p5971_p6 }
  0x14   :  { %p5974_p9 = pnand %p5973_p8, %p5967_p5 }
  0x16   :  { %5977 = shalt.err (!%p5974_p9)
}
  0x17   :  { %72 = dma.hbm_to_vmem [thread:$0]  %s7994_s5, 4096, %s67_s24, [#allocation10], %s6068_s26, %s6068_s26, %s6069_s27  }
  0x18   :  { %s6070_s15 = smov [#allocation4]   ;;  %s6071_s17 = smov [#allocation8]  }
  0x19   :  { %s28_s16 = sshll.u32 %s6070_s15, 4  ;;  %s54_s18 = sshll.u32 %s6071_s17, 4  ;;  %s29_s16 = int_to_ptr.vmem [resolvable:$true] %s28_s16  ;;  %s55_s18 = int_to_ptr.vmem [resolvable:$true] %s54_s18 }
  0x1a   :  { %s5986_s2 = scalar_lea.vmem %s29_s16, 4096  ;;  %p5991_p11 = scmp.lt.s32.totalorder %s29_s16, %s29_s16 }
  0x1b   :  { %p5987_p10 = scmp.ne.s32.totalorder %s29_s16, %s5986_s2  ;;  %p5992_p12 = scmp.lt.s32.totalorder %s5986_s2, %s5986_s2 }
  0x1d   :  { %p5993_p13 = por %p5992_p12, %p5991_p11 }
  0x1f   :  { %p5994_p0 = pnand %p5993_p13, %p5987_p10 }
  0x21   :  { %5997 = shalt.err (!%p5994_p0)
}
  0x22   :  { %34 = dma.hbm_to_vmem [thread:$0]  %s7990_s1, 4096, %s29_s16, [#allocation5], %s6068_s26, %s6068_s26, %s6069_s27  }
  0x23   :  { %s6006_s5 = scalar_lea.vmem %s55_s18, 4096  ;;  %p6011_p2 = scmp.lt.s32.totalorder %s55_s18, %s55_s18 }
  0x24   :  { %p6007_p1 = scmp.ne.s32.totalorder %s55_s18, %s6006_s5  ;;  %p6012_p3 = scmp.lt.s32.totalorder %s6006_s5, %s6006_s5 }
  0x26   :  { %p6013_p4 = por %p6012_p3, %p6011_p2 }
  0x28   :  { %p6014_p5 = pnand %p6013_p4, %p6007_p1 }
  0x2a   :  { %6017 = shalt.err (!%p6014_p5)
}
  0x2b   :  { %60 = dma.hbm_to_vmem [thread:$0]  %s7993_s4, 4096, %s55_s18, [#allocation7], %s6068_s26, %s6068_s26, %s6069_s27  }
  0x2c   :  { %s6072_s23 = smov [#allocation11]   ;;  %s6073_s25 = smov [#allocation12]  }
  0x2d   :  { %s80_s24 = sshll.u32 %s6072_s23, 4  ;;  %s92_s28 = sshll.u32 %s6073_s25, 4  ;;  %s81_s24 = int_to_ptr.vmem [resolvable:$true] %s80_s24  ;;  %s93_s28 = int_to_ptr.vmem [resolvable:$true] %s92_s28 }
  0x2e   :  { %s6026_s1 = scalar_lea.vmem %s81_s24, 4096  ;;  %p6031_p7 = scmp.lt.s32.totalorder %s81_s24, %s81_s24 }
  0x2f   :  { %p6027_p6 = scmp.ne.s32.totalorder %s81_s24, %s6026_s1  ;;  %p6032_p8 = scmp.lt.s32.totalorder %s6026_s1, %s6026_s1 }
  0x31   :  { %p6033_p9 = por %p6032_p8, %p6031_p7 }
  0x33   :  { %p6034_p10 = pnand %p6033_p9, %p6027_p6 }
  0x35   :  { %6037 = shalt.err (!%p6034_p10)
}
  0x36   :  { %86 = dma.hbm_to_vmem [thread:$0]  %s7996_s7, 4096, %s81_s24, [#allocation10], %s6068_s26, %s6068_s26, %s6069_s27  }
  0x37   :  { %s6046_s4 = scalar_lea.vmem %s93_s28, 4096  ;;  %p6051_p12 = scmp.lt.s32.totalorder %s93_s28, %s93_s28 }
  0x38   :  { %p6047_p11 = scmp.ne.s32.totalorder %s93_s28, %s6046_s4  ;;  %p6052_p13 = scmp.lt.s32.totalorder %s6046_s4, %s6046_s4 }
  0x3a   :  { %p6053_p0 = por %p6052_p13, %p6051_p12 }
  0x3c   :  { %p6054_p1 = pnand %p6053_p0, %p6047_p11 }
  0x3e   :  { %6057 = shalt.err (!%p6054_p1)
}
  0x3f   :  { %98 = dma.hbm_to_vmem [thread:$0]  %s7997_s8, 4096, %s93_s28, [#allocation13], %s6068_s26, %s6068_s26, %s6069_s27  }
  0x40   :  { %6058 = dma.done.wait [#allocation5], 4096  }
  0x41   :  { %6059 = vsyncadd [#allocation5], 4294963200 }
  0x42   :  { %6060 = dma.done.wait [#allocation7], 8192  }
  0x43   :  { %6061 = vsyncadd [#allocation7], 4294959104 }
  0x44   :  { %6062 = dma.done.wait [#allocation10], 8192  }
  0x45   :  { %6063 = vsyncadd [#allocation10], 4294959104 }
  0x46   :  { %6064 = dma.done.wait [#allocation13], 4096  }
  0x47   :  { %6065 = vsyncadd [#allocation13], 4294963200  ;;  %v8002_v0 = vmov 0   ;;  %v5158_v1 = vld [vmem:[#allocation4 + $0xe4] ss:$16 sps:$4 sm:$0xff]   ;;  %v5219_v44 = vld [vmem:[%s7989_s0 + $0x8] sm:$0xff]  }
  0x48   :  { %402 = vmatprep.mubr.bf16.mxu0 %v8002_v0  ;;  %475 = vmatprep.mubr.bf16.mxu1 %v8002_v0  ;;  %v5160_v2 = vld [vmem:[#allocation4 + $0xec] ss:$16 sps:$4 sm:$0xff]   ;;  %v5162_v3 = vld [vmem:[#allocation4 + $0xe0] ss:$16 sps:$4 sm:$0xff]   ;;  %v5163_v4 = vld [vmem:[#allocation4 + $0xe8] ss:$16 sps:$4 sm:$0xff]  }
  0x49   :  { %370 = vmatprep.subr.bf16.mxu0 %v5158_v1  ;;  %443 = vmatprep.subr.bf16.mxu1 %v5160_v2  ;;  %v5164_v5 = vld [vmem:[#allocation4 + $0xc4] ss:$16 sps:$4 sm:$0xff]   ;;  %v5166_v6 = vld [vmem:[#allocation4 + $0xcc] ss:$16 sps:$4 sm:$0xff]   ;;  %v5168_v7 = vld [vmem:[#allocation4 + $0xc0] ss:$16 sps:$4 sm:$0xff]  }
  0x4a   :  { %371 = vmatpush1.bf16.msra.mxu0 %v5162_v3  ;;  %444 = vmatpush1.bf16.msra.mxu1 %v5163_v4  ;;  %v5169_v8 = vld [vmem:[#allocation4 + $0xc8] ss:$16 sps:$4 sm:$0xff]   ;;  %v5170_v9 = vld [vmem:[#allocation4 + $0xa4] ss:$16 sps:$4 sm:$0xff]   ;;  %v5172_v10 = vld [vmem:[#allocation4 + $0xac] ss:$16 sps:$4 sm:$0xff]  }
  0x4b   :  { %372 = vmatprep.subr.bf16.mxu0 %v5164_v5  ;;  %445 = vmatprep.subr.bf16.mxu1 %v5166_v6  ;;  %v5174_v11 = vld [vmem:[#allocation4 + $0xa0] ss:$16 sps:$4 sm:$0xff]   ;;  %v5175_v12 = vld [vmem:[#allocation4 + $0xa8] ss:$16 sps:$4 sm:$0xff]   ;;  %v5176_v13 = vld [vmem:[#allocation4 + $0x84] ss:$16 sps:$4 sm:$0xff]   ;;  %v166_v6 = vlaneseq }
  0x4c   :  { %v5178_v14 = vld [vmem:[#allocation4 + $0x8c] ss:$16 sps:$4 sm:$0xff]   ;;  %v5180_v15 = vld [vmem:[#allocation4 + $0x80] ss:$16 sps:$4 sm:$0xff]   ;;  %v5181_v16 = vld [vmem:[#allocation4 + $0x88] ss:$16 sps:$4 sm:$0xff]  }
  0x4d   :  { %v5182_v17 = vld [vmem:[#allocation4 + $0x64] ss:$16 sps:$4 sm:$0xff]   ;;  %v5184_v18 = vld [vmem:[#allocation4 + $0x6c] ss:$16 sps:$4 sm:$0xff]   ;;  %v5186_v19 = vld [vmem:[#allocation4 + $0x60] ss:$16 sps:$4 sm:$0xff]  }
  0x4e   :  { %373 = vmatpush1.bf16.msra.mxu0 %v5168_v7  ;;  %446 = vmatpush1.bf16.msra.mxu1 %v5169_v8  ;;  %v5187_v20 = vld [vmem:[#allocation4 + $0x68] ss:$16 sps:$4 sm:$0xff]   ;;  %v5188_v21 = vld [vmem:[#allocation4 + $0x44] ss:$16 sps:$4 sm:$0xff]   ;;  %v5190_v22 = vld [vmem:[#allocation4 + $0x4c] ss:$16 sps:$4 sm:$0xff]  }
  0x4f   :  { %374 = vmatprep.subr.bf16.mxu0 %v5170_v9  ;;  %447 = vmatprep.subr.bf16.mxu1 %v5172_v10  ;;  %v5192_v23 = vld [vmem:[#allocation4 + $0x40] ss:$16 sps:$4 sm:$0xff]   ;;  %v5193_v24 = vld [vmem:[#allocation4 + $0x48] ss:$16 sps:$4 sm:$0xff]   ;;  %v5194_v25 = vld [vmem:[#allocation4 + $0x24] ss:$16 sps:$4 sm:$0xff]  }
  0x50   :  { %v5196_v26 = vld [vmem:[#allocation4 + $0x2c] ss:$16 sps:$4 sm:$0xff]   ;;  %v5198_v27 = vld [vmem:[#allocation4 + $0x20] ss:$16 sps:$4 sm:$0xff]   ;;  %v5199_v28 = vld [vmem:[#allocation4 + $0x28] ss:$16 sps:$4 sm:$0xff]  }
  0x51   :  { %v5200_v29 = vld [vmem:[#allocation4 + $0x4] ss:$16 sps:$4 sm:$0xff]   ;;  %v5202_v30 = vld [vmem:[#allocation4 + $0xc] ss:$16 sps:$4 sm:$0xff]   ;;  %v5204_v31 = vld [vmem:[#allocation4] ss:$16 sps:$4 sm:$0xff]  }
  0x52   :  { %375 = vmatpush1.bf16.msra.mxu0 %v5174_v11  ;;  %448 = vmatpush1.bf16.msra.mxu1 %v5175_v12  ;;  %v5205_v32 = vld [vmem:[#allocation4 + $0x8] ss:$16 sps:$4 sm:$0xff]   ;;  %v6180_v33 = vld [vmem:[#allocation6 + $0xe4] ss:$16 sps:$4 sm:$0xff]   ;;  %v6182_v34 = vld [vmem:[#allocation6 + $0xec] ss:$16 sps:$4 sm:$0xff]  }
  0x53   :  { %376 = vmatprep.subr.bf16.mxu0 %v5176_v13  ;;  %449 = vmatprep.subr.bf16.mxu1 %v5178_v14  ;;  %v5206_v35 = vld [vmem:[%s7989_s0] sm:$0xff]   ;;  %v6189_v37 = vld [vmem:[#allocation6 + $0xe8] ss:$16 sps:$4 sm:$0xff]   ;;  %v6195_v39 = vld [vmem:[#allocation6 + $0xcc] ss:$16 sps:$4 sm:$0xff]   ;;  %v167_v7 = vshrl.u32 %v166_v6, 7 }
  0x54   :  { %v6187_v36 = vld [vmem:[#allocation6 + $0xe0] ss:$16 sps:$4 sm:$0xff]   ;;  %v6193_v38 = vld [vmem:[#allocation6 + $0xc4] ss:$16 sps:$4 sm:$0xff]   ;;  %v6201_v41 = vld [vmem:[#allocation6 + $0xc8] ss:$16 sps:$4 sm:$0xff]  }
  0x55   :  { %v6197_v40 = vld [vmem:[#allocation6 + $0xc0] ss:$16 sps:$4 sm:$0xff]   ;;  %v6205_v42 = vld [vmem:[#allocation6 + $0xa4] ss:$16 sps:$4 sm:$0xff]   ;;  %v6207_v43 = vld [vmem:[#allocation6 + $0xac] ss:$16 sps:$4 sm:$0xff]  }
  0x56   :  { %377 = vmatpush1.bf16.msra.mxu0 %v5180_v15  ;;  %450 = vmatpush1.bf16.msra.mxu1 %v5181_v16  ;;  %v6214_v45 = vld [vmem:[#allocation6 + $0xa0] ss:$16 sps:$4 sm:$0xff]   ;;  %v6216_v46 = vld [vmem:[#allocation6 + $0xa8] ss:$16 sps:$4 sm:$0xff]   ;;  %v6220_v47 = vld [vmem:[#allocation6 + $0x84] ss:$16 sps:$4 sm:$0xff]  }
  0x57   :  { %378 = vmatprep.subr.bf16.mxu0 %v5182_v17  ;;  %451 = vmatprep.subr.bf16.mxu1 %v5184_v18  ;;  %v6224_v48 = vld [vmem:[#allocation6 + $0x8c] ss:$16 sps:$4 sm:$0xff]   ;;  %v6226_v49 = vld [vmem:[#allocation6 + $0x80] ss:$16 sps:$4 sm:$0xff]   ;;  %v6228_v50 = vld [vmem:[#allocation6 + $0x88] ss:$16 sps:$4 sm:$0xff]  }
  0x58   :  { %v6232_v51 = vld [vmem:[#allocation6 + $0x64] ss:$16 sps:$4 sm:$0xff]   ;;  %v6236_v52 = vld [vmem:[#allocation6 + $0x6c] ss:$16 sps:$4 sm:$0xff]   ;;  %v6243_v54 = vld [vmem:[#allocation6 + $0x60] ss:$16 sps:$4 sm:$0xff]  }
  0x59   :  { %v5232_v53 = vld [vmem:[%s7989_s0 + $0x10] sm:$0xff]   ;;  %v6245_v55 = vld [vmem:[#allocation6 + $0x68] ss:$16 sps:$4 sm:$0xff]   ;;  %v6249_v57 = vld [vmem:[#allocation6 + $0x4c] ss:$16 sps:$4 sm:$0xff]   ;;  %v6334_v8 = vsub.s32 2, %v167_v7 }
  0x5a   :  { %379 = vmatpush1.bf16.msra.mxu0 %v5186_v19  ;;  %452 = vmatpush1.bf16.msra.mxu1 %v5187_v20  ;;  %v6247_v56 = vld [vmem:[#allocation6 + $0x44] ss:$16 sps:$4 sm:$0xff]   ;;  %v6255_v58 = vld [vmem:[#allocation6 + $0x40] ss:$16 sps:$4 sm:$0xff]   ;;  %v6257_v59 = vld [vmem:[#allocation6 + $0x48] ss:$16 sps:$4 sm:$0xff]  }
  0x5b   :  { %380 = vmatprep.subr.bf16.mxu0 %v5188_v21  ;;  %453 = vmatprep.subr.bf16.mxu1 %v5190_v22  ;;  %v6259_v60 = vld [vmem:[#allocation6 + $0x24] ss:$16 sps:$4 sm:$0xff]   ;;  %v6261_v61 = vld [vmem:[#allocation6 + $0x2c] ss:$16 sps:$4 sm:$0xff]   ;;  %v6272_v63 = vld [vmem:[#allocation6 + $0x20] ss:$16 sps:$4 sm:$0xff]  }
  0x5c   :  { %v5245_v62 = vld [vmem:[%s7989_s0 + $0x18] sm:$0xff]   ;;  %v6276_v2 = vld [vmem:[#allocation6 + $0x4] ss:$16 sps:$4 sm:$0xff]   ;;  %v6284_v4 = vld [vmem:[#allocation6] ss:$16 sps:$4 sm:$0xff]   ;;  %8012 = vst [vmem:[#allocation18_spill] sm:$0xff] %v6334_v8 }
  0x5d   :  { %v6274_v1 = vld [vmem:[#allocation6 + $0x28] ss:$16 sps:$4 sm:$0xff]   ;;  %v6278_v3 = vld [vmem:[#allocation6 + $0xc] ss:$16 sps:$4 sm:$0xff]   ;;  %v6336_v9 = vsub.s32 0, %v167_v7  ;;  %v6349_v19 = vsub.s32 1, %v167_v7 }
  0x5e   :  { %381 = vmatpush1.bf16.msra.mxu0 %v5192_v23  ;;  %454 = vmatpush1.bf16.msra.mxu1 %v5193_v24  ;;  %v6286_v5 = vld [vmem:[#allocation6 + $0x8] ss:$16 sps:$4 sm:$0xff]   ;;  %v164_v10 = vld [vmem:[%s7992_s3] sm:$0xf]  ;;  %v6351_v20 = vsub.s32 3, %v167_v7  ;;  %vm6076_vm0 = vmmov 0  }
  0x5f   :  { %382 = vmatprep.subr.bf16.mxu0 %v5194_v25  ;;  %455 = vmatprep.subr.bf16.mxu1 %v5196_v26  ;;  %8013 = vst [vmem:[#allocation19_spill] sm:$0xff] %v6336_v9  ;;  %v6344_v13 = vrot.slane %v164_v10, %v6334_v8  ;;  %v169_v16 = vrot.slane %v164_v10, %v6336_v9  ;;  %8014 = vst [vmem:[#allocation20_spill] sm:$0xff] %v6349_v19 }
  0x60   :  { %8015 = vst [vmem:[#allocation21_spill] sm:$0xff] %v6351_v20 }
  0x62   :  { %383 = vmatpush1.bf16.msra.mxu0 %v5198_v27  ;;  %456 = vmatpush1.bf16.msra.mxu1 %v5199_v28  ;;  %v6363_v27 = vrot.slane %v164_v10, %v6349_v19  ;;  %v6366_v28 = vrot.slane %v164_v10, %v6351_v20 }
  0x63   :  { %384 = vmatprep.subr.bf16.mxu0 %v5200_v29  ;;  %457 = vmatprep.subr.bf16.mxu1 %v5202_v30 }
  0x66   :  { %385 = vmatpush1.bf16.msra.mxu0 %v5204_v31  ;;  %458 = vmatpush1.bf16.msra.mxu1 %v5205_v32 }
  0x67   :  { %744 = vmatprep.subr.bf16.mxu0 %v6180_v33  ;;  %785 = vmatprep.subr.bf16.mxu1 %v6182_v34 }
  0x69   :  { %403 = vmatmul.mubr.bf16.vlgmr.msra.gmra.mxu0 %v5206_v35  ;;  %476 = vmatmul.mubr.bf16.vlgmr.msra.gmra.mxu1 %v5206_v35 }
  0x6a   :  { %745 = vmatpush1.bf16.msra.mxu0 %v6187_v36  ;;  %786 = vmatpush1.bf16.msra.mxu1 %v6189_v37 }
  0x6b   :  { %746 = vmatprep.subr.bf16.mxu0 %v6193_v38  ;;  %787 = vmatprep.subr.bf16.mxu1 %v6195_v39 }
  0x6c   :  { %412 = vmatprep.mubr.bf16.mxu0 %v8002_v0  ;;  %485 = vmatprep.mubr.bf16.mxu1 %v8002_v0 }
  0x6e   :  { %747 = vmatpush1.bf16.msra.mxu0 %v6197_v40  ;;  %788 = vmatpush1.bf16.msra.mxu1 %v6201_v41 }
  0x6f   :  { %748 = vmatprep.subr.bf16.mxu0 %v6205_v42  ;;  %789 = vmatprep.subr.bf16.mxu1 %v6207_v43 }
  0x71   :  { %413 = vmatmul.mubr.bf16.gmra.mxu0 %v5219_v44  ;;  %486 = vmatmul.mubr.bf16.gmra.mxu1 %v5219_v44 }
  0x72   :  { %749 = vmatpush1.bf16.msra.mxu0 %v6214_v45  ;;  %790 = vmatpush1.bf16.msra.mxu1 %v6216_v46 }
  0x73   :  { %750 = vmatprep.subr.bf16.mxu0 %v6220_v47  ;;  %791 = vmatprep.subr.bf16.mxu1 %v6224_v48 }
  0x74   :  { %422 = vmatprep.mubr.bf16.mxu0 %v8002_v0  ;;  %495 = vmatprep.mubr.bf16.mxu1 %v8002_v0 }
  0x76   :  { %751 = vmatpush1.bf16.msra.mxu0 %v6226_v49  ;;  %792 = vmatpush1.bf16.msra.mxu1 %v6228_v50 }
  0x77   :  { %752 = vmatprep.subr.bf16.mxu0 %v6232_v51  ;;  %793 = vmatprep.subr.bf16.mxu1 %v6236_v52 }
  0x79   :  { %423 = vmatmul.mubr.bf16.gmra.mxu0 %v5232_v53  ;;  %496 = vmatmul.mubr.bf16.gmra.mxu1 %v5232_v53 }
  0x7a   :  { %753 = vmatpush1.bf16.msra.mxu0 %v6243_v54  ;;  %794 = vmatpush1.bf16.msra.mxu1 %v6245_v55 }
  0x7b   :  { %754 = vmatprep.subr.bf16.mxu0 %v6247_v56  ;;  %795 = vmatprep.subr.bf16.mxu1 %v6249_v57 }
  0x7c   :  { %432 = vmatprep.mubr.bf16.mxu0 %v8002_v0  ;;  %505 = vmatprep.mubr.bf16.mxu1 %v8002_v0 }
  0x7e   :  { %755 = vmatpush1.bf16.msra.mxu0 %v6255_v58  ;;  %796 = vmatpush1.bf16.msra.mxu1 %v6257_v59 }
  0x7f   :  { %756 = vmatprep.subr.bf16.mxu0 %v6259_v60  ;;  %797 = vmatprep.subr.bf16.mxu1 %v6261_v61 }
  0x81   :  { %433 = vmatmul.mubr.bf16.gmra.mxu0 %v5245_v62  ;;  %506 = vmatmul.mubr.bf16.gmra.mxu1 %v5245_v62 }
  0x82   :  { %757 = vmatpush1.bf16.msra.mxu0 %v6272_v63  ;;  %798 = vmatpush1.bf16.msra.mxu1 %v6274_v1 }
  0x83   :  { %758 = vmatprep.subr.bf16.mxu0 %v6276_v2  ;;  %799 = vmatprep.subr.bf16.mxu1 %v6278_v3 }
  0x84   :  { %776 = vmatprep.mubr.bf16.mxu0 %v8002_v0  ;;  %817 = vmatprep.mubr.bf16.mxu1 %v8002_v0 }
  0x86   :  { %759 = vmatpush1.bf16.msra.mxu0 %v6284_v4  ;;  %800 = vmatpush1.bf16.msra.mxu1 %v6286_v5 }
  0x87   :  { %861 = vmatprep.subr.bf16.mxu0 %v6180_v33  ;;  %902 = vmatprep.subr.bf16.mxu1 %v6182_v34 }
  0x89   :  { %777 = vmatmul.mubr.bf16.vlgmr.msra.gmra.mxu0 %v8002_v0  ;;  %818 = vmatmul.mubr.bf16.vlgmr.msra.gmra.mxu1 %v8002_v0 }
  0x8a   :  { %862 = vmatpush1.bf16.msra.mxu0 %v6187_v36  ;;  %903 = vmatpush1.bf16.msra.mxu1 %v6189_v37 }
  0x8b   :  { %863 = vmatprep.subr.bf16.mxu0 %v6193_v38  ;;  %904 = vmatprep.subr.bf16.mxu1 %v6195_v39 }
  0x8c   :  { %893 = vmatprep.mubr.bf16.mxu0 %v8002_v0  ;;  %934 = vmatprep.mubr.bf16.mxu1 %v8002_v0 }
  0x8e   :  { %864 = vmatpush1.bf16.msra.mxu0 %v6197_v40  ;;  %905 = vmatpush1.bf16.msra.mxu1 %v6201_v41 }
  0x8f   :  { %865 = vmatprep.subr.bf16.mxu0 %v6205_v42  ;;  %906 = vmatprep.subr.bf16.mxu1 %v6207_v43 }
  0x92   :  { %866 = vmatpush1.bf16.msra.mxu0 %v6214_v45  ;;  %907 = vmatpush1.bf16.msra.mxu1 %v6216_v46 }
  0x93   :  { %867 = vmatprep.subr.bf16.mxu0 %v6220_v47  ;;  %908 = vmatprep.subr.bf16.mxu1 %v6224_v48 }
  0x96   :  { %868 = vmatpush1.bf16.msra.mxu0 %v6226_v49  ;;  %909 = vmatpush1.bf16.msra.mxu1 %v6228_v50 }
  0x97   :  { %869 = vmatprep.subr.bf16.mxu0 %v6232_v51  ;;  %910 = vmatprep.subr.bf16.mxu1 %v6236_v52 }
  0x9a   :  { %870 = vmatpush1.bf16.msra.mxu0 %v6243_v54  ;;  %911 = vmatpush1.bf16.msra.mxu1 %v6245_v55 }
  0x9b   :  { %871 = vmatprep.subr.bf16.mxu0 %v6247_v56  ;;  %912 = vmatprep.subr.bf16.mxu1 %v6249_v57 }
  0x9e   :  { %872 = vmatpush1.bf16.msra.mxu0 %v6255_v58  ;;  %913 = vmatpush1.bf16.msra.mxu1 %v6257_v59 }
  0x9f   :  { %873 = vmatprep.subr.bf16.mxu0 %v6259_v60  ;;  %914 = vmatprep.subr.bf16.mxu1 %v6261_v61 }
  0xa2   :  { %874 = vmatpush1.bf16.msra.mxu0 %v6272_v63  ;;  %915 = vmatpush1.bf16.msra.mxu1 %v6274_v1 }
  0xa3   :  { %875 = vmatprep.subr.bf16.mxu0 %v6276_v2  ;;  %916 = vmatprep.subr.bf16.mxu1 %v6278_v3 }
  0xa6   :  { %876 = vmatpush1.bf16.msra.mxu0 %v6284_v4  ;;  %917 = vmatpush1.bf16.msra.mxu1 %v6286_v5 }
  0xa7   :  { %979 = vmatprep.subr.bf16.mxu0 %v6180_v33  ;;  %1020 = vmatprep.subr.bf16.mxu1 %v6182_v34 }
 0x129   :  { %v404_v11 = vpop.f32.mrf.mxu0  ;;  %v6341_v12 = vpop.f32.mrf.mxu1 }
 0x12b   :  { %v406_v14 = vpop.f32.mrf.mxu0  ;;  %v6346_v15 = vpop.f32.mrf.mxu1 }
 0x12d   :  { %v408_v17 = vpop.f32.mrf.mxu0  ;;  %v481_v18 = vpop.f32.mrf.mxu1 }
 0x12e   :  { %v6353_v21 = vadd.f32 %v408_v17, %v169_v16  ;;  %v6356_v22 = vadd.f32 %v481_v18, %v6344_v13 }
 0x12f   :  { %v6358_v23 = vpop.f32.mrf.mxu0  ;;  %v6360_v24 = vpop.f32.mrf.mxu1 }
 0x131   :  { %v414_v25 = vpop.f32.mrf.mxu0  ;;  %v487_v26 = vpop.f32.mrf.mxu1 }
 0x132   :  { %v6368_v29 = vadd.f32 %v414_v25, %v169_v16  ;;  %v6371_v30 = vadd.f32 %v487_v26, %v6344_v13 }
 0x133   :  { %v416_v31 = vpop.f32.mrf.mxu0  ;;  %v489_v32 = vpop.f32.mrf.mxu1 }
 0x134   :  { %v6374_v35 = vadd.f32 %v416_v31, %v6363_v27  ;;  %v6377_v44 = vadd.f32 %v489_v32, %v6366_v28 }
 0x135   :  { %v418_v53 = vpop.f32.mrf.mxu0  ;;  %v491_v62 = vpop.f32.mrf.mxu1 }
 0x136   :  { %v6379_v6 = vadd.f32 %v418_v53, %v169_v16  ;;  %v6382_v7 = vadd.f32 %v491_v62, %v6344_v13 }
 0x137   :  { %v6384_v10 = vpop.f32.mrf.mxu0  ;;  %v6386_v17 = vpop.f32.mrf.mxu1 }
 0x138   :  { %8016 = vst [vmem:[#allocation22_spill] sm:$0xff] %v6379_v6  ;;  %8017 = vst [vmem:[#allocation23_spill] sm:$0xff] %v6382_v7 }
 0x139   :  { %8018 = vst [vmem:[#allocation24_spill] sm:$0xff] %v6384_v10  ;;  %8019 = vst [vmem:[#allocation25_spill] sm:$0xff] %v6386_v17  ;;  %v424_v18 = vpop.f32.mrf.mxu0  ;;  %v497_v25 = vpop.f32.mrf.mxu1 }
 0x13a   :  { %v6388_v26 = vadd.f32 %v424_v18, %v169_v16  ;;  %v6391_v31 = vadd.f32 %v497_v25, %v6344_v13 }
 0x13b   :  { %v426_v32 = vpop.f32.mrf.mxu0  ;;  %v499_v0 = vpop.f32.mrf.mxu1 }
 0x13c   :  { %8020 = vst [vmem:[#allocation26_spill] sm:$0xff] %v6388_v26  ;;  %8021 = vst [vmem:[#allocation27_spill] sm:$0xff] %v6391_v31  ;;  %v6394_v20 = vadd.f32 %v426_v32, %v6363_v27  ;;  %v6397_v53 = vadd.f32 %v499_v0, %v6366_v28 }
 0x13d   :  { %v428_v62 = vpop.f32.mrf.mxu0  ;;  %v501_v8 = vpop.f32.mrf.mxu1 }
 0x13e   :  { %8022 = vst [vmem:[#allocation28_spill] sm:$0xff] %v6394_v20  ;;  %8023 = vst [vmem:[#allocation29_spill] sm:$0xff] %v6397_v53  ;;  %v6399_v19 = vadd.f32 %v428_v62, %v169_v16  ;;  %v6402_v9 = vadd.f32 %v501_v8, %v6344_v13 }
 0x13f   :  { %v6404_v18 = vpop.f32.mrf.mxu0  ;;  %v6406_v26 = vpop.f32.mrf.mxu1 }
 0x140   :  { %8024 = vst [vmem:[#allocation30_spill] sm:$0xff] %v6399_v19  ;;  %8025 = vst [vmem:[#allocation31_spill] sm:$0xff] %v6402_v9 }
 0x141   :  { %8026 = vst [vmem:[#allocation32_spill] sm:$0xff] %v6404_v18  ;;  %8027 = vst [vmem:[#allocation33_spill] sm:$0xff] %v6406_v26  ;;  %v434_v25 = vpop.f32.mrf.mxu0  ;;  %v507_v31 = vpop.f32.mrf.mxu1 }
 0x142   :  { %v6408_v17 = vadd.f32 %v434_v25, %v169_v16  ;;  %v6411_v32 = vadd.f32 %v507_v31, %v6344_v13  ;;  %v405_v31 = vadd.f32 %v404_v11, %v169_v16 }
 0x143   :  { %v436_v0 = vpop.f32.mrf.mxu0  ;;  %v509_v53 = vpop.f32.mrf.mxu1 }
 0x144   :  { %8028 = vst [vmem:[#allocation34_spill] sm:$0xff] %v6408_v17  ;;  %8029 = vst [vmem:[#allocation35_spill] sm:$0xff] %v6411_v32  ;;  %v6414_v20 = vadd.f32 %v436_v0, %v6363_v27  ;;  %v6417_v62 = vadd.f32 %v509_v53, %v6366_v28  ;;  %v407_v0 = vadd.f32 %v406_v14, %v6363_v27 }
 0x145   :  { %v438_v8 = vpop.f32.mrf.mxu0  ;;  %v511_v9 = vpop.f32.mrf.mxu1 }
 0x146   :  { %8030 = vst [vmem:[#allocation36_spill] sm:$0xff] %v6414_v20  ;;  %8031 = vst [vmem:[#allocation37_spill] sm:$0xff] %v6417_v62  ;;  %v6419_v19 = vadd.f32 %v438_v8, %v169_v16  ;;  %v6422_v26 = vadd.f32 %v511_v9, %v6344_v13  ;;  %v480_v16 = vadd.f32 %v6346_v15, %v6366_v28 }
 0x147   :  { %v6424_v25 = vpop.f32.mrf.mxu0  ;;  %v6426_v17 = vpop.f32.mrf.mxu1 }
 0x148   :  { %8032 = vst [vmem:[#allocation38_spill] sm:$0xff] %v6419_v19  ;;  %8033 = vst [vmem:[#allocation39_spill] sm:$0xff] %v6422_v26 }
 0x149   :  { %8034 = vst [vmem:[#allocation40_spill] sm:$0xff] %v6424_v25  ;;  %8035 = vst [vmem:[#allocation41_spill] sm:$0xff] %v6426_v17  ;;  %v778_v32 = vpop.f32.mrf.mxu0  ;;  %v819_v18 = vpop.f32.mrf.mxu1  ;;  %v478_v17 = vadd.f32 %v6341_v12, %v6344_v13 }
 0x14a   :  { %v826_v20 = vadd.f32 %v778_v32, %v405_v31 }
 0x14b   :  { %v780_v7 = vpop.f32.mrf.mxu0  ;;  %v821_v53 = vpop.f32.mrf.mxu1  ;;  %v828_v11 = vadd.f32 %v819_v18, %v478_v17 }
 0x14c   :  { %v4909_v62 = vmul.f32 -1.442695, %v826_v20  ;;  %v827_v6 = vadd.f32 %v780_v7, %v407_v0  ;;  %v829_v31 = vadd.f32 %v821_v53, %v480_v16  ;;  %v8036_v53 = vmov 0  }
 0x14d   :  { %v782_v10 = vpop.f32.mrf.mxu0  ;;  %v823_v8 = vpop.f32.mrf.mxu1  ;;  %v4911_v14 = vmul.f32 -1.442695, %v828_v11  ;;  %v411_v11 = vadd.f32 %v6358_v23, %v6363_v27 }
 0x14e   :  { %5458 = vpow2.f32 %v4909_v62  ;;  %v4910_v19 = vmul.f32 -1.442695, %v827_v6 }
 0x14f   :  { %v783_v9 = vpop.f32.mrf.mxu0  ;;  %v824_v26 = vpop.f32.mrf.mxu1 }
 0x150   :  { %5460 = vpow2.f32 %v4910_v19 }
 0x151   :  { %5462 = vpow2.f32 %v4911_v14 }
 0x15b   :  { %v5459_v32 = vpop.eup %5458 }
 0x15c   :  { %v839_v25 = vadd.f32 1.0, %v5459_v32 }
 0x15d   :  { %v5461_v20 = vpop.eup %5460 }
 0x15e   :  { %5464 = vrcp.f32 %v839_v25  ;;  %v840_v7 = vadd.f32 1.0, %v5461_v20  ;;  %v5463_v6 = vpop.eup %5462 }
 0x15f   :  { %5466 = vtanh.f32 %v829_v31  ;;  %v841_v62 = vadd.f32 1.0, %v5463_v6 }
 0x160   :  { %5468 = vrcp.f32 %v840_v7 }
 0x161   :  { %5470 = vrcp.f32 %v841_v62 }
 0x16b   :  { %v5465_v10 = vpop.eup %5464 }
 0x16c   :  { %v5467_v19 = vpop.eup %5466 }
 0x16d   :  { %v5469_v26 = vpop.eup %5468  ;;  %v850_v13 = vmul.f32 %v5467_v19, %v5465_v10 }
 0x16e   :  { %v849_v12 = vmul.f32 0.0, %v5469_v26  ;;  %v5471_v15 = vpop.eup %5470 }
 0x170   :  { %v6433_v17 = vadd.f32 %v850_v13, %v849_v12 }
 0x172   :  { %5472 = vtanh.f32 %v6433_v17 }
 0x17f   :  { %v5473_v18 = vpop.eup %5472 }
 0x180   :  { %v6436_v0 = vmul.f32 %v5473_v18, %v5471_v15 }
 0x182   :  { %v860_v25 = vpack.c.bf16 %v6436_v0, %v6436_v0 }
 0x184   :  { %894 = vmatmul.mubr.bf16.vlgmr.msra.gmra.mxu0 %v860_v25  ;;  %935 = vmatmul.mubr.bf16.vlgmr.msra.gmra.mxu1 %v860_v25 }
 0x185   :  { %980 = vmatpush1.bf16.msra.mxu0 %v6187_v36  ;;  %1021 = vmatpush1.bf16.msra.mxu1 %v6189_v37 }
 0x186   :  { %981 = vmatprep.subr.bf16.mxu0 %v6193_v38  ;;  %1022 = vmatprep.subr.bf16.mxu1 %v6195_v39 }
 0x187   :  { %1011 = vmatprep.mubr.bf16.mxu0 %v8036_v53  ;;  %1052 = vmatprep.mubr.bf16.mxu1 %v8036_v53 }
 0x189   :  { %982 = vmatpush1.bf16.msra.mxu0 %v6197_v40  ;;  %1023 = vmatpush1.bf16.msra.mxu1 %v6201_v41 }
 0x18a   :  { %983 = vmatprep.subr.bf16.mxu0 %v6205_v42  ;;  %1024 = vmatprep.subr.bf16.mxu1 %v6207_v43 }
 0x18d   :  { %984 = vmatpush1.bf16.msra.mxu0 %v6214_v45  ;;  %1025 = vmatpush1.bf16.msra.mxu1 %v6216_v46 }
 0x18e   :  { %985 = vmatprep.subr.bf16.mxu0 %v6220_v47  ;;  %1026 = vmatprep.subr.bf16.mxu1 %v6224_v48 }
 0x191   :  { %986 = vmatpush1.bf16.msra.mxu0 %v6226_v49  ;;  %1027 = vmatpush1.bf16.msra.mxu1 %v6228_v50 }
 0x192   :  { %987 = vmatprep.subr.bf16.mxu0 %v6232_v51  ;;  %1028 = vmatprep.subr.bf16.mxu1 %v6236_v52 }
 0x195   :  { %988 = vmatpush1.bf16.msra.mxu0 %v6243_v54  ;;  %1029 = vmatpush1.bf16.msra.mxu1 %v6245_v55 }
 0x196   :  { %989 = vmatprep.subr.bf16.mxu0 %v6247_v56  ;;  %1030 = vmatprep.subr.bf16.mxu1 %v6249_v57 }
 0x199   :  { %990 = vmatpush1.bf16.msra.mxu0 %v6255_v58  ;;  %1031 = vmatpush1.bf16.msra.mxu1 %v6257_v59 }
 0x19a   :  { %991 = vmatprep.subr.bf16.mxu0 %v6259_v60  ;;  %1032 = vmatprep.subr.bf16.mxu1 %v6261_v61 }
 0x19d   :  { %992 = vmatpush1.bf16.msra.mxu0 %v6272_v63  ;;  %1033 = vmatpush1.bf16.msra.mxu1 %v6274_v1 }
 0x19e   :  { %993 = vmatprep.subr.bf16.mxu0 %v6276_v2  ;;  %1034 = vmatprep.subr.bf16.mxu1 %v6278_v3 }
 0x1a1   :  { %994 = vmatpush1.bf16.msra.mxu0 %v6284_v4  ;;  %1035 = vmatpush1.bf16.msra.mxu1 %v6286_v5 }
 0x1a2   :  { %1097 = vmatprep.subr.bf16.mxu0 %v6180_v33  ;;  %1138 = vmatprep.subr.bf16.mxu1 %v6182_v34  ;;  %v484_v34 = vadd.f32 %v6360_v24, %v6366_v28 }
 0x244   :  { %v895_v8 = vpop.f32.mrf.mxu0  ;;  %v936_v9 = vpop.f32.mrf.mxu1 }
 0x245   :  { %v943_v16 = vadd.f32 %v895_v8, %v6353_v21  ;;  %v945_v33 = vadd.f32 %v936_v9, %v6356_v22 }
 0x246   :  { %v897_v14 = vpop.f32.mrf.mxu0  ;;  %v938_v32 = vpop.f32.mrf.mxu1 }
 0x247   :  { %v4912_v31 = vmul.f32 -1.442695, %v943_v16  ;;  %v944_v20 = vadd.f32 %v897_v14, %v411_v11  ;;  %v4914_v62 = vmul.f32 -1.442695, %v945_v33  ;;  %v946_v23 = vadd.f32 %v938_v32, %v484_v34 }
 0x248   :  { %v899_v7 = vpop.f32.mrf.mxu0  ;;  %v940_v6 = vpop.f32.mrf.mxu1 }
 0x249   :  { %5474 = vpow2.f32 %v4912_v31  ;;  %v4913_v10 = vmul.f32 -1.442695, %v944_v20 }
 0x24a   :  { %v900_v19 = vpop.f32.mrf.mxu0  ;;  %v941_v26 = vpop.f32.mrf.mxu1 }
 0x24b   :  { %5476 = vpow2.f32 %v4913_v10 }
 0x24c   :  { %5478 = vpow2.f32 %v4914_v62 }
 0x24d   :  { %5480 = vtanh.f32 %v946_v23 }
 0x256   :  { %v5475_v12 = vpop.eup %5474 }
 0x257   :  { %v956_v21 = vadd.f32 1.0, %v5475_v12 }
 0x258   :  { %v5477_v13 = vpop.eup %5476 }
 0x259   :  { %5482 = vrcp.f32 %v956_v21  ;;  %v957_v15 = vadd.f32 1.0, %v5477_v13  ;;  %v5479_v18 = vpop.eup %5478 }
 0x25a   :  { %v5481_v25 = vpop.eup %5480  ;;  %v958_v14 = vadd.f32 1.0, %v5479_v18 }
 0x25b   :  { %5484 = vrcp.f32 %v957_v15 }
 0x25c   :  { %5486 = vrcp.f32 %v958_v14  ;;  %v6552_v14 = vld [vmem:[#allocation6 + $0xc0] ss:$16 sps:$4 sm:$0xff]  }
 0x266   :  { %v5483_v8 = vpop.eup %5482 }
 0x267   :  { %v967_v11 = vmul.f32 %v5483_v8, %v5481_v25  ;;  %v6538_v25 = vld [vmem:[#allocation6 + $0xe0] ss:$16 sps:$4 sm:$0xff]   ;;  %v6541_v8 = vld [vmem:[#allocation6 + $0xe8] ss:$16 sps:$4 sm:$0xff]  }
 0x268   :  { %v5485_v16 = vpop.eup %5484 }
 0x269   :  { %v966_v22 = vmul.f32 %v5485_v16, %v6433_v17  ;;  %v5487_v24 = vpop.eup %5486  ;;  %v6547_v16 = vld [vmem:[#allocation6 + $0xcc] ss:$16 sps:$4 sm:$0xff]  }
 0x26b   :  { %v6481_v9 = vadd.f32 %v967_v11, %v966_v22  ;;  %v6544_v11 = vld [vmem:[#allocation6 + $0xc4] ss:$16 sps:$4 sm:$0xff]   ;;  %v6555_v22 = vld [vmem:[#allocation6 + $0xc8] ss:$16 sps:$4 sm:$0xff]  }
 0x26d   :  { %5488 = vtanh.f32 %v6481_v9 }
 0x27a   :  { %v5489_v32 = vpop.eup %5488 }
 0x27b   :  { %v6484_v31 = vmul.f32 %v5489_v32, %v5487_v24  ;;  %v6561_v24 = vld [vmem:[#allocation6 + $0xac] ss:$16 sps:$4 sm:$0xff]   ;;  %v6564_v32 = vld [vmem:[#allocation6 + $0xa0] ss:$16 sps:$4 sm:$0xff]  }
 0x27d   :  { %v978_v20 = vpack.c.bf16 %v6484_v31, %v6484_v31 }
 0x27f   :  { %1012 = vmatmul.mubr.bf16.vlgmr.msra.gmra.mxu0 %v978_v20  ;;  %1053 = vmatmul.mubr.bf16.vlgmr.msra.gmra.mxu1 %v978_v20  ;;  %v6567_v20 = vld [vmem:[#allocation6 + $0xa8] ss:$16 sps:$4 sm:$0xff]  }
 0x280   :  { %1098 = vmatpush1.bf16.msra.mxu0 %v6187_v36  ;;  %1139 = vmatpush1.bf16.msra.mxu1 %v6189_v37  ;;  %v6520_v36 = vld [vmem:[#allocation6 + $0xe4] ss:$16 sps:$4 sm:$0xff]   ;;  %v6523_v37 = vld [vmem:[#allocation6 + $0xec] ss:$16 sps:$4 sm:$0xff]  }
 0x281   :  { %1099 = vmatprep.subr.bf16.mxu0 %v6193_v38  ;;  %1140 = vmatprep.subr.bf16.mxu1 %v6195_v39 }
 0x282   :  { %1129 = vmatprep.mubr.bf16.mxu0 %v8036_v53  ;;  %1170 = vmatprep.mubr.bf16.mxu1 %v8036_v53 }
 0x284   :  { %1100 = vmatpush1.bf16.msra.mxu0 %v6197_v40  ;;  %1141 = vmatpush1.bf16.msra.mxu1 %v6201_v41 }
 0x285   :  { %1101 = vmatprep.subr.bf16.mxu0 %v6205_v42  ;;  %1142 = vmatprep.subr.bf16.mxu1 %v6207_v43 }
 0x288   :  { %1102 = vmatpush1.bf16.msra.mxu0 %v6214_v45  ;;  %1143 = vmatpush1.bf16.msra.mxu1 %v6216_v46 }
 0x289   :  { %1103 = vmatprep.subr.bf16.mxu0 %v6220_v47  ;;  %1144 = vmatprep.subr.bf16.mxu1 %v6224_v48 }
 0x28c   :  { %1104 = vmatpush1.bf16.msra.mxu0 %v6226_v49  ;;  %1145 = vmatpush1.bf16.msra.mxu1 %v6228_v50 }
 0x28d   :  { %1105 = vmatprep.subr.bf16.mxu0 %v6232_v51  ;;  %1146 = vmatprep.subr.bf16.mxu1 %v6236_v52 }
 0x290   :  { %1106 = vmatpush1.bf16.msra.mxu0 %v6243_v54  ;;  %1147 = vmatpush1.bf16.msra.mxu1 %v6245_v55 }
 0x291   :  { %1107 = vmatprep.subr.bf16.mxu0 %v6247_v56  ;;  %1148 = vmatprep.subr.bf16.mxu1 %v6249_v57 }
 0x294   :  { %1108 = vmatpush1.bf16.msra.mxu0 %v6255_v58  ;;  %1149 = vmatpush1.bf16.msra.mxu1 %v6257_v59 }
 0x295   :  { %1109 = vmatprep.subr.bf16.mxu0 %v6259_v60  ;;  %1150 = vmatprep.subr.bf16.mxu1 %v6261_v61 }
 0x298   :  { %1110 = vmatpush1.bf16.msra.mxu0 %v6272_v63  ;;  %1151 = vmatpush1.bf16.msra.mxu1 %v6274_v1 }
 0x299   :  { %1111 = vmatprep.subr.bf16.mxu0 %v6276_v2  ;;  %1152 = vmatprep.subr.bf16.mxu1 %v6278_v3 }
 0x29c   :  { %1112 = vmatpush1.bf16.msra.mxu0 %v6284_v4  ;;  %1153 = vmatpush1.bf16.msra.mxu1 %v6286_v5 }
 0x29d   :  { %1215 = vmatprep.subr.bf16.mxu0 %v6520_v36  ;;  %1256 = vmatprep.subr.bf16.mxu1 %v6523_v37 }
 0x33f   :  { %v1013_v38 = vpop.f32.mrf.mxu0  ;;  %v1054_v39 = vpop.f32.mrf.mxu1 }
 0x340   :  { %v1061_v40 = vadd.f32 %v1013_v38, %v6368_v29  ;;  %v1063_v17 = vadd.f32 %v1054_v39, %v6371_v30  ;;  %v6570_v38 = vld [vmem:[#allocation6 + $0x84] ss:$16 sps:$4 sm:$0xff]   ;;  %v6573_v39 = vld [vmem:[#allocation6 + $0x8c] ss:$16 sps:$4 sm:$0xff]  }
 0x341   :  { %v1015_v41 = vpop.f32.mrf.mxu0  ;;  %v1056_v42 = vpop.f32.mrf.mxu1 }
 0x342   :  { %v4915_v43 = vmul.f32 -1.442695, %v1061_v40  ;;  %v1062_v45 = vadd.f32 %v1015_v41, %v6374_v35  ;;  %v4917_v7 = vmul.f32 -1.442695, %v1063_v17  ;;  %v1064_v6 = vadd.f32 %v1056_v42, %v6377_v44  ;;  %v6576_v40 = vld [vmem:[#allocation6 + $0x80] ss:$16 sps:$4 sm:$0xff]  }
 0x343   :  { %v1017_v46 = vpop.f32.mrf.mxu0  ;;  %v1058_v47 = vpop.f32.mrf.mxu1  ;;  %v6579_v41 = vld [vmem:[#allocation6 + $0x88] ss:$16 sps:$4 sm:$0xff]  }
 0x344   :  { %5490 = vpow2.f32 %v4915_v43  ;;  %v4916_v48 = vmul.f32 -1.442695, %v1062_v45  ;;  %v8040_v43 = vld [vmem:[#allocation25_spill] sm:$0xff] }
 0x345   :  { %v1018_v49 = vpop.f32.mrf.mxu0  ;;  %v1059_v50 = vpop.f32.mrf.mxu1  ;;  %v494_v45 = vadd.f32 %v8040_v43, %v6366_v28 }
 0x346   :  { %5492 = vpow2.f32 %v4916_v48 }
 0x347   :  { %5494 = vpow2.f32 %v4917_v7 }
 0x348   :  { %5496 = vtanh.f32 %v1064_v6 }
 0x351   :  { %v5491_v10 = vpop.eup %5490 }
 0x352   :  { %v1074_v19 = vadd.f32 1.0, %v5491_v10 }
 0x353   :  { %v5493_v29 = vpop.eup %5492 }
 0x354   :  { %5498 = vrcp.f32 %v1074_v19  ;;  %v1075_v26 = vadd.f32 1.0, %v5493_v29  ;;  %v5495_v35 = vpop.eup %5494 }
 0x355   :  { %v5497_v33 = vpop.eup %5496  ;;  %v1076_v12 = vadd.f32 1.0, %v5495_v35 }
 0x356   :  { %5500 = vrcp.f32 %v1075_v26 }
 0x357   :  { %5502 = vrcp.f32 %v1076_v12 }
 0x361   :  { %v5499_v34 = vpop.eup %5498 }
 0x362   :  { %v1085_v62 = vmul.f32 %v5499_v34, %v5497_v33 }
 0x363   :  { %v5501_v23 = vpop.eup %5500 }
 0x364   :  { %v1084_v21 = vmul.f32 %v5501_v23, %v6481_v9  ;;  %v5503_v44 = vpop.eup %5502  ;;  %v6558_v9 = vld [vmem:[#allocation6 + $0xa4] ss:$16 sps:$4 sm:$0xff]  }
 0x366   :  { %v6531_v30 = vadd.f32 %v1085_v62, %v1084_v21  ;;  %v6630_v21 = vld [vmem:[#allocation6 + $0x64] ss:$16 sps:$4 sm:$0xff]  }
 0x368   :  { %5504 = vtanh.f32 %v6531_v30 }
 0x375   :  { %v5505_v13 = vpop.eup %5504 }
 0x376   :  { %v6534_v15 = vmul.f32 %v5505_v13, %v5503_v44  ;;  %v6636_v44 = vld [vmem:[#allocation6 + $0x60] ss:$16 sps:$4 sm:$0xff]   ;;  %v6639_v13 = vld [vmem:[#allocation6 + $0x68] ss:$16 sps:$4 sm:$0xff]  }
 0x378   :  { %v1096_v18 = vpack.c.bf16 %v6534_v15, %v6534_v15 }
 0x37a   :  { %1130 = vmatmul.mubr.bf16.vlgmr.msra.gmra.mxu0 %v1096_v18  ;;  %1171 = vmatmul.mubr.bf16.vlgmr.msra.gmra.mxu1 %v1096_v18  ;;  %v6642_v18 = vld [vmem:[#allocation6 + $0x44] ss:$16 sps:$4 sm:$0xff]  }
 0x37b   :  { %1216 = vmatpush1.bf16.msra.mxu0 %v6538_v25  ;;  %1257 = vmatpush1.bf16.msra.mxu1 %v6541_v8 }
 0x37c   :  { %1217 = vmatprep.subr.bf16.mxu0 %v6544_v11  ;;  %1258 = vmatprep.subr.bf16.mxu1 %v6547_v16 }
 0x37d   :  { %1247 = vmatprep.mubr.bf16.mxu0 %v8036_v53  ;;  %1288 = vmatprep.mubr.bf16.mxu1 %v8036_v53 }
 0x37f   :  { %1218 = vmatpush1.bf16.msra.mxu0 %v6552_v14  ;;  %1259 = vmatpush1.bf16.msra.mxu1 %v6555_v22 }
 0x380   :  { %1219 = vmatprep.subr.bf16.mxu0 %v6558_v9  ;;  %1260 = vmatprep.subr.bf16.mxu1 %v6561_v24 }
 0x383   :  { %1220 = vmatpush1.bf16.msra.mxu0 %v6564_v32  ;;  %1261 = vmatpush1.bf16.msra.mxu1 %v6567_v20 }
 0x384   :  { %1221 = vmatprep.subr.bf16.mxu0 %v6570_v38  ;;  %1262 = vmatprep.subr.bf16.mxu1 %v6573_v39 }
 0x387   :  { %1222 = vmatpush1.bf16.msra.mxu0 %v6576_v40  ;;  %1263 = vmatpush1.bf16.msra.mxu1 %v6579_v41 }
 0x388   :  { %1223 = vmatprep.subr.bf16.mxu0 %v6232_v51  ;;  %1264 = vmatprep.subr.bf16.mxu1 %v6236_v52 }
 0x38b   :  { %1224 = vmatpush1.bf16.msra.mxu0 %v6243_v54  ;;  %1265 = vmatpush1.bf16.msra.mxu1 %v6245_v55  ;;  %v8037_v54 = vld [vmem:[#allocation24_spill] sm:$0xff] }
 0x38c   :  { %1225 = vmatprep.subr.bf16.mxu0 %v6247_v56  ;;  %1266 = vmatprep.subr.bf16.mxu1 %v6249_v57  ;;  %v421_v55 = vadd.f32 %v8037_v54, %v6363_v27  ;;  %v8038_v56 = vld [vmem:[#allocation22_spill] sm:$0xff]  ;;  %v6651_v54 = vld [vmem:[#allocation6 + $0x48] ss:$16 sps:$4 sm:$0xff]  }
 0x38f   :  { %1226 = vmatpush1.bf16.msra.mxu0 %v6255_v58  ;;  %1267 = vmatpush1.bf16.msra.mxu1 %v6257_v59 }
 0x390   :  { %1227 = vmatprep.subr.bf16.mxu0 %v6259_v60  ;;  %1268 = vmatprep.subr.bf16.mxu1 %v6261_v61 }
 0x393   :  { %1228 = vmatpush1.bf16.msra.mxu0 %v6272_v63  ;;  %1269 = vmatpush1.bf16.msra.mxu1 %v6274_v1 }
 0x394   :  { %1229 = vmatprep.subr.bf16.mxu0 %v6276_v2  ;;  %1270 = vmatprep.subr.bf16.mxu1 %v6278_v3 }
 0x397   :  { %1230 = vmatpush1.bf16.msra.mxu0 %v6284_v4  ;;  %1271 = vmatpush1.bf16.msra.mxu1 %v6286_v5  ;;  %v8039_v5 = vld [vmem:[#allocation23_spill] sm:$0xff] }
 0x398   :  { %1333 = vmatprep.subr.bf16.mxu0 %v6520_v36  ;;  %1374 = vmatprep.subr.bf16.mxu1 %v6523_v37 }
 0x43a   :  { %v1131_v51 = vpop.f32.mrf.mxu0  ;;  %v1172_v52 = vpop.f32.mrf.mxu1 }
 0x43b   :  { %v1179_v57 = vadd.f32 %v1131_v51, %v8038_v56  ;;  %v1181_v42 = vadd.f32 %v1172_v52, %v8039_v5  ;;  %v6645_v51 = vld [vmem:[#allocation6 + $0x4c] ss:$16 sps:$4 sm:$0xff]   ;;  %v6648_v52 = vld [vmem:[#allocation6 + $0x40] ss:$16 sps:$4 sm:$0xff]  }
 0x43c   :  { %v1133_v58 = vpop.f32.mrf.mxu0  ;;  %v1174_v59 = vpop.f32.mrf.mxu1  ;;  %v6657_v56 = vld [vmem:[#allocation6 + $0x2c] ss:$16 sps:$4 sm:$0xff]  }
 0x43d   :  { %v4918_v60 = vmul.f32 -1.442695, %v1179_v57  ;;  %v1180_v61 = vadd.f32 %v1133_v58, %v421_v55  ;;  %v4920_v46 = vmul.f32 -1.442695, %v1181_v42  ;;  %v1182_v47 = vadd.f32 %v1174_v59, %v494_v45  ;;  %v6654_v55 = vld [vmem:[#allocation6 + $0x24] ss:$16 sps:$4 sm:$0xff]  }
 0x43e   :  { %v1135_v63 = vpop.f32.mrf.mxu0  ;;  %v1176_v1 = vpop.f32.mrf.mxu1  ;;  %v6660_v57 = vld [vmem:[#allocation6 + $0x20] ss:$16 sps:$4 sm:$0xff]   ;;  %v6663_v58 = vld [vmem:[#allocation6 + $0x28] ss:$16 sps:$4 sm:$0xff]   ;;  %v6666_v59 = vld [vmem:[#allocation6 + $0x4] ss:$16 sps:$4 sm:$0xff]  }
 0x43f   :  { %5506 = vpow2.f32 %v4918_v60  ;;  %v4919_v2 = vmul.f32 -1.442695, %v1180_v61  ;;  %v6669_v60 = vld [vmem:[#allocation6 + $0xc] ss:$16 sps:$4 sm:$0xff]   ;;  %v6672_v61 = vld [vmem:[#allocation6] ss:$16 sps:$4 sm:$0xff]  }
 0x440   :  { %v1136_v3 = vpop.f32.mrf.mxu0  ;;  %v1177_v4 = vpop.f32.mrf.mxu1  ;;  %v6675_v63 = vld [vmem:[#allocation6 + $0x8] ss:$16 sps:$4 sm:$0xff]   ;;  %v8042_v45 = vld [vmem:[#allocation28_spill] sm:$0xff] }
 0x441   :  { %5508 = vpow2.f32 %v4919_v2  ;;  %v8041_v3 = vld [vmem:[#allocation26_spill] sm:$0xff] }
 0x442   :  { %5510 = vpow2.f32 %v4920_v46 }
 0x443   :  { %5512 = vtanh.f32 %v1182_v47 }
 0x44c   :  { %v5507_v48 = vpop.eup %5506 }
 0x44d   :  { %v1192_v49 = vadd.f32 1.0, %v5507_v48 }
 0x44e   :  { %v5509_v50 = vpop.eup %5508 }
 0x44f   :  { %5514 = vrcp.f32 %v1192_v49  ;;  %v1193_v17 = vadd.f32 1.0, %v5509_v50  ;;  %v5511_v7 = vpop.eup %5510 }
 0x450   :  { %v5513_v6 = vpop.eup %5512  ;;  %v1194_v26 = vadd.f32 1.0, %v5511_v7  ;;  %v8043_v7 = vld [vmem:[#allocation27_spill] sm:$0xff] }
 0x451   :  { %5516 = vrcp.f32 %v1193_v17 }
 0x452   :  { %5518 = vrcp.f32 %v1194_v26 }
 0x45c   :  { %v5515_v10 = vpop.eup %5514 }
 0x45d   :  { %v1203_v19 = vmul.f32 %v5515_v10, %v5513_v6 }
 0x45e   :  { %v5517_v29 = vpop.eup %5516 }
 0x45f   :  { %v1202_v35 = vmul.f32 %v5517_v29, %v6531_v30  ;;  %v5519_v34 = vpop.eup %5518  ;;  %v6633_v30 = vld [vmem:[#allocation6 + $0x6c] ss:$16 sps:$4 sm:$0xff]  }
 0x461   :  { %v6607_v33 = vadd.f32 %v1203_v19, %v1202_v35  ;;  %v8044_v19 = vld [vmem:[#allocation29_spill] sm:$0xff] }
 0x463   :  { %5520 = vtanh.f32 %v6607_v33 }
 0x470   :  { %v5521_v62 = vpop.eup %5520 }
 0x471   :  { %v6610_v23 = vmul.f32 %v5521_v62, %v5519_v34 }
 0x473   :  { %v1214_v12 = vpack.c.bf16 %v6610_v23, %v6610_v23 }
 0x475   :  { %1248 = vmatmul.mubr.bf16.vlgmr.msra.gmra.mxu0 %v1214_v12  ;;  %1289 = vmatmul.mubr.bf16.vlgmr.msra.gmra.mxu1 %v1214_v12 }
 0x476   :  { %1334 = vmatpush1.bf16.msra.mxu0 %v6538_v25  ;;  %1375 = vmatpush1.bf16.msra.mxu1 %v6541_v8 }
 0x477   :  { %1335 = vmatprep.subr.bf16.mxu0 %v6544_v11  ;;  %1376 = vmatprep.subr.bf16.mxu1 %v6547_v16 }
 0x478   :  { %1365 = vmatprep.mubr.bf16.mxu0 %v8036_v53  ;;  %1406 = vmatprep.mubr.bf16.mxu1 %v8036_v53 }
 0x47a   :  { %1336 = vmatpush1.bf16.msra.mxu0 %v6552_v14  ;;  %1377 = vmatpush1.bf16.msra.mxu1 %v6555_v22 }
 0x47b   :  { %1337 = vmatprep.subr.bf16.mxu0 %v6558_v9  ;;  %1378 = vmatprep.subr.bf16.mxu1 %v6561_v24 }
 0x47e   :  { %1338 = vmatpush1.bf16.msra.mxu0 %v6564_v32  ;;  %1379 = vmatpush1.bf16.msra.mxu1 %v6567_v20 }
 0x47f   :  { %1339 = vmatprep.subr.bf16.mxu0 %v6570_v38  ;;  %1380 = vmatprep.subr.bf16.mxu1 %v6573_v39 }
 0x482   :  { %1340 = vmatpush1.bf16.msra.mxu0 %v6576_v40  ;;  %1381 = vmatpush1.bf16.msra.mxu1 %v6579_v41 }
 0x483   :  { %1341 = vmatprep.subr.bf16.mxu0 %v6630_v21  ;;  %1382 = vmatprep.subr.bf16.mxu1 %v6633_v30 }
 0x486   :  { %1342 = vmatpush1.bf16.msra.mxu0 %v6636_v44  ;;  %1383 = vmatpush1.bf16.msra.mxu1 %v6639_v13 }
 0x487   :  { %1343 = vmatprep.subr.bf16.mxu0 %v6642_v18  ;;  %1384 = vmatprep.subr.bf16.mxu1 %v6645_v51 }
 0x48a   :  { %1344 = vmatpush1.bf16.msra.mxu0 %v6648_v52  ;;  %1385 = vmatpush1.bf16.msra.mxu1 %v6651_v54 }
 0x48b   :  { %1345 = vmatprep.subr.bf16.mxu0 %v6654_v55  ;;  %1386 = vmatprep.subr.bf16.mxu1 %v6657_v56 }
 0x48e   :  { %1346 = vmatpush1.bf16.msra.mxu0 %v6660_v57  ;;  %1387 = vmatpush1.bf16.msra.mxu1 %v6663_v58 }
 0x48f   :  { %1347 = vmatprep.subr.bf16.mxu0 %v6666_v59  ;;  %1388 = vmatprep.subr.bf16.mxu1 %v6669_v60 }
 0x492   :  { %1348 = vmatpush1.bf16.msra.mxu0 %v6672_v61  ;;  %1389 = vmatpush1.bf16.msra.mxu1 %v6675_v63 }
 0x493   :  { %1451 = vmatprep.subr.bf16.mxu0 %v6520_v36  ;;  %1492 = vmatprep.subr.bf16.mxu1 %v6523_v37 }
 0x535   :  { %v1249_v1 = vpop.f32.mrf.mxu0  ;;  %v1290_v2 = vpop.f32.mrf.mxu1 }
 0x536   :  { %v1297_v4 = vadd.f32 %v1249_v1, %v8041_v3  ;;  %v1299_v6 = vadd.f32 %v1290_v2, %v8043_v7  ;;  %v8046_v7 = vld [vmem:[#allocation30_spill] sm:$0xff] }
 0x537   :  { %v1251_v5 = vpop.f32.mrf.mxu0  ;;  %v1292_v42 = vpop.f32.mrf.mxu1 }
 0x538   :  { %v4921_v43 = vmul.f32 -1.442695, %v1297_v4  ;;  %v1298_v46 = vadd.f32 %v1251_v5, %v8042_v45  ;;  %v4923_v10 = vmul.f32 -1.442695, %v1299_v6  ;;  %v1300_v29 = vadd.f32 %v1292_v42, %v8044_v19 }
 0x539   :  { %v1253_v47 = vpop.f32.mrf.mxu0  ;;  %v1294_v48 = vpop.f32.mrf.mxu1 }
 0x53a   :  { %5522 = vpow2.f32 %v4921_v43  ;;  %v4922_v49 = vmul.f32 -1.442695, %v1298_v46 }
 0x53b   :  { %v1254_v50 = vpop.f32.mrf.mxu0  ;;  %v1295_v17 = vpop.f32.mrf.mxu1 }
 0x53c   :  { %5524 = vpow2.f32 %v4922_v49  ;;  %v8045_v50 = vld [vmem:[#allocation32_spill] sm:$0xff] }
 0x53d   :  { %5526 = vpow2.f32 %v4923_v10  ;;  %v431_v17 = vadd.f32 %v8045_v50, %v6363_v27 }
 0x53e   :  { %5528 = vtanh.f32 %v1300_v29 }
 0x547   :  { %v5523_v26 = vpop.eup %5522 }
 0x548   :  { %v1310_v35 = vadd.f32 1.0, %v5523_v26 }
 0x549   :  { %v5525_v34 = vpop.eup %5524 }
 0x54a   :  { %5530 = vrcp.f32 %v1310_v35  ;;  %v1311_v62 = vadd.f32 1.0, %v5525_v34  ;;  %v5527_v12 = vpop.eup %5526 }
 0x54b   :  { %v5529_v1 = vpop.eup %5528  ;;  %v1312_v43 = vadd.f32 1.0, %v5527_v12 }
 0x54c   :  { %5532 = vrcp.f32 %v1311_v62 }
 0x54d   :  { %5534 = vrcp.f32 %v1312_v43 }
 0x557   :  { %v5531_v3 = vpop.eup %5530 }
 0x558   :  { %v1321_v4 = vmul.f32 %v5531_v3, %v5529_v1  ;;  %v8048_v3 = vld [vmem:[#allocation33_spill] sm:$0xff] }
 0x559   :  { %v5533_v5 = vpop.eup %5532 }
 0x55a   :  { %v1320_v45 = vmul.f32 %v5533_v5, %v6607_v33  ;;  %v5535_v42 = vpop.eup %5534 }
 0x55c   :  { %v6685_v2 = vadd.f32 %v1321_v4, %v1320_v45  ;;  %v504_v4 = vadd.f32 %v8048_v3, %v6366_v28  ;;  %v5258_v3 = vld [vmem:[#allocation8 + $0xe0] ss:$16 sps:$4 sm:$0xff]  }
 0x55e   :  { %5536 = vtanh.f32 %v6685_v2 }
 0x56b   :  { %v5537_v46 = vpop.eup %5536 }
 0x56c   :  { %v6688_v47 = vmul.f32 %v5537_v46, %v5535_v42 }
 0x56e   :  { %v1332_v48 = vpack.c.bf16 %v6688_v47, %v6688_v47 }
 0x570   :  { %1366 = vmatmul.mubr.bf16.vlgmr.msra.gmra.mxu0 %v1332_v48  ;;  %1407 = vmatmul.mubr.bf16.vlgmr.msra.gmra.mxu1 %v1332_v48 }
 0x571   :  { %1452 = vmatpush1.bf16.msra.mxu0 %v6538_v25  ;;  %1493 = vmatpush1.bf16.msra.mxu1 %v6541_v8 }
 0x572   :  { %1453 = vmatprep.subr.bf16.mxu0 %v6544_v11  ;;  %1494 = vmatprep.subr.bf16.mxu1 %v6547_v16 }
 0x573   :  { %1483 = vmatprep.mubr.bf16.mxu0 %v8036_v53  ;;  %1524 = vmatprep.mubr.bf16.mxu1 %v8036_v53 }
 0x575   :  { %1454 = vmatpush1.bf16.msra.mxu0 %v6552_v14  ;;  %1495 = vmatpush1.bf16.msra.mxu1 %v6555_v22 }
 0x576   :  { %1455 = vmatprep.subr.bf16.mxu0 %v6558_v9  ;;  %1496 = vmatprep.subr.bf16.mxu1 %v6561_v24 }
 0x579   :  { %1456 = vmatpush1.bf16.msra.mxu0 %v6564_v32  ;;  %1497 = vmatpush1.bf16.msra.mxu1 %v6567_v20 }
 0x57a   :  { %1457 = vmatprep.subr.bf16.mxu0 %v6570_v38  ;;  %1498 = vmatprep.subr.bf16.mxu1 %v6573_v39 }
 0x57d   :  { %1458 = vmatpush1.bf16.msra.mxu0 %v6576_v40  ;;  %1499 = vmatpush1.bf16.msra.mxu1 %v6579_v41 }
 0x57e   :  { %1459 = vmatprep.subr.bf16.mxu0 %v6630_v21  ;;  %1500 = vmatprep.subr.bf16.mxu1 %v6633_v30 }
 0x581   :  { %1460 = vmatpush1.bf16.msra.mxu0 %v6636_v44  ;;  %1501 = vmatpush1.bf16.msra.mxu1 %v6639_v13 }
 0x582   :  { %1461 = vmatprep.subr.bf16.mxu0 %v6642_v18  ;;  %1502 = vmatprep.subr.bf16.mxu1 %v6645_v51 }
 0x585   :  { %1462 = vmatpush1.bf16.msra.mxu0 %v6648_v52  ;;  %1503 = vmatpush1.bf16.msra.mxu1 %v6651_v54 }
 0x586   :  { %1463 = vmatprep.subr.bf16.mxu0 %v6654_v55  ;;  %1504 = vmatprep.subr.bf16.mxu1 %v6657_v56 }
 0x589   :  { %1464 = vmatpush1.bf16.msra.mxu0 %v6660_v57  ;;  %1505 = vmatpush1.bf16.msra.mxu1 %v6663_v58 }
 0x58a   :  { %1465 = vmatprep.subr.bf16.mxu0 %v6666_v59  ;;  %1506 = vmatprep.subr.bf16.mxu1 %v6669_v60 }
 0x58d   :  { %1466 = vmatpush1.bf16.msra.mxu0 %v6672_v61  ;;  %1507 = vmatpush1.bf16.msra.mxu1 %v6675_v63 }
 0x58e   :  { %1569 = vmatprep.subr.bf16.mxu0 %v6520_v36  ;;  %1610 = vmatprep.subr.bf16.mxu1 %v6523_v37  ;;  %v8047_v36 = vld [vmem:[#allocation31_spill] sm:$0xff] }
 0x630   :  { %v1367_v33 = vpop.f32.mrf.mxu0  ;;  %v1408_v49 = vpop.f32.mrf.mxu1 }
 0x631   :  { %v1415_v6 = vadd.f32 %v1367_v33, %v8046_v7  ;;  %v1417_v37 = vadd.f32 %v1408_v49, %v8047_v36 }
 0x632   :  { %v1369_v10 = vpop.f32.mrf.mxu0  ;;  %v1410_v19 = vpop.f32.mrf.mxu1 }
 0x633   :  { %v4924_v29 = vmul.f32 -1.442695, %v1415_v6  ;;  %v1416_v26 = vadd.f32 %v1369_v10, %v431_v17  ;;  %v4926_v5 = vmul.f32 -1.442695, %v1417_v37  ;;  %v1418_v43 = vadd.f32 %v1410_v19, %v504_v4  ;;  %v5261_v4 = vld [vmem:[#allocation8 + $0xe8] ss:$16 sps:$4 sm:$0xff]  }
 0x634   :  { %v1371_v35 = vpop.f32.mrf.mxu0  ;;  %v1412_v34 = vpop.f32.mrf.mxu1 }
 0x635   :  { %5538 = vpow2.f32 %v4924_v29  ;;  %v4925_v62 = vmul.f32 -1.442695, %v1416_v26 }
 0x636   :  { %v1372_v12 = vpop.f32.mrf.mxu0  ;;  %v1413_v1 = vpop.f32.mrf.mxu1 }
 0x637   :  { %5540 = vpow2.f32 %v4925_v62 }
 0x638   :  { %5542 = vpow2.f32 %v4926_v5 }
 0x639   :  { %5544 = vtanh.f32 %v1418_v43  ;;  %v5266_v43 = vld [vmem:[#allocation8 + $0xc4] ss:$16 sps:$4 sm:$0xff]  }
 0x642   :  { %v5539_v45 = vpop.eup %5538 }
 0x643   :  { %v1428_v42 = vadd.f32 1.0, %v5539_v45  ;;  %v5269_v45 = vld [vmem:[#allocation8 + $0xcc] ss:$16 sps:$4 sm:$0xff]  }
 0x644   :  { %v5541_v46 = vpop.eup %5540 }
 0x645   :  { %5546 = vrcp.f32 %v1428_v42  ;;  %v1429_v48 = vadd.f32 1.0, %v5541_v46  ;;  %v5543_v33 = vpop.eup %5542  ;;  %v5264_v42 = vld [vmem:[#allocation8 + $0xc0] ss:$16 sps:$4 sm:$0xff]   ;;  %v5267_v46 = vld [vmem:[#allocation8 + $0xc8] ss:$16 sps:$4 sm:$0xff]  }
 0x646   :  { %v5545_v50 = vpop.eup %5544  ;;  %v1430_v10 = vadd.f32 1.0, %v5543_v33  ;;  %v5275_v33 = vld [vmem:[#allocation8 + $0xac] ss:$16 sps:$4 sm:$0xff]  }
 0x647   :  { %5548 = vrcp.f32 %v1429_v48  ;;  %v5272_v48 = vld [vmem:[#allocation8 + $0xa4] ss:$16 sps:$4 sm:$0xff]  }
 0x648   :  { %5550 = vrcp.f32 %v1430_v10  ;;  %v5276_v10 = vld [vmem:[#allocation8 + $0x80] ss:$16 sps:$4 sm:$0xff]  }
 0x652   :  { %v5547_v17 = vpop.eup %5546 }
 0x653   :  { %v1439_v7 = vmul.f32 %v5547_v17, %v5545_v50  ;;  %v5270_v50 = vld [vmem:[#allocation8 + $0xa0] ss:$16 sps:$4 sm:$0xff]   ;;  %v5273_v17 = vld [vmem:[#allocation8 + $0xa8] ss:$16 sps:$4 sm:$0xff]  }
 0x654   :  { %v5549_v6 = vpop.eup %5548 }
 0x655   :  { %v1438_v49 = vmul.f32 %v5549_v6, %v6685_v2  ;;  %v5551_v19 = vpop.eup %5550  ;;  %v5281_v6 = vld [vmem:[#allocation8 + $0x8c] ss:$16 sps:$4 sm:$0xff]  }
 0x657   :  { %v6733_v29 = vadd.f32 %v1439_v7, %v1438_v49  ;;  %v5278_v7 = vld [vmem:[#allocation8 + $0x84] ss:$16 sps:$4 sm:$0xff]   ;;  %v5279_v49 = vld [vmem:[#allocation8 + $0x88] ss:$16 sps:$4 sm:$0xff]  }
 0x659   :  { %5552 = vtanh.f32 %v6733_v29 }
 0x666   :  { %v5553_v26 = vpop.eup %5552 }
 0x667   :  { %v6736_v35 = vmul.f32 %v5553_v26, %v5551_v19  ;;  %v5287_v19 = vld [vmem:[#allocation8 + $0x6c] ss:$16 sps:$4 sm:$0xff]   ;;  %v5282_v26 = vld [vmem:[#allocation8 + $0x60] ss:$16 sps:$4 sm:$0xff]  }
 0x669   :  { %v1450_v34 = vpack.c.bf16 %v6736_v35, %v6736_v35 }
 0x66b   :  { %1484 = vmatmul.mubr.bf16.vlgmr.msra.gmra.mxu0 %v1450_v34  ;;  %1525 = vmatmul.mubr.bf16.vlgmr.msra.gmra.mxu1 %v1450_v34  ;;  %v5285_v34 = vld [vmem:[#allocation8 + $0x68] ss:$16 sps:$4 sm:$0xff]  }
 0x66c   :  { %1570 = vmatpush1.bf16.msra.mxu0 %v6538_v25  ;;  %1611 = vmatpush1.bf16.msra.mxu1 %v6541_v8  ;;  %v5260_v25 = vld [vmem:[#allocation8 + $0xe4] ss:$16 sps:$4 sm:$0xff]   ;;  %v5263_v8 = vld [vmem:[#allocation8 + $0xec] ss:$16 sps:$4 sm:$0xff]  }
 0x66d   :  { %1571 = vmatprep.subr.bf16.mxu0 %v6544_v11  ;;  %1612 = vmatprep.subr.bf16.mxu1 %v6547_v16 }
 0x66e   :  { %1601 = vmatprep.mubr.bf16.mxu0 %v8036_v53  ;;  %1642 = vmatprep.mubr.bf16.mxu1 %v8036_v53 }
 0x670   :  { %1572 = vmatpush1.bf16.msra.mxu0 %v6552_v14  ;;  %1613 = vmatpush1.bf16.msra.mxu1 %v6555_v22  ;;  %v8049_v14 = vld [vmem:[#allocation34_spill] sm:$0xff] }
 0x671   :  { %1573 = vmatprep.subr.bf16.mxu0 %v6558_v9  ;;  %1614 = vmatprep.subr.bf16.mxu1 %v6561_v24 }
 0x674   :  { %1574 = vmatpush1.bf16.msra.mxu0 %v6564_v32  ;;  %1615 = vmatpush1.bf16.msra.mxu1 %v6567_v20  ;;  %v8050_v20 = vld [vmem:[#allocation36_spill] sm:$0xff] }
 0x675   :  { %1575 = vmatprep.subr.bf16.mxu0 %v6570_v38  ;;  %1616 = vmatprep.subr.bf16.mxu1 %v6573_v39 }
 0x678   :  { %1576 = vmatpush1.bf16.msra.mxu0 %v6576_v40  ;;  %1617 = vmatpush1.bf16.msra.mxu1 %v6579_v41 }
 0x679   :  { %1577 = vmatprep.subr.bf16.mxu0 %v6630_v21  ;;  %1618 = vmatprep.subr.bf16.mxu1 %v6633_v30 }
 0x67c   :  { %1578 = vmatpush1.bf16.msra.mxu0 %v6636_v44  ;;  %1619 = vmatpush1.bf16.msra.mxu1 %v6639_v13  ;;  %v8051_v44 = vld [vmem:[#allocation35_spill] sm:$0xff] }
 0x67d   :  { %1579 = vmatprep.subr.bf16.mxu0 %v6642_v18  ;;  %1620 = vmatprep.subr.bf16.mxu1 %v6645_v51  ;;  %v8052_v51 = vld [vmem:[#allocation37_spill] sm:$0xff] }
 0x680   :  { %1580 = vmatpush1.bf16.msra.mxu0 %v6648_v52  ;;  %1621 = vmatpush1.bf16.msra.mxu1 %v6651_v54 }
 0x681   :  { %1581 = vmatprep.subr.bf16.mxu0 %v6654_v55  ;;  %1622 = vmatprep.subr.bf16.mxu1 %v6657_v56 }
 0x684   :  { %1582 = vmatpush1.bf16.msra.mxu0 %v6660_v57  ;;  %1623 = vmatpush1.bf16.msra.mxu1 %v6663_v58 }
 0x685   :  { %1583 = vmatprep.subr.bf16.mxu0 %v6666_v59  ;;  %1624 = vmatprep.subr.bf16.mxu1 %v6669_v60 }
 0x688   :  { %1584 = vmatpush1.bf16.msra.mxu0 %v6672_v61  ;;  %1625 = vmatpush1.bf16.msra.mxu1 %v6675_v63 }
 0x689   :  { %1907 = vmatprep.subr.bf16.mxu0 %v5260_v25  ;;  %1980 = vmatprep.subr.bf16.mxu1 %v5263_v8  ;;  %v5290_v25 = vld [vmem:[#allocation8 + $0x44] ss:$16 sps:$4 sm:$0xff]   ;;  %v5293_v8 = vld [vmem:[#allocation8 + $0x4c] ss:$16 sps:$4 sm:$0xff]  }
 0x72b   :  { %v1485_v11 = vpop.f32.mrf.mxu0  ;;  %v1526_v16 = vpop.f32.mrf.mxu1 }
 0x72c   :  { %v1533_v22 = vadd.f32 %v1485_v11, %v8049_v14  ;;  %v1535_v13 = vadd.f32 %v1526_v16, %v8051_v44  ;;  %v5288_v11 = vld [vmem:[#allocation8 + $0x40] ss:$16 sps:$4 sm:$0xff]   ;;  %v5291_v16 = vld [vmem:[#allocation8 + $0x48] ss:$16 sps:$4 sm:$0xff]   ;;  %v5296_v14 = vld [vmem:[#allocation8 + $0x24] ss:$16 sps:$4 sm:$0xff]  }
 0x72d   :  { %v1487_v9 = vpop.f32.mrf.mxu0  ;;  %v1528_v24 = vpop.f32.mrf.mxu1  ;;  %v6816_v44 = vld [vmem:[#allocation9 + $0xc8] ss:$16 sps:$4 sm:$0xff]  }
 0x72e   :  { %v4927_v32 = vmul.f32 -1.442695, %v1533_v22  ;;  %v1534_v38 = vadd.f32 %v1487_v9, %v8050_v20  ;;  %v4929_v18 = vmul.f32 -1.442695, %v1535_v13  ;;  %v1536_v52 = vadd.f32 %v1528_v24, %v8052_v51  ;;  %v5299_v22 = vld [vmem:[#allocation8 + $0x2c] ss:$16 sps:$4 sm:$0xff]  }
 0x72f   :  { %v1489_v39 = vpop.f32.mrf.mxu0  ;;  %v1530_v40 = vpop.f32.mrf.mxu1  ;;  %v5294_v9 = vld [vmem:[#allocation8 + $0x20] ss:$16 sps:$4 sm:$0xff]   ;;  %v5297_v24 = vld [vmem:[#allocation8 + $0x28] ss:$16 sps:$4 sm:$0xff]   ;;  %v5305_v20 = vld [vmem:[#allocation8 + $0xc] ss:$16 sps:$4 sm:$0xff]  }
 0x730   :  { %5554 = vpow2.f32 %v4927_v32  ;;  %v4928_v41 = vmul.f32 -1.442695, %v1534_v38  ;;  %v5302_v32 = vld [vmem:[#allocation8 + $0x4] ss:$16 sps:$4 sm:$0xff]   ;;  %v5300_v38 = vld [vmem:[#allocation8] ss:$16 sps:$4 sm:$0xff]   ;;  %v1689_v40 = vpack.c.bf16 %v6484_v31, %v6436_v0 }
 0x731   :  { %v1490_v21 = vpop.f32.mrf.mxu0  ;;  %v1531_v30 = vpop.f32.mrf.mxu1  ;;  %v5303_v39 = vld [vmem:[#allocation8 + $0x8] ss:$16 sps:$4 sm:$0xff]   ;;  %v6798_v0 = vld [vmem:[#allocation9 + $0xe4] ss:$16 sps:$4 sm:$0xff]   ;;  %v6800_v31 = vld [vmem:[#allocation9 + $0xec] ss:$16 sps:$4 sm:$0xff]  }
 0x732   :  { %5556 = vpow2.f32 %v4928_v41  ;;  %v1690_v41 = vpack.c.bf16 %v6610_v23, %v6534_v15  ;;  %v1691_v21 = vpack.c.bf16 %v6736_v35, %v6688_v47  ;;  %v6802_v15 = vld [vmem:[#allocation9 + $0xe0] ss:$16 sps:$4 sm:$0xff]   ;;  %v6804_v23 = vld [vmem:[#allocation9 + $0xe8] ss:$16 sps:$4 sm:$0xff]   ;;  %v6810_v47 = vld [vmem:[#allocation9 + $0xc4] ss:$16 sps:$4 sm:$0xff]  }
 0x733   :  { %5558 = vpow2.f32 %v4929_v18  ;;  %v6812_v35 = vld [vmem:[#allocation9 + $0xcc] ss:$16 sps:$4 sm:$0xff]   ;;  %v6814_v30 = vld [vmem:[#allocation9 + $0xc0] ss:$16 sps:$4 sm:$0xff]   ;;  %v6822_v13 = vld [vmem:[#allocation9 + $0xa4] ss:$16 sps:$4 sm:$0xff]  }
 0x734   :  { %5560 = vtanh.f32 %v1536_v52  ;;  %v6824_v18 = vld [vmem:[#allocation9 + $0xac] ss:$16 sps:$4 sm:$0xff]   ;;  %v6826_v51 = vld [vmem:[#allocation9 + $0xa0] ss:$16 sps:$4 sm:$0xff]   ;;  %v6828_v52 = vld [vmem:[#allocation9 + $0xa8] ss:$16 sps:$4 sm:$0xff]  }
 0x73d   :  { %v5555_v54 = vpop.eup %5554 }
 0x73e   :  { %v1546_v55 = vadd.f32 1.0, %v5555_v54  ;;  %v6834_v54 = vld [vmem:[#allocation9 + $0x84] ss:$16 sps:$4 sm:$0xff]  }
 0x73f   :  { %v5557_v56 = vpop.eup %5556 }
 0x740   :  { %5562 = vrcp.f32 %v1546_v55  ;;  %v1547_v57 = vadd.f32 1.0, %v5557_v56  ;;  %v5559_v58 = vpop.eup %5558  ;;  %v6836_v55 = vld [vmem:[#allocation9 + $0x8c] ss:$16 sps:$4 sm:$0xff]   ;;  %v6838_v56 = vld [vmem:[#allocation9 + $0x80] ss:$16 sps:$4 sm:$0xff]  }
 0x741   :  { %v5561_v59 = vpop.eup %5560  ;;  %v1548_v2 = vadd.f32 1.0, %v5559_v58  ;;  %v6846_v58 = vld [vmem:[#allocation9 + $0x64] ss:$16 sps:$4 sm:$0xff]  }
 0x742   :  { %5564 = vrcp.f32 %v1547_v57  ;;  %v6840_v57 = vld [vmem:[#allocation9 + $0x88] ss:$16 sps:$4 sm:$0xff]  }
 0x743   :  { %5566 = vrcp.f32 %v1548_v2  ;;  %v6860_v2 = vld [vmem:[#allocation9 + $0x4c] ss:$16 sps:$4 sm:$0xff]  }
 0x74d   :  { %v5563_v60 = vpop.eup %5562 }
 0x74e   :  { %v1557_v61 = vmul.f32 %v5563_v60, %v5561_v59  ;;  %v6848_v59 = vld [vmem:[#allocation9 + $0x6c] ss:$16 sps:$4 sm:$0xff]   ;;  %v6850_v60 = vld [vmem:[#allocation9 + $0x60] ss:$16 sps:$4 sm:$0xff]  }
 0x74f   :  { %v5565_v63 = vpop.eup %5564 }
 0x750   :  { %v1556_v62 = vmul.f32 %v5565_v63, %v6733_v29  ;;  %v5567_v1 = vpop.eup %5566  ;;  %v5284_v29 = vld [vmem:[#allocation8 + $0x64] ss:$16 sps:$4 sm:$0xff]  }
 0x751   :  { %v6858_v63 = vld [vmem:[#allocation9 + $0x44] ss:$16 sps:$4 sm:$0xff]  }
 0x752   :  { %v6777_v12 = vadd.f32 %v1557_v61, %v1556_v62  ;;  %v6852_v61 = vld [vmem:[#allocation9 + $0x68] ss:$16 sps:$4 sm:$0xff]   ;;  %v6862_v62 = vld [vmem:[#allocation9 + $0x40] ss:$16 sps:$4 sm:$0xff]  }
 0x754   :  { %5568 = vtanh.f32 %v6777_v12 }
 0x761   :  { %v5569_v36 = vpop.eup %5568 }
 0x762   :  { %v6780_v37 = vmul.f32 %v5569_v36, %v5567_v1  ;;  %v6864_v1 = vld [vmem:[#allocation9 + $0x48] ss:$16 sps:$4 sm:$0xff]   ;;  %v6870_v36 = vld [vmem:[#allocation9 + $0x24] ss:$16 sps:$4 sm:$0xff]  }
 0x764   :  { %v1568_v5 = vpack.c.bf16 %v6780_v37, %v6780_v37 }
 0x766   :  { %1602 = vmatmul.mubr.bf16.vlgmr.msra.gmra.mxu0 %v1568_v5  ;;  %1643 = vmatmul.mubr.bf16.vlgmr.msra.gmra.mxu1 %v1568_v5  ;;  %v6876_v5 = vld [vmem:[#allocation9 + $0x28] ss:$16 sps:$4 sm:$0xff]  }
 0x767   :  { %1908 = vmatpush1.bf16.msra.mxu0 %v5258_v3  ;;  %1981 = vmatpush1.bf16.msra.mxu1 %v5261_v4  ;;  %v6872_v3 = vld [vmem:[#allocation9 + $0x2c] ss:$16 sps:$4 sm:$0xff]   ;;  %v6874_v4 = vld [vmem:[#allocation9 + $0x20] ss:$16 sps:$4 sm:$0xff]  }
 0x768   :  { %1909 = vmatprep.subr.bf16.mxu0 %v5266_v43  ;;  %1982 = vmatprep.subr.bf16.mxu1 %v5269_v45  ;;  %v6878_v43 = vld [vmem:[#allocation9 + $0x4] ss:$16 sps:$4 sm:$0xff]   ;;  %v6880_v45 = vld [vmem:[#allocation9 + $0xc] ss:$16 sps:$4 sm:$0xff]  }
 0x769   :  { %1939 = vmatprep.mubr.bf16.mxu0 %v8036_v53  ;;  %2012 = vmatprep.mubr.bf16.mxu1 %v8036_v53 }
 0x76b   :  { %1910 = vmatpush1.bf16.msra.mxu0 %v5264_v42  ;;  %1983 = vmatpush1.bf16.msra.mxu1 %v5267_v46  ;;  %v6886_v42 = vld [vmem:[#allocation9] ss:$16 sps:$4 sm:$0xff]   ;;  %v6888_v46 = vld [vmem:[#allocation9 + $0x8] ss:$16 sps:$4 sm:$0xff]  }
 0x76c   :  { %1911 = vmatprep.subr.bf16.mxu0 %v5272_v48  ;;  %1984 = vmatprep.subr.bf16.mxu1 %v5275_v33 }
 0x76f   :  { %1912 = vmatpush1.bf16.msra.mxu0 %v5270_v50  ;;  %1985 = vmatpush1.bf16.msra.mxu1 %v5273_v17  ;;  %v8053_v50 = vld [vmem:[#allocation40_spill] sm:$0xff] }
 0x770   :  { %1913 = vmatprep.subr.bf16.mxu0 %v5278_v7  ;;  %1986 = vmatprep.subr.bf16.mxu1 %v5281_v6  ;;  %v441_v17 = vadd.f32 %v8053_v50, %v6363_v27  ;;  %v8054_v7 = vld [vmem:[#allocation38_spill] sm:$0xff] }
 0x773   :  { %1914 = vmatpush1.bf16.msra.mxu0 %v5276_v10  ;;  %1987 = vmatpush1.bf16.msra.mxu1 %v5279_v49 }
 0x774   :  { %1915 = vmatprep.subr.bf16.mxu0 %v5284_v29  ;;  %1988 = vmatprep.subr.bf16.mxu1 %v5287_v19 }
 0x777   :  { %1916 = vmatpush1.bf16.msra.mxu0 %v5282_v26  ;;  %1989 = vmatpush1.bf16.msra.mxu1 %v5285_v34 }
 0x778   :  { %1917 = vmatprep.subr.bf16.mxu0 %v5290_v25  ;;  %1990 = vmatprep.subr.bf16.mxu1 %v5293_v8 }
 0x77b   :  { %1918 = vmatpush1.bf16.msra.mxu0 %v5288_v11  ;;  %1991 = vmatpush1.bf16.msra.mxu1 %v5291_v16  ;;  %v8055_v16 = vld [vmem:[#allocation39_spill] sm:$0xff] }
 0x77c   :  { %1919 = vmatprep.subr.bf16.mxu0 %v5296_v14  ;;  %1992 = vmatprep.subr.bf16.mxu1 %v5299_v22  ;;  %v8056_v22 = vld [vmem:[#allocation41_spill] sm:$0xff] }
 0x77f   :  { %1920 = vmatpush1.bf16.msra.mxu0 %v5294_v9  ;;  %1993 = vmatpush1.bf16.msra.mxu1 %v5297_v24  ;;  %v514_v9 = vadd.f32 %v8056_v22, %v6366_v28 }
 0x780   :  { %1921 = vmatprep.subr.bf16.mxu0 %v5302_v32  ;;  %1994 = vmatprep.subr.bf16.mxu1 %v5305_v20 }
 0x783   :  { %1922 = vmatpush1.bf16.msra.mxu0 %v5300_v38  ;;  %1995 = vmatpush1.bf16.msra.mxu1 %v5303_v39 }
 0x784   :  { %2281 = vmatprep.subr.bf16.mxu0 %v6798_v0  ;;  %2322 = vmatprep.subr.bf16.mxu1 %v6800_v31 }
 0x786   :  { %1940 = vmatmul.mubr.bf16.vlgmr.msra.gmra.mxu0 %v1689_v40  ;;  %2013 = vmatmul.mubr.bf16.vlgmr.msra.gmra.mxu1 %v1689_v40 }
 0x787   :  { %1949 = vmatprep.mubr.bf16.mxu0 %v8036_v53  ;;  %2022 = vmatprep.mubr.bf16.mxu1 %v8036_v53 }
 0x788   :  { %2282 = vmatpush1.bf16.msra.mxu0 %v6802_v15  ;;  %2323 = vmatpush1.bf16.msra.mxu1 %v6804_v23 }
 0x789   :  { %2283 = vmatprep.subr.bf16.mxu0 %v6810_v47  ;;  %2324 = vmatprep.subr.bf16.mxu1 %v6812_v35 }
 0x78c   :  { %2284 = vmatpush1.bf16.msra.mxu0 %v6814_v30  ;;  %2325 = vmatpush1.bf16.msra.mxu1 %v6816_v44 }
 0x78d   :  { %2285 = vmatprep.subr.bf16.mxu0 %v6822_v13  ;;  %2326 = vmatprep.subr.bf16.mxu1 %v6824_v18 }
 0x78e   :  { %1950 = vmatmul.mubr.bf16.gmra.mxu0 %v1690_v41  ;;  %2023 = vmatmul.mubr.bf16.gmra.mxu1 %v1690_v41 }
 0x78f   :  { %1959 = vmatprep.mubr.bf16.mxu0 %v8036_v53  ;;  %2032 = vmatprep.mubr.bf16.mxu1 %v8036_v53 }
 0x790   :  { %2286 = vmatpush1.bf16.msra.mxu0 %v6826_v51  ;;  %2327 = vmatpush1.bf16.msra.mxu1 %v6828_v52 }
 0x791   :  { %2287 = vmatprep.subr.bf16.mxu0 %v6834_v54  ;;  %2328 = vmatprep.subr.bf16.mxu1 %v6836_v55 }
 0x794   :  { %2288 = vmatpush1.bf16.msra.mxu0 %v6838_v56  ;;  %2329 = vmatpush1.bf16.msra.mxu1 %v6840_v57 }
 0x795   :  { %2289 = vmatprep.subr.bf16.mxu0 %v6846_v58  ;;  %2330 = vmatprep.subr.bf16.mxu1 %v6848_v59 }
 0x796   :  { %1960 = vmatmul.mubr.bf16.gmra.mxu0 %v1691_v21  ;;  %2033 = vmatmul.mubr.bf16.gmra.mxu1 %v1691_v21 }
 0x797   :  { %1969 = vmatprep.mubr.bf16.mxu0 %v8036_v53  ;;  %2042 = vmatprep.mubr.bf16.mxu1 %v8036_v53 }
 0x798   :  { %2290 = vmatpush1.bf16.msra.mxu0 %v6850_v60  ;;  %2331 = vmatpush1.bf16.msra.mxu1 %v6852_v61 }
 0x799   :  { %2291 = vmatprep.subr.bf16.mxu0 %v6858_v63  ;;  %2332 = vmatprep.subr.bf16.mxu1 %v6860_v2 }
 0x79c   :  { %2292 = vmatpush1.bf16.msra.mxu0 %v6862_v62  ;;  %2333 = vmatpush1.bf16.msra.mxu1 %v6864_v1 }
 0x79d   :  { %2293 = vmatprep.subr.bf16.mxu0 %v6870_v36  ;;  %2334 = vmatprep.subr.bf16.mxu1 %v6872_v3 }
 0x7a0   :  { %2294 = vmatpush1.bf16.msra.mxu0 %v6874_v4  ;;  %2335 = vmatpush1.bf16.msra.mxu1 %v6876_v5 }
 0x7a1   :  { %2295 = vmatprep.subr.bf16.mxu0 %v6878_v43  ;;  %2336 = vmatprep.subr.bf16.mxu1 %v6880_v45 }
 0x7a4   :  { %2296 = vmatpush1.bf16.msra.mxu0 %v6886_v42  ;;  %2337 = vmatpush1.bf16.msra.mxu1 %v6888_v46 }
 0x7a5   :  { %2397 = vmatprep.subr.bf16.mxu0 %v6798_v0  ;;  %2438 = vmatprep.subr.bf16.mxu1 %v6800_v31 }
 0x826   :  { %v1603_v48 = vpop.f32.mrf.mxu0  ;;  %v1644_v33 = vpop.f32.mrf.mxu1 }
 0x827   :  { %v1651_v6 = vadd.f32 %v1603_v48, %v8054_v7  ;;  %v1653_v14 = vadd.f32 %v1644_v33, %v8055_v16 }
 0x828   :  { %v1605_v10 = vpop.f32.mrf.mxu0  ;;  %v1646_v49 = vpop.f32.mrf.mxu1 }
 0x829   :  { %v4930_v29 = vmul.f32 -1.442695, %v1651_v6  ;;  %v1652_v19 = vadd.f32 %v1605_v10, %v441_v17  ;;  %v4932_v24 = vmul.f32 -1.442695, %v1653_v14  ;;  %v1654_v27 = vadd.f32 %v1646_v49, %v514_v9 }
 0x82a   :  { %v1607_v26 = vpop.f32.mrf.mxu0  ;;  %v1648_v34 = vpop.f32.mrf.mxu1 }
 0x82b   :  { %5570 = vpow2.f32 %v4930_v29  ;;  %v4931_v25 = vmul.f32 -1.442695, %v1652_v19 }
 0x82c   :  { %v1608_v8 = vpop.f32.mrf.mxu0  ;;  %v1649_v11 = vpop.f32.mrf.mxu1 }
 0x82d   :  { %5572 = vpow2.f32 %v4931_v25 }
 0x82e   :  { %5574 = vpow2.f32 %v4932_v24 }
 0x82f   :  { %5576 = vtanh.f32 %v1654_v27 }
 0x838   :  { %v5571_v32 = vpop.eup %5570 }
 0x839   :  { %v1664_v20 = vadd.f32 1.0, %v5571_v32 }
 0x83a   :  { %v5573_v38 = vpop.eup %5572 }
 0x83b   :  { %5578 = vrcp.f32 %v1664_v20  ;;  %v1665_v39 = vadd.f32 1.0, %v5573_v38  ;;  %v5575_v40 = vpop.eup %5574 }
 0x83c   :  { %v5577_v41 = vpop.eup %5576  ;;  %v1666_v17 = vadd.f32 1.0, %v5575_v40 }
 0x83d   :  { %5580 = vrcp.f32 %v1665_v39 }
 0x83e   :  { %5582 = vrcp.f32 %v1666_v17  ;;  %v1725_v17 = vld [vmem:[%s7995_s6] sm:$0xf] }
 0x848   :  { %v5579_v21 = vpop.eup %5578 }
 0x849   :  { %v1675_v48 = vmul.f32 %v5579_v21, %v5577_v41 }
 0x84a   :  { %v5581_v50 = vpop.eup %5580 }
 0x84b   :  { %v1674_v33 = vmul.f32 %v5581_v50, %v6777_v12  ;;  %v5583_v28 = vpop.eup %5582  ;;  %v1941_v12 = vpop.f32.mrf.mxu0 }
 0x84d   :  { %v1676_v7 = vadd.f32 %v1675_v48, %v1674_v33  ;;  %v1943_v29 = vpop.f32.mrf.mxu0 }
 0x84f   :  { %5584 = vtanh.f32 %v1676_v7  ;;  %v6942_v26 = vpop.f32.mrf.mxu0 }
 0x851   :  { %v6946_v25 = vpop.f32.mrf.mxu0 }
 0x853   :  { %v6950_v11 = vpop.f32.mrf.mxu0 }
 0x855   :  { %v6954_v14 = vpop.f32.mrf.mxu0 }
 0x857   :  { %v6958_v9 = vpop.f32.mrf.mxu0 }
 0x858   :  { %8059 = vst [vmem:[#allocation23_spill] sm:$0xff] %v6958_v9 }
 0x859   :  { %v6962_v27 = vpop.f32.mrf.mxu0 }
 0x85a   :  { %8061 = vst [vmem:[#allocation26_spill] sm:$0xff] %v6962_v27  ;;  %v8081_v27 = vld [vmem:[#allocation18_spill] sm:$0xff] }
 0x85b   :  { %v6966_v20 = vpop.f32.mrf.mxu0  ;;  %v7010_v9 = vrot.slane %v1725_v17, %v8081_v27 }
 0x85c   :  { %v5585_v6 = vpop.eup %5584  ;;  %8063 = vst [vmem:[#allocation27_spill] sm:$0xff] %v6966_v20 }
 0x85d   :  { %v1678_v10 = vmul.f32 %v5585_v6, %v5583_v28  ;;  %v6970_v39 = vpop.f32.mrf.mxu0 }
 0x85e   :  { %8065 = vst [vmem:[#allocation32_spill] sm:$0xff] %v6970_v39 }
 0x85f   :  { %v1692_v49 = vpack.c.bf16 %v1678_v10, %v6780_v37  ;;  %v2014_v37 = vpop.f32.mrf.mxu1  ;;  %v6974_v41 = vpop.f32.mrf.mxu0  ;;  %v8075_v10 = vld [vmem:[#allocation19_spill] sm:$0xff] }
 0x860   :  { %8067 = vst [vmem:[#allocation31_spill] sm:$0xff] %v6974_v41 }
 0x861   :  { %1970 = vmatmul.mubr.bf16.gmra.mxu0 %v1692_v49  ;;  %2043 = vmatmul.mubr.bf16.gmra.mxu1 %v1692_v49  ;;  %v2016_v19 = vpop.f32.mrf.mxu1  ;;  %v6978_v48 = vpop.f32.mrf.mxu0  ;;  %v6994_v49 = vrot.slane %v1725_v17, %v8075_v10 }
 0x862   :  { %2313 = vmatprep.mubr.bf16.mxu0 %v8036_v53  ;;  %2354 = vmatprep.mubr.bf16.mxu1 %v8036_v53  ;;  %8069 = vst [vmem:[#allocation34_spill] sm:$0xff] %v6978_v48 }
 0x863   :  { %v6944_v34 = vpop.f32.mrf.mxu1 }
 0x865   :  { %v6948_v8 = vpop.f32.mrf.mxu1 }
 0x867   :  { %v6952_v16 = vpop.f32.mrf.mxu1 }
 0x868   :  { %8057 = vst [vmem:[#allocation24_spill] sm:$0xff] %v6952_v16 }
 0x869   :  { %2314 = vmatmul.mubr.bf16.vlgmr.msra.gmra.mxu0 %v8036_v53  ;;  %2355 = vmatmul.mubr.bf16.vlgmr.msra.gmra.mxu1 %v8036_v53  ;;  %v6956_v22 = vpop.f32.mrf.mxu1 }
 0x86a   :  { %2398 = vmatpush1.bf16.msra.mxu0 %v6802_v15  ;;  %2439 = vmatpush1.bf16.msra.mxu1 %v6804_v23  ;;  %8058 = vst [vmem:[#allocation22_spill] sm:$0xff] %v6956_v22  ;;  %v8082_v22 = vld [vmem:[#allocation21_spill] sm:$0xff] }
 0x86b   :  { %2399 = vmatprep.subr.bf16.mxu0 %v6810_v47  ;;  %2440 = vmatprep.subr.bf16.mxu1 %v6812_v35  ;;  %v6960_v24 = vpop.f32.mrf.mxu1  ;;  %v7014_v16 = vrot.slane %v1725_v17, %v8082_v22 }
 0x86c   :  { %2429 = vmatprep.mubr.bf16.mxu0 %v8036_v53  ;;  %2470 = vmatprep.mubr.bf16.mxu1 %v8036_v53  ;;  %8060 = vst [vmem:[#allocation25_spill] sm:$0xff] %v6960_v24 }
 0x86d   :  { %v6964_v32 = vpop.f32.mrf.mxu1 }
 0x86e   :  { %2400 = vmatpush1.bf16.msra.mxu0 %v6814_v30  ;;  %2441 = vmatpush1.bf16.msra.mxu1 %v6816_v44  ;;  %8062 = vst [vmem:[#allocation28_spill] sm:$0xff] %v6964_v32 }
 0x86f   :  { %2401 = vmatprep.subr.bf16.mxu0 %v6822_v13  ;;  %2442 = vmatprep.subr.bf16.mxu1 %v6824_v18  ;;  %v6968_v38 = vpop.f32.mrf.mxu1 }
 0x870   :  { %8064 = vst [vmem:[#allocation29_spill] sm:$0xff] %v6968_v38 }
 0x871   :  { %v6972_v40 = vpop.f32.mrf.mxu1 }
 0x872   :  { %2402 = vmatpush1.bf16.msra.mxu0 %v6826_v51  ;;  %2443 = vmatpush1.bf16.msra.mxu1 %v6828_v52  ;;  %8066 = vst [vmem:[#allocation30_spill] sm:$0xff] %v6972_v40 }
 0x873   :  { %2403 = vmatprep.subr.bf16.mxu0 %v6834_v54  ;;  %2444 = vmatprep.subr.bf16.mxu1 %v6836_v55  ;;  %v6976_v21 = vpop.f32.mrf.mxu1 }
 0x874   :  { %8068 = vst [vmem:[#allocation33_spill] sm:$0xff] %v6976_v21 }
 0x875   :  { %v6980_v50 = vpop.f32.mrf.mxu1 }
 0x876   :  { %2404 = vmatpush1.bf16.msra.mxu0 %v6838_v56  ;;  %2445 = vmatpush1.bf16.msra.mxu1 %v6840_v57  ;;  %8070 = vst [vmem:[#allocation36_spill] sm:$0xff] %v6980_v50  ;;  %v8078_v50 = vld [vmem:[#allocation20_spill] sm:$0xff] }
 0x877   :  { %2405 = vmatprep.subr.bf16.mxu0 %v6846_v58  ;;  %2446 = vmatprep.subr.bf16.mxu1 %v6848_v59  ;;  %v7001_v41 = vrot.slane %v1725_v17, %v8078_v50 }
 0x87a   :  { %2406 = vmatpush1.bf16.msra.mxu0 %v6850_v60  ;;  %2447 = vmatpush1.bf16.msra.mxu1 %v6852_v61 }
 0x87b   :  { %2407 = vmatprep.subr.bf16.mxu0 %v6858_v63  ;;  %2448 = vmatprep.subr.bf16.mxu1 %v6860_v2 }
 0x87e   :  { %2408 = vmatpush1.bf16.msra.mxu0 %v6862_v62  ;;  %2449 = vmatpush1.bf16.msra.mxu1 %v6864_v1 }
 0x87f   :  { %2409 = vmatprep.subr.bf16.mxu0 %v6870_v36  ;;  %2450 = vmatprep.subr.bf16.mxu1 %v6872_v3 }
 0x882   :  { %2410 = vmatpush1.bf16.msra.mxu0 %v6874_v4  ;;  %2451 = vmatpush1.bf16.msra.mxu1 %v6876_v5 }
 0x883   :  { %2411 = vmatprep.subr.bf16.mxu0 %v6878_v43  ;;  %2452 = vmatprep.subr.bf16.mxu1 %v6880_v45 }
 0x886   :  { %2412 = vmatpush1.bf16.msra.mxu0 %v6886_v42  ;;  %2453 = vmatpush1.bf16.msra.mxu1 %v6888_v46 }
 0x887   :  { %2513 = vmatprep.subr.bf16.mxu0 %v6798_v0  ;;  %2554 = vmatprep.subr.bf16.mxu1 %v6800_v31 }
 0x921   :  { %v6985_v33 = vpop.f32.mrf.mxu0  ;;  %v6987_v7 = vpop.f32.mrf.mxu1 }
 0x922   :  { %8071 = vst [vmem:[#allocation35_spill] sm:$0xff] %v6985_v33  ;;  %8072 = vst [vmem:[#allocation37_spill] sm:$0xff] %v6987_v7  ;;  %v1942_v7 = vadd.f32 %v1941_v12, %v6994_v49  ;;  %v2015_v12 = vadd.f32 %v2014_v37, %v7010_v9 }
 0x923   :  { %v6989_v28 = vpop.f32.mrf.mxu0  ;;  %v6991_v6 = vpop.f32.mrf.mxu1 }
 0x924   :  { %8073 = vst [vmem:[#allocation40_spill] sm:$0xff] %v6989_v28  ;;  %8074 = vst [vmem:[#allocation38_spill] sm:$0xff] %v6991_v6  ;;  %v1944_v6 = vadd.f32 %v1943_v29, %v7001_v41 }
 0x925   :  { %v6996_v21 = vpop.f32.mrf.mxu0  ;;  %v6998_v48 = vpop.f32.mrf.mxu1 }
 0x926   :  { %8076 = vst [vmem:[#allocation39_spill] sm:$0xff] %v6996_v21  ;;  %8077 = vst [vmem:[#allocation41_spill] sm:$0xff] %v6998_v48 }
 0x927   :  { %v7003_v40 = vpop.f32.mrf.mxu0  ;;  %v7005_v38 = vpop.f32.mrf.mxu1 }
 0x928   :  { %8079 = vst [vmem:[#allocation42_spill] sm:$0xff] %v7003_v40  ;;  %8080 = vst [vmem:[#allocation43_spill] sm:$0xff] %v7005_v38 }
 0x929   :  { %v2315_v33 = vpop.f32.mrf.mxu0  ;;  %v2356_v28 = vpop.f32.mrf.mxu1 }
 0x92a   :  { %v2363_v39 = vadd.f32 %v2315_v33, %v1942_v7  ;;  %v2365_v29 = vadd.f32 %v2356_v28, %v2015_v12  ;;  %v2017_v33 = vadd.f32 %v2016_v19, %v7014_v16 }
 0x92b   :  { %v2317_v10 = vpop.f32.mrf.mxu0  ;;  %v2358_v20 = vpop.f32.mrf.mxu1 }
 0x92c   :  { %v4997_v32 = vmul.f32 -1.442695, %v2363_v39  ;;  %v2364_v21 = vadd.f32 %v2317_v10, %v1944_v6  ;;  %v4999_v39 = vmul.f32 -1.442695, %v2365_v29 }
 0x92d   :  { %v2319_v24 = vpop.f32.mrf.mxu0  ;;  %v2360_v48 = vpop.f32.mrf.mxu1 }
 0x92e   :  { %5586 = vpow2.f32 %v4997_v32  ;;  %v4998_v50 = vmul.f32 -1.442695, %v2364_v21  ;;  %v2366_v24 = vadd.f32 %v2358_v20, %v2017_v33  ;;  %v1946_v33 = vadd.f32 %v6942_v26, %v6994_v49 }
 0x92f   :  { %v2320_v40 = vpop.f32.mrf.mxu0  ;;  %v2361_v38 = vpop.f32.mrf.mxu1  ;;  %v2019_v26 = vadd.f32 %v6944_v34, %v7010_v9 }
 0x930   :  { %5588 = vpow2.f32 %v4998_v50 }
 0x931   :  { %5590 = vpow2.f32 %v4999_v39 }
 0x93b   :  { %v5587_v7 = vpop.eup %5586 }
 0x93c   :  { %v2376_v48 = vadd.f32 1.0, %v5587_v7 }
 0x93d   :  { %v5589_v32 = vpop.eup %5588 }
 0x93e   :  { %5592 = vrcp.f32 %v2376_v48  ;;  %v2377_v21 = vadd.f32 1.0, %v5589_v32  ;;  %v5591_v38 = vpop.eup %5590 }
 0x93f   :  { %5594 = vtanh.f32 %v2366_v24  ;;  %v2378_v6 = vadd.f32 1.0, %v5591_v38  ;;  %v1948_v24 = vadd.f32 %v6946_v25, %v7001_v41 }
 0x940   :  { %5596 = vrcp.f32 %v2377_v21 }
 0x941   :  { %5598 = vrcp.f32 %v2378_v6 }
 0x94b   :  { %v5593_v40 = vpop.eup %5592 }
 0x94c   :  { %v5595_v50 = vpop.eup %5594 }
 0x94d   :  { %v5597_v37 = vpop.eup %5596  ;;  %v2387_v10 = vmul.f32 %v5595_v50, %v5593_v40 }
 0x94e   :  { %v2386_v17 = vmul.f32 0.0, %v5597_v37  ;;  %v5599_v19 = vpop.eup %5598 }
 0x950   :  { %v7017_v28 = vadd.f32 %v2387_v10, %v2386_v17 }
 0x952   :  { %5600 = vtanh.f32 %v7017_v28 }
 0x95f   :  { %v5601_v20 = vpop.eup %5600 }
 0x960   :  { %v7020_v12 = vmul.f32 %v5601_v20, %v5599_v19  ;;  %v2021_v20 = vadd.f32 %v6948_v8, %v7014_v16 }
 0x962   :  { %v2396_v29 = vpack.c.bf16 %v7020_v12, %v7020_v12 }
 0x964   :  { %2430 = vmatmul.mubr.bf16.vlgmr.msra.gmra.mxu0 %v2396_v29  ;;  %2471 = vmatmul.mubr.bf16.vlgmr.msra.gmra.mxu1 %v2396_v29 }
 0x965   :  { %2514 = vmatpush1.bf16.msra.mxu0 %v6802_v15  ;;  %2555 = vmatpush1.bf16.msra.mxu1 %v6804_v23 }
 0x966   :  { %2515 = vmatprep.subr.bf16.mxu0 %v6810_v47  ;;  %2556 = vmatprep.subr.bf16.mxu1 %v6812_v35 }
 0x967   :  { %2545 = vmatprep.mubr.bf16.mxu0 %v8036_v53  ;;  %2586 = vmatprep.mubr.bf16.mxu1 %v8036_v53 }
 0x969   :  { %2516 = vmatpush1.bf16.msra.mxu0 %v6814_v30  ;;  %2557 = vmatpush1.bf16.msra.mxu1 %v6816_v44 }
 0x96a   :  { %2517 = vmatprep.subr.bf16.mxu0 %v6822_v13  ;;  %2558 = vmatprep.subr.bf16.mxu1 %v6824_v18 }
 0x96d   :  { %2518 = vmatpush1.bf16.msra.mxu0 %v6826_v51  ;;  %2559 = vmatpush1.bf16.msra.mxu1 %v6828_v52 }
 0x96e   :  { %2519 = vmatprep.subr.bf16.mxu0 %v6834_v54  ;;  %2560 = vmatprep.subr.bf16.mxu1 %v6836_v55 }
 0x971   :  { %2520 = vmatpush1.bf16.msra.mxu0 %v6838_v56  ;;  %2561 = vmatpush1.bf16.msra.mxu1 %v6840_v57 }
 0x972   :  { %2521 = vmatprep.subr.bf16.mxu0 %v6846_v58  ;;  %2562 = vmatprep.subr.bf16.mxu1 %v6848_v59 }
 0x975   :  { %2522 = vmatpush1.bf16.msra.mxu0 %v6850_v60  ;;  %2563 = vmatpush1.bf16.msra.mxu1 %v6852_v61 }
 0x976   :  { %2523 = vmatprep.subr.bf16.mxu0 %v6858_v63  ;;  %2564 = vmatprep.subr.bf16.mxu1 %v6860_v2 }
 0x979   :  { %2524 = vmatpush1.bf16.msra.mxu0 %v6862_v62  ;;  %2565 = vmatpush1.bf16.msra.mxu1 %v6864_v1 }
 0x97a   :  { %2525 = vmatprep.subr.bf16.mxu0 %v6870_v36  ;;  %2566 = vmatprep.subr.bf16.mxu1 %v6872_v3 }
 0x97d   :  { %2526 = vmatpush1.bf16.msra.mxu0 %v6874_v4  ;;  %2567 = vmatpush1.bf16.msra.mxu1 %v6876_v5 }
 0x97e   :  { %2527 = vmatprep.subr.bf16.mxu0 %v6878_v43  ;;  %2568 = vmatprep.subr.bf16.mxu1 %v6880_v45 }
 0x981   :  { %2528 = vmatpush1.bf16.msra.mxu0 %v6886_v42  ;;  %2569 = vmatpush1.bf16.msra.mxu1 %v6888_v46 }
 0x982   :  { %2629 = vmatprep.subr.bf16.mxu0 %v6798_v0  ;;  %2670 = vmatprep.subr.bf16.mxu1 %v6800_v31 }
 0xa24   :  { %v2431_v39 = vpop.f32.mrf.mxu0  ;;  %v2472_v7 = vpop.f32.mrf.mxu1 }
 0xa25   :  { %v2479_v48 = vadd.f32 %v2431_v39, %v1946_v33  ;;  %v2481_v19 = vadd.f32 %v2472_v7, %v2019_v26 }
 0xa26   :  { %v2433_v32 = vpop.f32.mrf.mxu0  ;;  %v2474_v21 = vpop.f32.mrf.mxu1 }
 0xa27   :  { %v5000_v38 = vmul.f32 -1.442695, %v2479_v48  ;;  %v2480_v40 = vadd.f32 %v2433_v32, %v1948_v24  ;;  %v5002_v25 = vmul.f32 -1.442695, %v2481_v19  ;;  %v2482_v29 = vadd.f32 %v2474_v21, %v2021_v20 }
 0xa28   :  { %v2435_v50 = vpop.f32.mrf.mxu0  ;;  %v2476_v37 = vpop.f32.mrf.mxu1  ;;  %v1954_v20 = vadd.f32 %v6954_v14, %v7001_v41 }
 0xa29   :  { %5602 = vpow2.f32 %v5000_v38  ;;  %v5001_v6 = vmul.f32 -1.442695, %v2480_v40 }
 0xa2a   :  { %v2436_v17 = vpop.f32.mrf.mxu0  ;;  %v2477_v10 = vpop.f32.mrf.mxu1 }
 0xa2b   :  { %5604 = vpow2.f32 %v5001_v6 }
 0xa2c   :  { %5606 = vpow2.f32 %v5002_v25 }
 0xa2d   :  { %5608 = vtanh.f32 %v2482_v29 }
 0xa36   :  { %v5603_v33 = vpop.eup %5602 }
 0xa37   :  { %v2492_v39 = vadd.f32 1.0, %v5603_v33 }
 0xa38   :  { %v5605_v24 = vpop.eup %5604 }
 0xa39   :  { %5610 = vrcp.f32 %v2492_v39  ;;  %v2493_v48 = vadd.f32 1.0, %v5605_v24  ;;  %v5607_v32 = vpop.eup %5606 }
 0xa3a   :  { %v5609_v38 = vpop.eup %5608  ;;  %v2494_v34 = vadd.f32 1.0, %v5607_v32 }
 0xa3b   :  { %5612 = vrcp.f32 %v2493_v48 }
 0xa3c   :  { %5614 = vrcp.f32 %v2494_v34 }
 0xa46   :  { %v5611_v40 = vpop.eup %5610 }
 0xa47   :  { %v2503_v50 = vmul.f32 %v5611_v40, %v5609_v38 }
 0xa48   :  { %v5613_v37 = vpop.eup %5612 }
 0xa49   :  { %v2502_v7 = vmul.f32 %v5613_v37, %v7017_v28  ;;  %v5615_v8 = vpop.eup %5614  ;;  %v1952_v28 = vadd.f32 %v6950_v11, %v6994_v49  ;;  %v8083_v37 = vld [vmem:[#allocation24_spill] sm:$0xff] }
 0xa4a   :  { %v2025_v11 = vadd.f32 %v8083_v37, %v7010_v9 }
 0xa4b   :  { %v7067_v6 = vadd.f32 %v2503_v50, %v2502_v7  ;;  %v8084_v7 = vld [vmem:[#allocation22_spill] sm:$0xff] }
 0xa4d   :  { %5616 = vtanh.f32 %v7067_v6 }
 0xa5a   :  { %v5617_v21 = vpop.eup %5616 }
 0xa5b   :  { %v7070_v17 = vmul.f32 %v5617_v21, %v5615_v8  ;;  %v2027_v8 = vadd.f32 %v8084_v7, %v7014_v16 }
 0xa5d   :  { %v2512_v10 = vpack.c.bf16 %v7070_v17, %v7070_v17 }
 0xa5f   :  { %2546 = vmatmul.mubr.bf16.vlgmr.msra.gmra.mxu0 %v2512_v10  ;;  %2587 = vmatmul.mubr.bf16.vlgmr.msra.gmra.mxu1 %v2512_v10 }
 0xa60   :  { %2630 = vmatpush1.bf16.msra.mxu0 %v6802_v15  ;;  %2671 = vmatpush1.bf16.msra.mxu1 %v6804_v23 }
 0xa61   :  { %2631 = vmatprep.subr.bf16.mxu0 %v6810_v47  ;;  %2672 = vmatprep.subr.bf16.mxu1 %v6812_v35 }
 0xa62   :  { %2661 = vmatprep.mubr.bf16.mxu0 %v8036_v53  ;;  %2702 = vmatprep.mubr.bf16.mxu1 %v8036_v53 }
 0xa64   :  { %2632 = vmatpush1.bf16.msra.mxu0 %v6814_v30  ;;  %2673 = vmatpush1.bf16.msra.mxu1 %v6816_v44 }
 0xa65   :  { %2633 = vmatprep.subr.bf16.mxu0 %v6822_v13  ;;  %2674 = vmatprep.subr.bf16.mxu1 %v6824_v18 }
 0xa68   :  { %2634 = vmatpush1.bf16.msra.mxu0 %v6826_v51  ;;  %2675 = vmatpush1.bf16.msra.mxu1 %v6828_v52 }
 0xa69   :  { %2635 = vmatprep.subr.bf16.mxu0 %v6834_v54  ;;  %2676 = vmatprep.subr.bf16.mxu1 %v6836_v55 }
 0xa6c   :  { %2636 = vmatpush1.bf16.msra.mxu0 %v6838_v56  ;;  %2677 = vmatpush1.bf16.msra.mxu1 %v6840_v57 }
 0xa6d   :  { %2637 = vmatprep.subr.bf16.mxu0 %v6846_v58  ;;  %2678 = vmatprep.subr.bf16.mxu1 %v6848_v59 }
 0xa70   :  { %2638 = vmatpush1.bf16.msra.mxu0 %v6850_v60  ;;  %2679 = vmatpush1.bf16.msra.mxu1 %v6852_v61 }
 0xa71   :  { %2639 = vmatprep.subr.bf16.mxu0 %v6858_v63  ;;  %2680 = vmatprep.subr.bf16.mxu1 %v6860_v2 }
 0xa74   :  { %2640 = vmatpush1.bf16.msra.mxu0 %v6862_v62  ;;  %2681 = vmatpush1.bf16.msra.mxu1 %v6864_v1 }
 0xa75   :  { %2641 = vmatprep.subr.bf16.mxu0 %v6870_v36  ;;  %2682 = vmatprep.subr.bf16.mxu1 %v6872_v3 }
 0xa78   :  { %2642 = vmatpush1.bf16.msra.mxu0 %v6874_v4  ;;  %2683 = vmatpush1.bf16.msra.mxu1 %v6876_v5 }
 0xa79   :  { %2643 = vmatprep.subr.bf16.mxu0 %v6878_v43  ;;  %2684 = vmatprep.subr.bf16.mxu1 %v6880_v45 }
 0xa7c   :  { %2644 = vmatpush1.bf16.msra.mxu0 %v6886_v42  ;;  %2685 = vmatpush1.bf16.msra.mxu1 %v6888_v46 }
 0xa7d   :  { %2745 = vmatprep.subr.bf16.mxu0 %v6798_v0  ;;  %2786 = vmatprep.subr.bf16.mxu1 %v6800_v31 }
 0xb1f   :  { %v2547_v26 = vpop.f32.mrf.mxu0  ;;  %v2588_v19 = vpop.f32.mrf.mxu1 }
 0xb20   :  { %v2595_v25 = vadd.f32 %v2547_v26, %v1952_v28  ;;  %v2597_v34 = vadd.f32 %v2588_v19, %v2025_v11 }
 0xb21   :  { %v2549_v29 = vpop.f32.mrf.mxu0  ;;  %v2590_v33 = vpop.f32.mrf.mxu1 }
 0xb22   :  { %v5003_v39 = vmul.f32 -1.442695, %v2595_v25  ;;  %v2596_v24 = vadd.f32 %v2549_v29, %v1954_v20  ;;  %v5005_v14 = vmul.f32 -1.442695, %v2597_v34  ;;  %v2598_v21 = vadd.f32 %v2590_v33, %v2027_v8  ;;  %v8086_v8 = vld [vmem:[#allocation26_spill] sm:$0xff] }
 0xb23   :  { %v2551_v48 = vpop.f32.mrf.mxu0  ;;  %v2592_v32 = vpop.f32.mrf.mxu1 }
 0xb24   :  { %5618 = vpow2.f32 %v5003_v39  ;;  %v5004_v38 = vmul.f32 -1.442695, %v2596_v24 }
 0xb25   :  { %v2552_v40 = vpop.f32.mrf.mxu0  ;;  %v2593_v50 = vpop.f32.mrf.mxu1 }
 0xb26   :  { %5620 = vpow2.f32 %v5004_v38 }
 0xb27   :  { %5622 = vpow2.f32 %v5005_v14  ;;  %v1958_v14 = vadd.f32 %v8086_v8, %v7001_v41 }
 0xb28   :  { %5624 = vtanh.f32 %v2598_v21 }
 0xb31   :  { %v5619_v10 = vpop.eup %5618 }
 0xb32   :  { %v2608_v28 = vadd.f32 1.0, %v5619_v10 }
 0xb33   :  { %v5621_v26 = vpop.eup %5620 }
 0xb34   :  { %5626 = vrcp.f32 %v2608_v28  ;;  %v2609_v20 = vadd.f32 1.0, %v5621_v26  ;;  %v5623_v25 = vpop.eup %5622 }
 0xb35   :  { %v5625_v29 = vpop.eup %5624  ;;  %v2610_v32 = vadd.f32 1.0, %v5623_v25 }
 0xb36   :  { %5628 = vrcp.f32 %v2609_v20 }
 0xb37   :  { %5630 = vrcp.f32 %v2610_v32  ;;  %v8087_v32 = vld [vmem:[#allocation25_spill] sm:$0xff] }
 0xb41   :  { %v5627_v39 = vpop.eup %5626 }
 0xb42   :  { %v2619_v24 = vmul.f32 %v5627_v39, %v5625_v29 }
 0xb43   :  { %v5629_v48 = vpop.eup %5628 }
 0xb44   :  { %v2618_v19 = vmul.f32 %v5629_v48, %v7067_v6  ;;  %v5631_v33 = vpop.eup %5630  ;;  %v8085_v6 = vld [vmem:[#allocation23_spill] sm:$0xff] }
 0xb45   :  { %v1956_v11 = vadd.f32 %v8085_v6, %v6994_v49 }
 0xb46   :  { %v7117_v38 = vadd.f32 %v2619_v24, %v2618_v19  ;;  %v2029_v19 = vadd.f32 %v8087_v32, %v7010_v9 }
 0xb48   :  { %5632 = vtanh.f32 %v7117_v38 }
 0xb55   :  { %v5633_v40 = vpop.eup %5632 }
 0xb56   :  { %v7120_v50 = vmul.f32 %v5633_v40, %v5631_v33  ;;  %v8088_v40 = vld [vmem:[#allocation28_spill] sm:$0xff] }
 0xb58   :  { %v2628_v37 = vpack.c.bf16 %v7120_v50, %v7120_v50 }
 0xb5a   :  { %2662 = vmatmul.mubr.bf16.vlgmr.msra.gmra.mxu0 %v2628_v37  ;;  %2703 = vmatmul.mubr.bf16.vlgmr.msra.gmra.mxu1 %v2628_v37  ;;  %v2031_v37 = vadd.f32 %v8088_v40, %v7014_v16 }
 0xb5b   :  { %2746 = vmatpush1.bf16.msra.mxu0 %v6802_v15  ;;  %2787 = vmatpush1.bf16.msra.mxu1 %v6804_v23 }
 0xb5c   :  { %2747 = vmatprep.subr.bf16.mxu0 %v6810_v47  ;;  %2788 = vmatprep.subr.bf16.mxu1 %v6812_v35 }
 0xb5d   :  { %2777 = vmatprep.mubr.bf16.mxu0 %v8036_v53  ;;  %2818 = vmatprep.mubr.bf16.mxu1 %v8036_v53 }
 0xb5f   :  { %2748 = vmatpush1.bf16.msra.mxu0 %v6814_v30  ;;  %2789 = vmatpush1.bf16.msra.mxu1 %v6816_v44 }
 0xb60   :  { %2749 = vmatprep.subr.bf16.mxu0 %v6822_v13  ;;  %2790 = vmatprep.subr.bf16.mxu1 %v6824_v18 }
 0xb63   :  { %2750 = vmatpush1.bf16.msra.mxu0 %v6826_v51  ;;  %2791 = vmatpush1.bf16.msra.mxu1 %v6828_v52 }
 0xb64   :  { %2751 = vmatprep.subr.bf16.mxu0 %v6834_v54  ;;  %2792 = vmatprep.subr.bf16.mxu1 %v6836_v55 }
 0xb67   :  { %2752 = vmatpush1.bf16.msra.mxu0 %v6838_v56  ;;  %2793 = vmatpush1.bf16.msra.mxu1 %v6840_v57 }
 0xb68   :  { %2753 = vmatprep.subr.bf16.mxu0 %v6846_v58  ;;  %2794 = vmatprep.subr.bf16.mxu1 %v6848_v59 }
 0xb6b   :  { %2754 = vmatpush1.bf16.msra.mxu0 %v6850_v60  ;;  %2795 = vmatpush1.bf16.msra.mxu1 %v6852_v61 }
 0xb6c   :  { %2755 = vmatprep.subr.bf16.mxu0 %v6858_v63  ;;  %2796 = vmatprep.subr.bf16.mxu1 %v6860_v2 }
 0xb6f   :  { %2756 = vmatpush1.bf16.msra.mxu0 %v6862_v62  ;;  %2797 = vmatpush1.bf16.msra.mxu1 %v6864_v1 }
 0xb70   :  { %2757 = vmatprep.subr.bf16.mxu0 %v6870_v36  ;;  %2798 = vmatprep.subr.bf16.mxu1 %v6872_v3 }
 0xb73   :  { %2758 = vmatpush1.bf16.msra.mxu0 %v6874_v4  ;;  %2799 = vmatpush1.bf16.msra.mxu1 %v6876_v5 }
 0xb74   :  { %2759 = vmatprep.subr.bf16.mxu0 %v6878_v43  ;;  %2800 = vmatprep.subr.bf16.mxu1 %v6880_v45 }
 0xb77   :  { %2760 = vmatpush1.bf16.msra.mxu0 %v6886_v42  ;;  %2801 = vmatpush1.bf16.msra.mxu1 %v6888_v46 }
 0xb78   :  { %2861 = vmatprep.subr.bf16.mxu0 %v6798_v0  ;;  %2902 = vmatprep.subr.bf16.mxu1 %v6800_v31 }
 0xc1a   :  { %v2663_v34 = vpop.f32.mrf.mxu0  ;;  %v2704_v7 = vpop.f32.mrf.mxu1 }
 0xc1b   :  { %v2711_v21 = vadd.f32 %v2663_v34, %v1956_v11  ;;  %v2713_v33 = vadd.f32 %v2704_v7, %v2029_v19 }
 0xc1c   :  { %v2665_v10 = vpop.f32.mrf.mxu0  ;;  %v2706_v28 = vpop.f32.mrf.mxu1 }
 0xc1d   :  { %v5006_v26 = vmul.f32 -1.442695, %v2711_v21  ;;  %v2712_v20 = vadd.f32 %v2665_v10, %v1958_v14  ;;  %v5008_v6 = vmul.f32 -1.442695, %v2713_v33  ;;  %v2714_v11 = vadd.f32 %v2706_v28, %v2031_v37 }
 0xc1e   :  { %v2667_v25 = vpop.f32.mrf.mxu0  ;;  %v2708_v29 = vpop.f32.mrf.mxu1 }
 0xc1f   :  { %5634 = vpow2.f32 %v5006_v26  ;;  %v5007_v39 = vmul.f32 -1.442695, %v2712_v20 }
 0xc20   :  { %v2668_v24 = vpop.f32.mrf.mxu0  ;;  %v2709_v48 = vpop.f32.mrf.mxu1 }
 0xc21   :  { %5636 = vpow2.f32 %v5007_v39 }
 0xc22   :  { %5638 = vpow2.f32 %v5008_v6 }
 0xc23   :  { %5640 = vtanh.f32 %v2714_v11 }
 0xc2c   :  { %v5635_v34 = vpop.eup %5634 }
 0xc2d   :  { %v2724_v8 = vadd.f32 1.0, %v5635_v34 }
 0xc2e   :  { %v5637_v14 = vpop.eup %5636 }
 0xc2f   :  { %5642 = vrcp.f32 %v2724_v8  ;;  %v2725_v21 = vadd.f32 1.0, %v5637_v14  ;;  %v5639_v10 = vpop.eup %5638  ;;  %v7224_v8 = vld [vmem:[#allocation9 + $0xe0] ss:$16 sps:$4 sm:$0xff]   ;;  %v7227_v14 = vld [vmem:[#allocation9 + $0xe8] ss:$16 sps:$4 sm:$0xff]  }
 0xc30   :  { %v5641_v26 = vpop.eup %5640  ;;  %v2726_v39 = vadd.f32 1.0, %v5639_v10  ;;  %v7233_v10 = vld [vmem:[#allocation9 + $0xcc] ss:$16 sps:$4 sm:$0xff]  }
 0xc31   :  { %5644 = vrcp.f32 %v2725_v21  ;;  %v7230_v21 = vld [vmem:[#allocation9 + $0xc4] ss:$16 sps:$4 sm:$0xff]  }
 0xc32   :  { %5646 = vrcp.f32 %v2726_v39  ;;  %v7250_v39 = vld [vmem:[#allocation9 + $0xa0] ss:$16 sps:$4 sm:$0xff]  }
 0xc3c   :  { %v5643_v20 = vpop.eup %5642 }
 0xc3d   :  { %v2735_v25 = vmul.f32 %v5643_v20, %v5641_v26  ;;  %v7238_v26 = vld [vmem:[#allocation9 + $0xc0] ss:$16 sps:$4 sm:$0xff]   ;;  %v7241_v20 = vld [vmem:[#allocation9 + $0xc8] ss:$16 sps:$4 sm:$0xff]  }
 0xc3e   :  { %v5645_v29 = vpop.eup %5644 }
 0xc3f   :  { %v2734_v7 = vmul.f32 %v5645_v29, %v7117_v38  ;;  %v5647_v28 = vpop.eup %5646  ;;  %v7247_v29 = vld [vmem:[#allocation9 + $0xac] ss:$16 sps:$4 sm:$0xff]  }
 0xc41   :  { %v7167_v24 = vadd.f32 %v2735_v25, %v2734_v7  ;;  %v7244_v25 = vld [vmem:[#allocation9 + $0xa4] ss:$16 sps:$4 sm:$0xff]   ;;  %v7253_v7 = vld [vmem:[#allocation9 + $0xa8] ss:$16 sps:$4 sm:$0xff]  }
 0xc43   :  { %5648 = vtanh.f32 %v7167_v24 }
 0xc50   :  { %v5649_v48 = vpop.eup %5648 }
 0xc51   :  { %v7170_v32 = vmul.f32 %v5649_v48, %v5647_v28  ;;  %v7259_v28 = vld [vmem:[#allocation9 + $0x8c] ss:$16 sps:$4 sm:$0xff]   ;;  %v7262_v48 = vld [vmem:[#allocation9 + $0x80] ss:$16 sps:$4 sm:$0xff]  }
 0xc53   :  { %v2744_v19 = vpack.c.bf16 %v7170_v32, %v7170_v32 }
 0xc55   :  { %2778 = vmatmul.mubr.bf16.vlgmr.msra.gmra.mxu0 %v2744_v19  ;;  %2819 = vmatmul.mubr.bf16.vlgmr.msra.gmra.mxu1 %v2744_v19  ;;  %v7265_v19 = vld [vmem:[#allocation9 + $0x88] ss:$16 sps:$4 sm:$0xff]  }
 0xc56   :  { %2862 = vmatpush1.bf16.msra.mxu0 %v6802_v15  ;;  %2903 = vmatpush1.bf16.msra.mxu1 %v6804_v23  ;;  %v8089_v15 = vld [vmem:[#allocation27_spill] sm:$0xff] }
 0xc57   :  { %2863 = vmatprep.subr.bf16.mxu0 %v6810_v47  ;;  %2904 = vmatprep.subr.bf16.mxu1 %v6812_v35  ;;  %v1962_v23 = vadd.f32 %v8089_v15, %v6994_v49  ;;  %v7268_v15 = vld [vmem:[#allocation9 + $0x64] ss:$16 sps:$4 sm:$0xff]  }
 0xc58   :  { %2893 = vmatprep.mubr.bf16.mxu0 %v8036_v53  ;;  %2934 = vmatprep.mubr.bf16.mxu1 %v8036_v53 }
 0xc5a   :  { %2864 = vmatpush1.bf16.msra.mxu0 %v6814_v30  ;;  %2905 = vmatpush1.bf16.msra.mxu1 %v6816_v44  ;;  %v8090_v30 = vld [vmem:[#allocation32_spill] sm:$0xff] }
 0xc5b   :  { %2865 = vmatprep.subr.bf16.mxu0 %v6822_v13  ;;  %2906 = vmatprep.subr.bf16.mxu1 %v6824_v18  ;;  %v1964_v44 = vadd.f32 %v8090_v30, %v7001_v41  ;;  %v7280_v30 = vld [vmem:[#allocation9 + $0x44] ss:$16 sps:$4 sm:$0xff]  }
 0xc5e   :  { %2866 = vmatpush1.bf16.msra.mxu0 %v6826_v51  ;;  %2907 = vmatpush1.bf16.msra.mxu1 %v6828_v52 }
 0xc5f   :  { %2867 = vmatprep.subr.bf16.mxu0 %v6834_v54  ;;  %2908 = vmatprep.subr.bf16.mxu1 %v6836_v55 }
 0xc62   :  { %2868 = vmatpush1.bf16.msra.mxu0 %v6838_v56  ;;  %2909 = vmatpush1.bf16.msra.mxu1 %v6840_v57 }
 0xc63   :  { %2869 = vmatprep.subr.bf16.mxu0 %v6846_v58  ;;  %2910 = vmatprep.subr.bf16.mxu1 %v6848_v59 }
 0xc66   :  { %2870 = vmatpush1.bf16.msra.mxu0 %v6850_v60  ;;  %2911 = vmatpush1.bf16.msra.mxu1 %v6852_v61  ;;  %v8092_v61 = vld [vmem:[#allocation30_spill] sm:$0xff] }
 0xc67   :  { %2871 = vmatprep.subr.bf16.mxu0 %v6858_v63  ;;  %2912 = vmatprep.subr.bf16.mxu1 %v6860_v2  ;;  %v2037_v63 = vadd.f32 %v8092_v61, %v7014_v16 }
 0xc6a   :  { %2872 = vmatpush1.bf16.msra.mxu0 %v6862_v62  ;;  %2913 = vmatpush1.bf16.msra.mxu1 %v6864_v1 }
 0xc6b   :  { %2873 = vmatprep.subr.bf16.mxu0 %v6870_v36  ;;  %2914 = vmatprep.subr.bf16.mxu1 %v6872_v3 }
 0xc6e   :  { %2874 = vmatpush1.bf16.msra.mxu0 %v6874_v4  ;;  %2915 = vmatpush1.bf16.msra.mxu1 %v6876_v5 }
 0xc6f   :  { %2875 = vmatprep.subr.bf16.mxu0 %v6878_v43  ;;  %2916 = vmatprep.subr.bf16.mxu1 %v6880_v45 }
 0xc72   :  { %2876 = vmatpush1.bf16.msra.mxu0 %v6886_v42  ;;  %2917 = vmatpush1.bf16.msra.mxu1 %v6888_v46 }
 0xc73   :  { %2977 = vmatprep.subr.bf16.mxu0 %v6798_v0  ;;  %3018 = vmatprep.subr.bf16.mxu1 %v6800_v31  ;;  %v8091_v31 = vld [vmem:[#allocation29_spill] sm:$0xff] }
 0xc74   :  { %v2035_v59 = vadd.f32 %v8091_v31, %v7010_v9  ;;  %v5904_v31 = vld [vmem:[#allocation9 + $0xe4] ss:$16 sps:$4 sm:$0xff]  }
 0xd15   :  { %v2779_v47 = vpop.f32.mrf.mxu0  ;;  %v2820_v35 = vpop.f32.mrf.mxu1 }
 0xd16   :  { %v2827_v13 = vadd.f32 %v2779_v47, %v1962_v23  ;;  %v2829_v60 = vadd.f32 %v2820_v35, %v2035_v59  ;;  %v7271_v23 = vld [vmem:[#allocation9 + $0x6c] ss:$16 sps:$4 sm:$0xff]   ;;  %v7274_v47 = vld [vmem:[#allocation9 + $0x60] ss:$16 sps:$4 sm:$0xff]   ;;  %v7277_v35 = vld [vmem:[#allocation9 + $0x68] ss:$16 sps:$4 sm:$0xff]  }
 0xd17   :  { %v2781_v18 = vpop.f32.mrf.mxu0  ;;  %v2822_v51 = vpop.f32.mrf.mxu1  ;;  %v5905_v59 = vld [vmem:[#allocation9 + $0xec] ss:$16 sps:$4 sm:$0xff]  }
 0xd18   :  { %v5009_v52 = vmul.f32 -1.442695, %v2827_v13  ;;  %v2828_v54 = vadd.f32 %v2781_v18, %v1964_v44  ;;  %v5011_v2 = vmul.f32 -1.442695, %v2829_v60  ;;  %v2830_v62 = vadd.f32 %v2822_v51, %v2037_v63  ;;  %v7283_v44 = vld [vmem:[#allocation9 + $0x4c] ss:$16 sps:$4 sm:$0xff]  }
 0xd19   :  { %v2783_v55 = vpop.f32.mrf.mxu0  ;;  %v2824_v56 = vpop.f32.mrf.mxu1  ;;  %v7286_v13 = vld [vmem:[#allocation9 + $0x40] ss:$16 sps:$4 sm:$0xff]   ;;  %v7289_v18 = vld [vmem:[#allocation9 + $0x48] ss:$16 sps:$4 sm:$0xff]   ;;  %v7292_v51 = vld [vmem:[#allocation9 + $0x24] ss:$16 sps:$4 sm:$0xff]  }
 0xd1a   :  { %5650 = vpow2.f32 %v5009_v52  ;;  %v5010_v57 = vmul.f32 -1.442695, %v2828_v54  ;;  %v7295_v52 = vld [vmem:[#allocation9 + $0x2c] ss:$16 sps:$4 sm:$0xff]   ;;  %v7298_v54 = vld [vmem:[#allocation9 + $0x20] ss:$16 sps:$4 sm:$0xff]  }
 0xd1b   :  { %v2784_v0 = vpop.f32.mrf.mxu0  ;;  %v2825_v58 = vpop.f32.mrf.mxu1  ;;  %v7301_v55 = vld [vmem:[#allocation9 + $0x28] ss:$16 sps:$4 sm:$0xff]   ;;  %v7304_v56 = vld [vmem:[#allocation9 + $0x4] ss:$16 sps:$4 sm:$0xff]  }
 0xd1c   :  { %5652 = vpow2.f32 %v5010_v57  ;;  %v7307_v57 = vld [vmem:[#allocation9 + $0xc] ss:$16 sps:$4 sm:$0xff]   ;;  %v7310_v0 = vld [vmem:[#allocation9] ss:$16 sps:$4 sm:$0xff]   ;;  %v7313_v58 = vld [vmem:[#allocation9 + $0x8] ss:$16 sps:$4 sm:$0xff]  }
 0xd1d   :  { %5654 = vpow2.f32 %v5011_v2  ;;  %v8093_v60 = vld [vmem:[#allocation31_spill] sm:$0xff] }
 0xd1e   :  { %5656 = vtanh.f32 %v2830_v62  ;;  %v1966_v61 = vadd.f32 %v8093_v60, %v6994_v49  ;;  %v8094_v62 = vld [vmem:[#allocation34_spill] sm:$0xff] }
 0xd27   :  { %v5651_v1 = vpop.eup %5650 }
 0xd28   :  { %v2840_v36 = vadd.f32 1.0, %v5651_v1  ;;  %v1968_v1 = vadd.f32 %v8094_v62, %v7001_v41 }
 0xd29   :  { %v5653_v3 = vpop.eup %5652 }
 0xd2a   :  { %5658 = vrcp.f32 %v2840_v36  ;;  %v2841_v4 = vadd.f32 1.0, %v5653_v3  ;;  %v5655_v5 = vpop.eup %5654 }
 0xd2b   :  { %v5657_v43 = vpop.eup %5656  ;;  %v2842_v38 = vadd.f32 1.0, %v5655_v5 }
 0xd2c   :  { %5660 = vrcp.f32 %v2841_v4 }
 0xd2d   :  { %5662 = vrcp.f32 %v2842_v38 }
 0xd37   :  { %v5659_v45 = vpop.eup %5658 }
 0xd38   :  { %v2851_v42 = vmul.f32 %v5659_v45, %v5657_v43 }
 0xd39   :  { %v5661_v46 = vpop.eup %5660 }
 0xd3a   :  { %v2850_v33 = vmul.f32 %v5661_v46, %v7167_v24  ;;  %v5663_v37 = vpop.eup %5662  ;;  %v7256_v24 = vld [vmem:[#allocation9 + $0x84] ss:$16 sps:$4 sm:$0xff]  }
 0xd3c   :  { %v7217_v40 = vadd.f32 %v2851_v42, %v2850_v33 }
 0xd3e   :  { %5664 = vtanh.f32 %v7217_v40 }
 0xd4b   :  { %v5665_v6 = vpop.eup %5664 }
 0xd4c   :  { %v7220_v11 = vmul.f32 %v5665_v6, %v5663_v37  ;;  %v8095_v37 = vld [vmem:[#allocation33_spill] sm:$0xff] }
 0xd4d   :  { %v2039_v6 = vadd.f32 %v8095_v37, %v7010_v9 }
 0xd4e   :  { %v2860_v34 = vpack.c.bf16 %v7220_v11, %v7220_v11 }
 0xd50   :  { %2894 = vmatmul.mubr.bf16.vlgmr.msra.gmra.mxu0 %v2860_v34  ;;  %2935 = vmatmul.mubr.bf16.vlgmr.msra.gmra.mxu1 %v2860_v34 }
 0xd51   :  { %2978 = vmatpush1.bf16.msra.mxu0 %v7224_v8  ;;  %3019 = vmatpush1.bf16.msra.mxu1 %v7227_v14 }
 0xd52   :  { %2979 = vmatprep.subr.bf16.mxu0 %v7230_v21  ;;  %3020 = vmatprep.subr.bf16.mxu1 %v7233_v10 }
 0xd53   :  { %3009 = vmatprep.mubr.bf16.mxu0 %v8036_v53  ;;  %3050 = vmatprep.mubr.bf16.mxu1 %v8036_v53 }
 0xd55   :  { %2980 = vmatpush1.bf16.msra.mxu0 %v7238_v26  ;;  %3021 = vmatpush1.bf16.msra.mxu1 %v7241_v20 }
 0xd56   :  { %2981 = vmatprep.subr.bf16.mxu0 %v7244_v25  ;;  %3022 = vmatprep.subr.bf16.mxu1 %v7247_v29 }
 0xd59   :  { %2982 = vmatpush1.bf16.msra.mxu0 %v7250_v39  ;;  %3023 = vmatpush1.bf16.msra.mxu1 %v7253_v7 }
 0xd5a   :  { %2983 = vmatprep.subr.bf16.mxu0 %v7256_v24  ;;  %3024 = vmatprep.subr.bf16.mxu1 %v7259_v28 }
 0xd5d   :  { %2984 = vmatpush1.bf16.msra.mxu0 %v7262_v48  ;;  %3025 = vmatpush1.bf16.msra.mxu1 %v7265_v19 }
 0xd5e   :  { %2985 = vmatprep.subr.bf16.mxu0 %v7268_v15  ;;  %3026 = vmatprep.subr.bf16.mxu1 %v7271_v23 }
 0xd61   :  { %2986 = vmatpush1.bf16.msra.mxu0 %v7274_v47  ;;  %3027 = vmatpush1.bf16.msra.mxu1 %v7277_v35 }
 0xd62   :  { %2987 = vmatprep.subr.bf16.mxu0 %v7280_v30  ;;  %3028 = vmatprep.subr.bf16.mxu1 %v7283_v44 }
 0xd65   :  { %2988 = vmatpush1.bf16.msra.mxu0 %v7286_v13  ;;  %3029 = vmatpush1.bf16.msra.mxu1 %v7289_v18 }
 0xd66   :  { %2989 = vmatprep.subr.bf16.mxu0 %v7292_v51  ;;  %3030 = vmatprep.subr.bf16.mxu1 %v7295_v52 }
 0xd69   :  { %2990 = vmatpush1.bf16.msra.mxu0 %v7298_v54  ;;  %3031 = vmatpush1.bf16.msra.mxu1 %v7301_v55 }
 0xd6a   :  { %2991 = vmatprep.subr.bf16.mxu0 %v7304_v56  ;;  %3032 = vmatprep.subr.bf16.mxu1 %v7307_v57 }
 0xd6d   :  { %2992 = vmatpush1.bf16.msra.mxu0 %v7310_v0  ;;  %3033 = vmatpush1.bf16.msra.mxu1 %v7313_v58 }
 0xd6e   :  { %3093 = vmatprep.subr.bf16.mxu0 %v5904_v31  ;;  %3134 = vmatprep.subr.bf16.mxu1 %v5905_v59  ;;  %v8096_v31 = vld [vmem:[#allocation36_spill] sm:$0xff] }
 0xd6f   :  { %v2041_v59 = vadd.f32 %v8096_v31, %v7014_v16 }
 0xe10   :  { %v2895_v63 = vpop.f32.mrf.mxu0  ;;  %v2936_v2 = vpop.f32.mrf.mxu1 }
 0xe11   :  { %v2943_v36 = vadd.f32 %v2895_v63, %v1966_v61  ;;  %v2945_v34 = vadd.f32 %v2936_v2, %v2039_v6 }
 0xe12   :  { %v2897_v3 = vpop.f32.mrf.mxu0  ;;  %v2938_v4 = vpop.f32.mrf.mxu1 }
 0xe13   :  { %v5012_v5 = vmul.f32 -1.442695, %v2943_v36  ;;  %v2944_v43 = vadd.f32 %v2897_v3, %v1968_v1  ;;  %v5014_v60 = vmul.f32 -1.442695, %v2945_v34  ;;  %v2946_v63 = vadd.f32 %v2938_v4, %v2041_v59 }
 0xe14   :  { %v2899_v45 = vpop.f32.mrf.mxu0  ;;  %v2940_v42 = vpop.f32.mrf.mxu1 }
 0xe15   :  { %5666 = vpow2.f32 %v5012_v5  ;;  %v5013_v46 = vmul.f32 -1.442695, %v2944_v43 }
 0xe16   :  { %v2900_v38 = vpop.f32.mrf.mxu0  ;;  %v2941_v33 = vpop.f32.mrf.mxu1 }
 0xe17   :  { %5668 = vpow2.f32 %v5013_v46 }
 0xe18   :  { %5670 = vpow2.f32 %v5014_v60 }
 0xe22   :  { %v5667_v61 = vpop.eup %5666 }
 0xe23   :  { %v2956_v62 = vadd.f32 1.0, %v5667_v61 }
 0xe24   :  { %v5669_v36 = vpop.eup %5668 }
 0xe25   :  { %5672 = vrcp.f32 %v2956_v62  ;;  %v2957_v1 = vadd.f32 1.0, %v5669_v36  ;;  %v5671_v3 = vpop.eup %5670 }
 0xe26   :  { %5674 = vtanh.f32 %v2946_v63  ;;  %v2958_v42 = vadd.f32 1.0, %v5671_v3  ;;  %v5354_v3 = vld [vmem:[#allocation11 + $0xe0] ss:$16 sps:$4 sm:$0xff]  }
 0xe27   :  { %5676 = vrcp.f32 %v2957_v1 }
 0xe28   :  { %5678 = vrcp.f32 %v2958_v42  ;;  %v5365_v42 = vld [vmem:[#allocation11 + $0xcc] ss:$16 sps:$4 sm:$0xff]  }
 0xe32   :  { %v5673_v5 = vpop.eup %5672 }
 0xe33   :  { %v5675_v43 = vpop.eup %5674 }
 0xe34   :  { %v5677_v45 = vpop.eup %5676  ;;  %v2967_v46 = vmul.f32 %v5675_v43, %v5673_v5  ;;  %v5357_v5 = vld [vmem:[#allocation11 + $0xe8] ss:$16 sps:$4 sm:$0xff]  }
 0xe35   :  { %v2966_v2 = vmul.f32 %v5677_v45, %v7217_v40  ;;  %v5679_v4 = vpop.eup %5678  ;;  %v5356_v40 = vld [vmem:[#allocation11 + $0xe4] ss:$16 sps:$4 sm:$0xff]  }
 0xe36   :  { %v5362_v45 = vld [vmem:[#allocation11 + $0xc4] ss:$16 sps:$4 sm:$0xff]  }
 0xe37   :  { %v7325_v38 = vadd.f32 %v2967_v46, %v2966_v2  ;;  %v5360_v2 = vld [vmem:[#allocation11 + $0xc0] ss:$16 sps:$4 sm:$0xff]   ;;  %v5363_v46 = vld [vmem:[#allocation11 + $0xc8] ss:$16 sps:$4 sm:$0xff]  }
 0xe39   :  { %5680 = vtanh.f32 %v7325_v38 }
 0xe46   :  { %v5681_v33 = vpop.eup %5680 }
 0xe47   :  { %v7328_v37 = vmul.f32 %v5681_v33, %v5679_v4  ;;  %v5371_v4 = vld [vmem:[#allocation11 + $0xac] ss:$16 sps:$4 sm:$0xff]   ;;  %v5366_v33 = vld [vmem:[#allocation11 + $0xa0] ss:$16 sps:$4 sm:$0xff]  }
 0xe49   :  { %v2976_v6 = vpack.c.bf16 %v7328_v37, %v7328_v37 }
 0xe4b   :  { %3010 = vmatmul.mubr.bf16.vlgmr.msra.gmra.mxu0 %v2976_v6  ;;  %3051 = vmatmul.mubr.bf16.vlgmr.msra.gmra.mxu1 %v2976_v6  ;;  %v5369_v6 = vld [vmem:[#allocation11 + $0xa8] ss:$16 sps:$4 sm:$0xff]  }
 0xe4c   :  { %3094 = vmatpush1.bf16.msra.mxu0 %v7224_v8  ;;  %3135 = vmatpush1.bf16.msra.mxu1 %v7227_v14  ;;  %v5359_v8 = vld [vmem:[#allocation11 + $0xec] ss:$16 sps:$4 sm:$0xff]  }
 0xe4d   :  { %3095 = vmatprep.subr.bf16.mxu0 %v7230_v21  ;;  %3136 = vmatprep.subr.bf16.mxu1 %v7233_v10  ;;  %v8097_v14 = vld [vmem:[#allocation35_spill] sm:$0xff] }
 0xe4e   :  { %3125 = vmatprep.mubr.bf16.mxu0 %v8036_v53  ;;  %3166 = vmatprep.mubr.bf16.mxu1 %v8036_v53  ;;  %v1972_v21 = vadd.f32 %v8097_v14, %v6994_v49  ;;  %v5372_v14 = vld [vmem:[#allocation11 + $0x80] ss:$16 sps:$4 sm:$0xff]  }
 0xe50   :  { %3096 = vmatpush1.bf16.msra.mxu0 %v7238_v26  ;;  %3137 = vmatpush1.bf16.msra.mxu1 %v7241_v20  ;;  %v8098_v20 = vld [vmem:[#allocation40_spill] sm:$0xff] }
 0xe51   :  { %3097 = vmatprep.subr.bf16.mxu0 %v7244_v25  ;;  %3138 = vmatprep.subr.bf16.mxu1 %v7247_v29  ;;  %v1974_v25 = vadd.f32 %v8098_v20, %v7001_v41  ;;  %v5378_v20 = vld [vmem:[#allocation11 + $0x60] ss:$16 sps:$4 sm:$0xff]  }
 0xe54   :  { %3098 = vmatpush1.bf16.msra.mxu0 %v7250_v39  ;;  %3139 = vmatpush1.bf16.msra.mxu1 %v7253_v7 }
 0xe55   :  { %3099 = vmatprep.subr.bf16.mxu0 %v7256_v24  ;;  %3140 = vmatprep.subr.bf16.mxu1 %v7259_v28 }
 0xe58   :  { %3100 = vmatpush1.bf16.msra.mxu0 %v7262_v48  ;;  %3141 = vmatpush1.bf16.msra.mxu1 %v7265_v19 }
 0xe59   :  { %3101 = vmatprep.subr.bf16.mxu0 %v7268_v15  ;;  %3142 = vmatprep.subr.bf16.mxu1 %v7271_v23 }
 0xe5c   :  { %3102 = vmatpush1.bf16.msra.mxu0 %v7274_v47  ;;  %3143 = vmatpush1.bf16.msra.mxu1 %v7277_v35  ;;  %v8099_v35 = vld [vmem:[#allocation37_spill] sm:$0xff] }
 0xe5d   :  { %3103 = vmatprep.subr.bf16.mxu0 %v7280_v30  ;;  %3144 = vmatprep.subr.bf16.mxu1 %v7283_v44  ;;  %v2045_v30 = vadd.f32 %v8099_v35, %v7010_v9  ;;  %v5396_v35 = vld [vmem:[#allocation11] ss:$16 sps:$4 sm:$0xff]  }
 0xe60   :  { %3104 = vmatpush1.bf16.msra.mxu0 %v7286_v13  ;;  %3145 = vmatpush1.bf16.msra.mxu1 %v7289_v18  ;;  %v8100_v13 = vld [vmem:[#allocation38_spill] sm:$0xff] }
 0xe61   :  { %3105 = vmatprep.subr.bf16.mxu0 %v7292_v51  ;;  %3146 = vmatprep.subr.bf16.mxu1 %v7295_v52  ;;  %v2047_v18 = vadd.f32 %v8100_v13, %v7014_v16  ;;  %v3213_v13 = vpack.c.bf16 %v7170_v32, %v7120_v50  ;;  %v7398_v50 = vld [vmem:[#allocation12 + $0xe0] ss:$16 sps:$4 sm:$0xff]   ;;  %v7400_v32 = vld [vmem:[#allocation12 + $0xe8] ss:$16 sps:$4 sm:$0xff]  }
 0xe64   :  { %3106 = vmatpush1.bf16.msra.mxu0 %v7298_v54  ;;  %3147 = vmatpush1.bf16.msra.mxu1 %v7301_v55 }
 0xe65   :  { %3107 = vmatprep.subr.bf16.mxu0 %v7304_v56  ;;  %3148 = vmatprep.subr.bf16.mxu1 %v7307_v57 }
 0xe68   :  { %3108 = vmatpush1.bf16.msra.mxu0 %v7310_v0  ;;  %3149 = vmatpush1.bf16.msra.mxu1 %v7313_v58 }
 0xe69   :  { %3430 = vmatprep.subr.bf16.mxu0 %v5356_v40  ;;  %3503 = vmatprep.subr.bf16.mxu1 %v5359_v8  ;;  %v5374_v40 = vld [vmem:[#allocation11 + $0x84] ss:$16 sps:$4 sm:$0xff]   ;;  %v5377_v8 = vld [vmem:[#allocation11 + $0x8c] ss:$16 sps:$4 sm:$0xff]  }
 0xf0b   :  { %v3011_v10 = vpop.f32.mrf.mxu0  ;;  %v3052_v26 = vpop.f32.mrf.mxu1 }
 0xf0c   :  { %v3059_v29 = vadd.f32 %v3011_v10, %v1972_v21  ;;  %v3061_v44 = vadd.f32 %v3052_v26, %v2045_v30  ;;  %v5375_v21 = vld [vmem:[#allocation11 + $0x88] ss:$16 sps:$4 sm:$0xff]   ;;  %v5380_v10 = vld [vmem:[#allocation11 + $0x64] ss:$16 sps:$4 sm:$0xff]   ;;  %v5383_v26 = vld [vmem:[#allocation11 + $0x6c] ss:$16 sps:$4 sm:$0xff]  }
 0xf0d   :  { %v3013_v39 = vpop.f32.mrf.mxu0  ;;  %v3054_v7 = vpop.f32.mrf.mxu1  ;;  %v5399_v30 = vld [vmem:[#allocation11 + $0x8] ss:$16 sps:$4 sm:$0xff]  }
 0xf0e   :  { %v5015_v24 = vmul.f32 -1.442695, %v3059_v29  ;;  %v3060_v28 = vadd.f32 %v3013_v39, %v1974_v25  ;;  %v5017_v51 = vmul.f32 -1.442695, %v3061_v44  ;;  %v3062_v52 = vadd.f32 %v3054_v7, %v2047_v18  ;;  %v5381_v25 = vld [vmem:[#allocation11 + $0x68] ss:$16 sps:$4 sm:$0xff]  }
 0xf0f   :  { %v3015_v48 = vpop.f32.mrf.mxu0  ;;  %v3056_v19 = vpop.f32.mrf.mxu1  ;;  %v5386_v29 = vld [vmem:[#allocation11 + $0x44] ss:$16 sps:$4 sm:$0xff]   ;;  %v5389_v39 = vld [vmem:[#allocation11 + $0x4c] ss:$16 sps:$4 sm:$0xff]   ;;  %v5384_v7 = vld [vmem:[#allocation11 + $0x40] ss:$16 sps:$4 sm:$0xff]   ;;  %v3212_v44 = vpack.c.bf16 %v7070_v17, %v7020_v12  ;;  %v3214_v18 = vpack.c.bf16 %v7328_v37, %v7220_v11 }
 0xf10   :  { %5682 = vpow2.f32 %v5015_v24  ;;  %v5016_v15 = vmul.f32 -1.442695, %v3060_v28  ;;  %v5387_v24 = vld [vmem:[#allocation11 + $0x48] ss:$16 sps:$4 sm:$0xff]   ;;  %v5392_v28 = vld [vmem:[#allocation11 + $0x24] ss:$16 sps:$4 sm:$0xff]  }
 0xf11   :  { %v3016_v23 = vpop.f32.mrf.mxu0  ;;  %v3057_v47 = vpop.f32.mrf.mxu1  ;;  %v5395_v48 = vld [vmem:[#allocation11 + $0x2c] ss:$16 sps:$4 sm:$0xff]   ;;  %v5390_v19 = vld [vmem:[#allocation11 + $0x20] ss:$16 sps:$4 sm:$0xff]   ;;  %v7394_v12 = vld [vmem:[#allocation12 + $0xe4] ss:$16 sps:$4 sm:$0xff]  }
 0xf12   :  { %5684 = vpow2.f32 %v5016_v15  ;;  %v5393_v15 = vld [vmem:[#allocation11 + $0x28] ss:$16 sps:$4 sm:$0xff]   ;;  %v5398_v23 = vld [vmem:[#allocation11 + $0x4] ss:$16 sps:$4 sm:$0xff]   ;;  %v5401_v47 = vld [vmem:[#allocation11 + $0xc] ss:$16 sps:$4 sm:$0xff]  }
 0xf13   :  { %5686 = vpow2.f32 %v5017_v51  ;;  %v7396_v17 = vld [vmem:[#allocation12 + $0xec] ss:$16 sps:$4 sm:$0xff]   ;;  %v7406_v11 = vld [vmem:[#allocation12 + $0xc4] ss:$16 sps:$4 sm:$0xff]   ;;  %v7410_v51 = vld [vmem:[#allocation12 + $0xc0] ss:$16 sps:$4 sm:$0xff]  }
 0xf14   :  { %5688 = vtanh.f32 %v3062_v52  ;;  %v7408_v37 = vld [vmem:[#allocation12 + $0xcc] ss:$16 sps:$4 sm:$0xff]   ;;  %v7412_v52 = vld [vmem:[#allocation12 + $0xc8] ss:$16 sps:$4 sm:$0xff]  }
 0xf1d   :  { %v5683_v54 = vpop.eup %5682 }
 0xf1e   :  { %v3072_v55 = vadd.f32 1.0, %v5683_v54  ;;  %v7418_v54 = vld [vmem:[#allocation12 + $0xa4] ss:$16 sps:$4 sm:$0xff]  }
 0xf1f   :  { %v5685_v56 = vpop.eup %5684 }
 0xf20   :  { %5690 = vrcp.f32 %v3072_v55  ;;  %v3073_v57 = vadd.f32 1.0, %v5685_v56  ;;  %v5687_v0 = vpop.eup %5686  ;;  %v7420_v55 = vld [vmem:[#allocation12 + $0xac] ss:$16 sps:$4 sm:$0xff]   ;;  %v7422_v56 = vld [vmem:[#allocation12 + $0xa0] ss:$16 sps:$4 sm:$0xff]  }
 0xf21   :  { %v5689_v58 = vpop.eup %5688  ;;  %v3074_v60 = vadd.f32 1.0, %v5687_v0  ;;  %v7430_v0 = vld [vmem:[#allocation12 + $0x84] ss:$16 sps:$4 sm:$0xff]  }
 0xf22   :  { %5692 = vrcp.f32 %v3073_v57  ;;  %v7424_v57 = vld [vmem:[#allocation12 + $0xa8] ss:$16 sps:$4 sm:$0xff]  }
 0xf23   :  { %5694 = vrcp.f32 %v3074_v60  ;;  %v7444_v60 = vld [vmem:[#allocation12 + $0x6c] ss:$16 sps:$4 sm:$0xff]  }
 0xf2d   :  { %v5691_v34 = vpop.eup %5690 }
 0xf2e   :  { %v3083_v31 = vmul.f32 %v5691_v34, %v5689_v58  ;;  %v7432_v58 = vld [vmem:[#allocation12 + $0x8c] ss:$16 sps:$4 sm:$0xff]   ;;  %v7434_v34 = vld [vmem:[#allocation12 + $0x80] ss:$16 sps:$4 sm:$0xff]  }
 0xf2f   :  { %v5693_v59 = vpop.eup %5692 }
 0xf30   :  { %v3082_v61 = vmul.f32 %v5693_v59, %v7325_v38  ;;  %v5695_v62 = vpop.eup %5694  ;;  %v5368_v38 = vld [vmem:[#allocation11 + $0xa4] ss:$16 sps:$4 sm:$0xff]  }
 0xf31   :  { %v7442_v59 = vld [vmem:[#allocation12 + $0x64] ss:$16 sps:$4 sm:$0xff]  }
 0xf32   :  { %v7373_v63 = vadd.f32 %v3083_v31, %v3082_v61  ;;  %v7436_v31 = vld [vmem:[#allocation12 + $0x88] ss:$16 sps:$4 sm:$0xff]   ;;  %v7446_v61 = vld [vmem:[#allocation12 + $0x60] ss:$16 sps:$4 sm:$0xff]  }
 0xf34   :  { %5696 = vtanh.f32 %v7373_v63 }
 0xf41   :  { %v5697_v36 = vpop.eup %5696 }
 0xf42   :  { %v7376_v1 = vmul.f32 %v5697_v36, %v5695_v62  ;;  %v7448_v62 = vld [vmem:[#allocation12 + $0x68] ss:$16 sps:$4 sm:$0xff]   ;;  %v7454_v36 = vld [vmem:[#allocation12 + $0x44] ss:$16 sps:$4 sm:$0xff]  }
 0xf44   :  { %v3092_v43 = vpack.c.bf16 %v7376_v1, %v7376_v1 }
 0xf46   :  { %3126 = vmatmul.mubr.bf16.vlgmr.msra.gmra.mxu0 %v3092_v43  ;;  %3167 = vmatmul.mubr.bf16.vlgmr.msra.gmra.mxu1 %v3092_v43  ;;  %v7460_v43 = vld [vmem:[#allocation12 + $0x48] ss:$16 sps:$4 sm:$0xff]  }
 0xf47   :  { %3431 = vmatpush1.bf16.msra.mxu0 %v5354_v3  ;;  %3504 = vmatpush1.bf16.msra.mxu1 %v5357_v5  ;;  %v7456_v3 = vld [vmem:[#allocation12 + $0x4c] ss:$16 sps:$4 sm:$0xff]   ;;  %v7458_v5 = vld [vmem:[#allocation12 + $0x40] ss:$16 sps:$4 sm:$0xff]  }
 0xf48   :  { %3432 = vmatprep.subr.bf16.mxu0 %v5362_v45  ;;  %3505 = vmatprep.subr.bf16.mxu1 %v5365_v42  ;;  %v7466_v45 = vld [vmem:[#allocation12 + $0x24] ss:$16 sps:$4 sm:$0xff]   ;;  %v7468_v42 = vld [vmem:[#allocation12 + $0x2c] ss:$16 sps:$4 sm:$0xff]  }
 0xf49   :  { %3462 = vmatprep.mubr.bf16.mxu0 %v8036_v53  ;;  %3535 = vmatprep.mubr.bf16.mxu1 %v8036_v53 }
 0xf4b   :  { %3433 = vmatpush1.bf16.msra.mxu0 %v5360_v2  ;;  %3506 = vmatpush1.bf16.msra.mxu1 %v5363_v46  ;;  %v7470_v2 = vld [vmem:[#allocation12 + $0x20] ss:$16 sps:$4 sm:$0xff]   ;;  %v7472_v46 = vld [vmem:[#allocation12 + $0x28] ss:$16 sps:$4 sm:$0xff]  }
 0xf4c   :  { %3434 = vmatprep.subr.bf16.mxu0 %v5368_v38  ;;  %3507 = vmatprep.subr.bf16.mxu1 %v5371_v4  ;;  %v7474_v38 = vld [vmem:[#allocation12 + $0x4] ss:$16 sps:$4 sm:$0xff]   ;;  %v7476_v4 = vld [vmem:[#allocation12 + $0xc] ss:$16 sps:$4 sm:$0xff]  }
 0xf4f   :  { %3435 = vmatpush1.bf16.msra.mxu0 %v5366_v33  ;;  %3508 = vmatpush1.bf16.msra.mxu1 %v5369_v6  ;;  %v7482_v33 = vld [vmem:[#allocation12] ss:$16 sps:$4 sm:$0xff]   ;;  %v7484_v6 = vld [vmem:[#allocation12 + $0x8] ss:$16 sps:$4 sm:$0xff]  }
 0xf50   :  { %3436 = vmatprep.subr.bf16.mxu0 %v5374_v40  ;;  %3509 = vmatprep.subr.bf16.mxu1 %v5377_v8  ;;  %v8101_v40 = vld [vmem:[#allocation39_spill] sm:$0xff] }
 0xf51   :  { %v1976_v8 = vadd.f32 %v8101_v40, %v6994_v49 }
 0xf53   :  { %3437 = vmatpush1.bf16.msra.mxu0 %v5372_v14  ;;  %3510 = vmatpush1.bf16.msra.mxu1 %v5375_v21 }
 0xf54   :  { %3438 = vmatprep.subr.bf16.mxu0 %v5380_v10  ;;  %3511 = vmatprep.subr.bf16.mxu1 %v5383_v26  ;;  %v8102_v10 = vld [vmem:[#allocation42_spill] sm:$0xff] }
 0xf55   :  { %v1978_v26 = vadd.f32 %v8102_v10, %v7001_v41 }
 0xf57   :  { %3439 = vmatpush1.bf16.msra.mxu0 %v5378_v20  ;;  %3512 = vmatpush1.bf16.msra.mxu1 %v5381_v25 }
 0xf58   :  { %3440 = vmatprep.subr.bf16.mxu0 %v5386_v29  ;;  %3513 = vmatprep.subr.bf16.mxu1 %v5389_v39 }
 0xf5b   :  { %3441 = vmatpush1.bf16.msra.mxu0 %v5384_v7  ;;  %3514 = vmatpush1.bf16.msra.mxu1 %v5387_v24 }
 0xf5c   :  { %3442 = vmatprep.subr.bf16.mxu0 %v5392_v28  ;;  %3515 = vmatprep.subr.bf16.mxu1 %v5395_v48 }
 0xf5f   :  { %3443 = vmatpush1.bf16.msra.mxu0 %v5390_v19  ;;  %3516 = vmatpush1.bf16.msra.mxu1 %v5393_v15 }
 0xf60   :  { %3444 = vmatprep.subr.bf16.mxu0 %v5398_v23  ;;  %3517 = vmatprep.subr.bf16.mxu1 %v5401_v47  ;;  %v8103_v23 = vld [vmem:[#allocation41_spill] sm:$0xff] }
 0xf61   :  { %v2049_v49 = vadd.f32 %v8103_v23, %v7010_v9 }
 0xf63   :  { %3445 = vmatpush1.bf16.msra.mxu0 %v5396_v35  ;;  %3518 = vmatpush1.bf16.msra.mxu1 %v5399_v30  ;;  %v8104_v35 = vld [vmem:[#allocation43_spill] sm:$0xff] }
 0xf64   :  { %3804 = vmatprep.subr.bf16.mxu0 %v7394_v12  ;;  %3845 = vmatprep.subr.bf16.mxu1 %v7396_v17  ;;  %v2051_v30 = vadd.f32 %v8104_v35, %v7014_v16 }
 0xf66   :  { %3463 = vmatmul.mubr.bf16.vlgmr.msra.gmra.mxu0 %v3212_v44  ;;  %3536 = vmatmul.mubr.bf16.vlgmr.msra.gmra.mxu1 %v3212_v44 }
 0xf67   :  { %3472 = vmatprep.mubr.bf16.mxu0 %v8036_v53  ;;  %3545 = vmatprep.mubr.bf16.mxu1 %v8036_v53 }
 0xf68   :  { %3805 = vmatpush1.bf16.msra.mxu0 %v7398_v50  ;;  %3846 = vmatpush1.bf16.msra.mxu1 %v7400_v32 }
 0xf69   :  { %3806 = vmatprep.subr.bf16.mxu0 %v7406_v11  ;;  %3847 = vmatprep.subr.bf16.mxu1 %v7408_v37 }
 0xf6c   :  { %3807 = vmatpush1.bf16.msra.mxu0 %v7410_v51  ;;  %3848 = vmatpush1.bf16.msra.mxu1 %v7412_v52 }
 0xf6d   :  { %3808 = vmatprep.subr.bf16.mxu0 %v7418_v54  ;;  %3849 = vmatprep.subr.bf16.mxu1 %v7420_v55 }
 0xf6e   :  { %3473 = vmatmul.mubr.bf16.gmra.mxu0 %v3213_v13  ;;  %3546 = vmatmul.mubr.bf16.gmra.mxu1 %v3213_v13 }
 0xf6f   :  { %3482 = vmatprep.mubr.bf16.mxu0 %v8036_v53  ;;  %3555 = vmatprep.mubr.bf16.mxu1 %v8036_v53 }
 0xf70   :  { %3809 = vmatpush1.bf16.msra.mxu0 %v7422_v56  ;;  %3850 = vmatpush1.bf16.msra.mxu1 %v7424_v57 }
 0xf71   :  { %3810 = vmatprep.subr.bf16.mxu0 %v7430_v0  ;;  %3851 = vmatprep.subr.bf16.mxu1 %v7432_v58 }
 0xf74   :  { %3811 = vmatpush1.bf16.msra.mxu0 %v7434_v34  ;;  %3852 = vmatpush1.bf16.msra.mxu1 %v7436_v31 }
 0xf75   :  { %3812 = vmatprep.subr.bf16.mxu0 %v7442_v59  ;;  %3853 = vmatprep.subr.bf16.mxu1 %v7444_v60 }
 0xf76   :  { %3483 = vmatmul.mubr.bf16.gmra.mxu0 %v3214_v18  ;;  %3556 = vmatmul.mubr.bf16.gmra.mxu1 %v3214_v18 }
 0xf77   :  { %3492 = vmatprep.mubr.bf16.mxu0 %v8036_v53  ;;  %3565 = vmatprep.mubr.bf16.mxu1 %v8036_v53 }
 0xf78   :  { %3813 = vmatpush1.bf16.msra.mxu0 %v7446_v61  ;;  %3854 = vmatpush1.bf16.msra.mxu1 %v7448_v62 }
 0xf79   :  { %3814 = vmatprep.subr.bf16.mxu0 %v7454_v36  ;;  %3855 = vmatprep.subr.bf16.mxu1 %v7456_v3 }
 0xf7c   :  { %3815 = vmatpush1.bf16.msra.mxu0 %v7458_v5  ;;  %3856 = vmatpush1.bf16.msra.mxu1 %v7460_v43 }
 0xf7d   :  { %3816 = vmatprep.subr.bf16.mxu0 %v7466_v45  ;;  %3857 = vmatprep.subr.bf16.mxu1 %v7468_v42 }
 0xf80   :  { %3817 = vmatpush1.bf16.msra.mxu0 %v7470_v2  ;;  %3858 = vmatpush1.bf16.msra.mxu1 %v7472_v46 }
 0xf81   :  { %3818 = vmatprep.subr.bf16.mxu0 %v7474_v38  ;;  %3859 = vmatprep.subr.bf16.mxu1 %v7476_v4 }
 0xf84   :  { %3819 = vmatpush1.bf16.msra.mxu0 %v7482_v33  ;;  %3860 = vmatpush1.bf16.msra.mxu1 %v7484_v6 }
 0xf85   :  { %3919 = vmatprep.subr.bf16.mxu0 %v7394_v12  ;;  %3960 = vmatprep.subr.bf16.mxu1 %v7396_v17 }
0x1006   :  { %v3127_v14 = vpop.f32.mrf.mxu0  ;;  %v3168_v21 = vpop.f32.mrf.mxu1 }
0x1007   :  { %v3175_v20 = vadd.f32 %v3127_v14, %v1976_v8  ;;  %v3177_v47 = vadd.f32 %v3168_v21, %v2049_v49 }
0x1008   :  { %v3129_v25 = vpop.f32.mrf.mxu0  ;;  %v3170_v29 = vpop.f32.mrf.mxu1 }
0x1009   :  { %v5018_v39 = vmul.f32 -1.442695, %v3175_v20  ;;  %v3176_v7 = vadd.f32 %v3129_v25, %v1978_v26  ;;  %v5020_v41 = vmul.f32 -1.442695, %v3177_v47  ;;  %v3178_v44 = vadd.f32 %v3170_v29, %v2051_v30 }
0x100a   :  { %v3131_v24 = vpop.f32.mrf.mxu0  ;;  %v3172_v28 = vpop.f32.mrf.mxu1 }
0x100b   :  { %5698 = vpow2.f32 %v5018_v39  ;;  %v5019_v48 = vmul.f32 -1.442695, %v3176_v7 }
0x100c   :  { %v3132_v19 = vpop.f32.mrf.mxu0  ;;  %v3173_v15 = vpop.f32.mrf.mxu1 }
0x100d   :  { %5700 = vpow2.f32 %v5019_v48 }
0x100e   :  { %5702 = vpow2.f32 %v5020_v41 }
0x100f   :  { %5704 = vtanh.f32 %v3178_v44 }
0x1018   :  { %v5699_v13 = vpop.eup %5698 }
0x1019   :  { %v3188_v18 = vadd.f32 1.0, %v5699_v13 }
0x101a   :  { %v5701_v40 = vpop.eup %5700 }
0x101b   :  { %5706 = vrcp.f32 %v3188_v18  ;;  %v3189_v8 = vadd.f32 1.0, %v5701_v40  ;;  %v5703_v14 = vpop.eup %5702 }
0x101c   :  { %v5705_v10 = vpop.eup %5704  ;;  %v3190_v9 = vadd.f32 1.0, %v5703_v14 }
0x101d   :  { %5708 = vrcp.f32 %v3189_v8 }
0x101e   :  { %5710 = vrcp.f32 %v3190_v9 }
0x1028   :  { %v5707_v26 = vpop.eup %5706 }
0x1029   :  { %v3199_v20 = vmul.f32 %v5707_v26, %v5705_v10 }
0x102a   :  { %v5709_v25 = vpop.eup %5708 }
0x102b   :  { %v3198_v21 = vmul.f32 %v5709_v25, %v7373_v63  ;;  %v5711_v16 = vpop.eup %5710  ;;  %v3464_v63 = vpop.f32.mrf.mxu0 }
0x102d   :  { %v3200_v39 = vadd.f32 %v3199_v20, %v3198_v21  ;;  %v3466_v28 = vpop.f32.mrf.mxu0 }
0x102f   :  { %5712 = vtanh.f32 %v3200_v39  ;;  %v7540_v19 = vpop.f32.mrf.mxu0  ;;  %v3248_v39 = vld [vmem:[%s7998_s9] sm:$0xf] }
0x1031   :  { %v7544_v23 = vpop.f32.mrf.mxu0 }
0x1033   :  { %v7548_v47 = vpop.f32.mrf.mxu0 }
0x1035   :  { %v7552_v30 = vpop.f32.mrf.mxu0 }
0x1037   :  { %v7556_v44 = vpop.f32.mrf.mxu0 }
0x1038   :  { %8107 = vst [vmem:[#allocation24_spill] sm:$0xff] %v7556_v44 }
0x1039   :  { %v7560_v18 = vpop.f32.mrf.mxu0 }
0x103a   :  { %8109 = vst [vmem:[#allocation23_spill] sm:$0xff] %v7560_v18 }
0x103b   :  { %v7564_v8 = vpop.f32.mrf.mxu0 }
0x103c   :  { %v5713_v29 = vpop.eup %5712  ;;  %8111 = vst [vmem:[#allocation25_spill] sm:$0xff] %v7564_v8 }
0x103d   :  { %v3202_v7 = vmul.f32 %v5713_v29, %v5711_v16  ;;  %v7568_v10 = vpop.f32.mrf.mxu0 }
0x103e   :  { %8113 = vst [vmem:[#allocation27_spill] sm:$0xff] %v7568_v10 }
0x103f   :  { %v3215_v24 = vpack.c.bf16 %v3202_v7, %v7376_v1  ;;  %v3537_v1 = vpop.f32.mrf.mxu1  ;;  %v7572_v20 = vpop.f32.mrf.mxu0 }
0x1040   :  { %8115 = vst [vmem:[#allocation29_spill] sm:$0xff] %v7572_v20 }
0x1041   :  { %3493 = vmatmul.mubr.bf16.gmra.mxu0 %v3215_v24  ;;  %3566 = vmatmul.mubr.bf16.gmra.mxu1 %v3215_v24  ;;  %v3539_v48 = vpop.f32.mrf.mxu1  ;;  %v7576_v9 = vpop.f32.mrf.mxu0 }
0x1042   :  { %3836 = vmatprep.mubr.bf16.mxu0 %v8036_v53  ;;  %3877 = vmatprep.mubr.bf16.mxu1 %v8036_v53  ;;  %8117 = vst [vmem:[#allocation31_spill] sm:$0xff] %v7576_v9 }
0x1043   :  { %v7542_v15 = vpop.f32.mrf.mxu1 }
0x1045   :  { %v7546_v49 = vpop.f32.mrf.mxu1 }
0x1047   :  { %v7550_v35 = vpop.f32.mrf.mxu1 }
0x1048   :  { %8105 = vst [vmem:[#allocation18_spill] sm:$0xff] %v7550_v35  ;;  %v7612_v35 = vrot.slane %v3248_v39, %v8082_v22 }
0x1049   :  { %3837 = vmatmul.mubr.bf16.vlgmr.msra.gmra.mxu0 %v8036_v53  ;;  %3878 = vmatmul.mubr.bf16.vlgmr.msra.gmra.mxu1 %v8036_v53  ;;  %v7554_v41 = vpop.f32.mrf.mxu1 }
0x104a   :  { %3920 = vmatpush1.bf16.msra.mxu0 %v7398_v50  ;;  %3961 = vmatpush1.bf16.msra.mxu1 %v7400_v32  ;;  %8106 = vst [vmem:[#allocation21_spill] sm:$0xff] %v7554_v41  ;;  %v7608_v41 = vrot.slane %v3248_v39, %v8081_v27 }
0x104b   :  { %3921 = vmatprep.subr.bf16.mxu0 %v7406_v11  ;;  %3962 = vmatprep.subr.bf16.mxu1 %v7408_v37  ;;  %v7558_v13 = vpop.f32.mrf.mxu1 }
0x104c   :  { %3951 = vmatprep.mubr.bf16.mxu0 %v8036_v53  ;;  %3992 = vmatprep.mubr.bf16.mxu1 %v8036_v53  ;;  %8108 = vst [vmem:[#allocation22_spill] sm:$0xff] %v7558_v13 }
0x104d   :  { %v7562_v40 = vpop.f32.mrf.mxu1 }
0x104e   :  { %3922 = vmatpush1.bf16.msra.mxu0 %v7410_v51  ;;  %3963 = vmatpush1.bf16.msra.mxu1 %v7412_v52  ;;  %8110 = vst [vmem:[#allocation26_spill] sm:$0xff] %v7562_v40 }
0x104f   :  { %3923 = vmatprep.subr.bf16.mxu0 %v7418_v54  ;;  %3964 = vmatprep.subr.bf16.mxu1 %v7420_v55  ;;  %v7566_v14 = vpop.f32.mrf.mxu1 }
0x1050   :  { %8112 = vst [vmem:[#allocation28_spill] sm:$0xff] %v7566_v14 }
0x1051   :  { %v7570_v26 = vpop.f32.mrf.mxu1 }
0x1052   :  { %3924 = vmatpush1.bf16.msra.mxu0 %v7422_v56  ;;  %3965 = vmatpush1.bf16.msra.mxu1 %v7424_v57  ;;  %8114 = vst [vmem:[#allocation32_spill] sm:$0xff] %v7570_v26  ;;  %v8123_v26 = vld [vmem:[#allocation19_spill] sm:$0xff] }
0x1053   :  { %3925 = vmatprep.subr.bf16.mxu0 %v7430_v0  ;;  %3966 = vmatprep.subr.bf16.mxu1 %v7432_v58  ;;  %v7574_v25 = vpop.f32.mrf.mxu1  ;;  %v7592_v20 = vrot.slane %v3248_v39, %v8123_v26 }
0x1054   :  { %8116 = vst [vmem:[#allocation30_spill] sm:$0xff] %v7574_v25 }
0x1055   :  { %v7578_v21 = vpop.f32.mrf.mxu1 }
0x1056   :  { %3926 = vmatpush1.bf16.msra.mxu0 %v7434_v34  ;;  %3967 = vmatpush1.bf16.msra.mxu1 %v7436_v31  ;;  %8118 = vst [vmem:[#allocation34_spill] sm:$0xff] %v7578_v21  ;;  %v8126_v21 = vld [vmem:[#allocation20_spill] sm:$0xff] }
0x1057   :  { %3927 = vmatprep.subr.bf16.mxu0 %v7442_v59  ;;  %3968 = vmatprep.subr.bf16.mxu1 %v7444_v60  ;;  %v7599_v14 = vrot.slane %v3248_v39, %v8126_v21 }
0x105a   :  { %3928 = vmatpush1.bf16.msra.mxu0 %v7446_v61  ;;  %3969 = vmatpush1.bf16.msra.mxu1 %v7448_v62 }
0x105b   :  { %3929 = vmatprep.subr.bf16.mxu0 %v7454_v36  ;;  %3970 = vmatprep.subr.bf16.mxu1 %v7456_v3 }
0x105e   :  { %3930 = vmatpush1.bf16.msra.mxu0 %v7458_v5  ;;  %3971 = vmatpush1.bf16.msra.mxu1 %v7460_v43 }
0x105f   :  { %3931 = vmatprep.subr.bf16.mxu0 %v7466_v45  ;;  %3972 = vmatprep.subr.bf16.mxu1 %v7468_v42 }
0x1062   :  { %3932 = vmatpush1.bf16.msra.mxu0 %v7470_v2  ;;  %3973 = vmatpush1.bf16.msra.mxu1 %v7472_v46 }
0x1063   :  { %3933 = vmatprep.subr.bf16.mxu0 %v7474_v38  ;;  %3974 = vmatprep.subr.bf16.mxu1 %v7476_v4 }
0x1066   :  { %3934 = vmatpush1.bf16.msra.mxu0 %v7482_v33  ;;  %3975 = vmatpush1.bf16.msra.mxu1 %v7484_v6 }
0x1067   :  { %4034 = vmatprep.subr.bf16.mxu0 %v7394_v12  ;;  %4075 = vmatprep.subr.bf16.mxu1 %v7396_v17 }
0x1101   :  { %v7583_v16 = vpop.f32.mrf.mxu0  ;;  %v7585_v29 = vpop.f32.mrf.mxu1 }
0x1102   :  { %8119 = vst [vmem:[#allocation33_spill] sm:$0xff] %v7583_v16  ;;  %8120 = vst [vmem:[#allocation36_spill] sm:$0xff] %v7585_v29  ;;  %v3465_v29 = vadd.f32 %v3464_v63, %v7592_v20  ;;  %v3538_v63 = vadd.f32 %v3537_v1, %v7608_v41 }
0x1103   :  { %v7587_v7 = vpop.f32.mrf.mxu0  ;;  %v7589_v24 = vpop.f32.mrf.mxu1 }
0x1104   :  { %8121 = vst [vmem:[#allocation35_spill] sm:$0xff] %v7587_v7  ;;  %8122 = vst [vmem:[#allocation40_spill] sm:$0xff] %v7589_v24  ;;  %v3467_v24 = vadd.f32 %v3466_v28, %v7599_v14 }
0x1105   :  { %v7594_v25 = vpop.f32.mrf.mxu0  ;;  %v7596_v9 = vpop.f32.mrf.mxu1 }
0x1106   :  { %8124 = vst [vmem:[#allocation37_spill] sm:$0xff] %v7594_v25  ;;  %8125 = vst [vmem:[#allocation38_spill] sm:$0xff] %v7596_v9 }
0x1107   :  { %v7601_v10 = vpop.f32.mrf.mxu0  ;;  %v7603_v8 = vpop.f32.mrf.mxu1 }
0x1108   :  { %8127 = vst [vmem:[#allocation39_spill] sm:$0xff] %v7601_v10  ;;  %8128 = vst [vmem:[#allocation42_spill] sm:$0xff] %v7603_v8 }
0x1109   :  { %v3838_v16 = vpop.f32.mrf.mxu0  ;;  %v3879_v7 = vpop.f32.mrf.mxu1 }
0x110a   :  { %v3886_v40 = vadd.f32 %v3838_v16, %v3465_v29  ;;  %v3888_v28 = vadd.f32 %v3879_v7, %v3538_v63  ;;  %v3540_v16 = vadd.f32 %v3539_v48, %v7612_v35  ;;  %v3469_v63 = vadd.f32 %v7540_v19, %v7592_v20 }
0x110b   :  { %v3840_v26 = vpop.f32.mrf.mxu0  ;;  %v3881_v13 = vpop.f32.mrf.mxu1  ;;  %v3542_v19 = vadd.f32 %v7542_v15, %v7608_v41 }
0x110c   :  { %v5085_v18 = vmul.f32 -1.442695, %v3886_v40  ;;  %v3887_v25 = vadd.f32 %v3840_v26, %v3467_v24  ;;  %v5087_v40 = vmul.f32 -1.442695, %v3888_v28 }
0x110d   :  { %v3842_v44 = vpop.f32.mrf.mxu0  ;;  %v3883_v9 = vpop.f32.mrf.mxu1 }
0x110e   :  { %5714 = vpow2.f32 %v5085_v18  ;;  %v5086_v21 = vmul.f32 -1.442695, %v3887_v25  ;;  %v3889_v44 = vadd.f32 %v3881_v13, %v3540_v16 }
0x110f   :  { %v3843_v10 = vpop.f32.mrf.mxu0  ;;  %v3884_v8 = vpop.f32.mrf.mxu1 }
0x1110   :  { %5716 = vpow2.f32 %v5086_v21 }
0x1111   :  { %5718 = vpow2.f32 %v5087_v40  ;;  %v3471_v40 = vadd.f32 %v7544_v23, %v7599_v14 }
0x111b   :  { %v5715_v29 = vpop.eup %5714 }
0x111c   :  { %v3899_v9 = vadd.f32 1.0, %v5715_v29 }
0x111d   :  { %v5717_v18 = vpop.eup %5716 }
0x111e   :  { %5720 = vrcp.f32 %v3899_v9  ;;  %v3900_v27 = vadd.f32 1.0, %v5717_v18  ;;  %v5719_v8 = vpop.eup %5718 }
0x111f   :  { %5722 = vtanh.f32 %v3889_v44  ;;  %v3901_v24 = vadd.f32 1.0, %v5719_v8 }
0x1120   :  { %5724 = vrcp.f32 %v3900_v27 }
0x1121   :  { %5726 = vrcp.f32 %v3901_v24 }
0x112b   :  { %v5721_v10 = vpop.eup %5720 }
0x112c   :  { %v5723_v25 = vpop.eup %5722 }
0x112d   :  { %v5725_v1 = vpop.eup %5724  ;;  %v3910_v39 = vmul.f32 %v5723_v25, %v5721_v10 }
0x112e   :  { %v3909_v22 = vmul.f32 0.0, %v5725_v1  ;;  %v5727_v48 = vpop.eup %5726 }
0x1130   :  { %v7615_v7 = vadd.f32 %v3910_v39, %v3909_v22  ;;  %v3544_v39 = vadd.f32 %v7546_v49, %v7612_v35 }
0x1132   :  { %5728 = vtanh.f32 %v7615_v7 }
0x113f   :  { %v5729_v13 = vpop.eup %5728 }
0x1140   :  { %v3913_v26 = vmul.f32 %v5729_v13, %v5727_v48 }
0x1142   :  { %v3918_v21 = vpack.c.bf16 %v3913_v26, %v3913_v26 }
0x1144   :  { %3952 = vmatmul.mubr.bf16.vlgmr.msra.gmra.mxu0 %v3918_v21  ;;  %3993 = vmatmul.mubr.bf16.vlgmr.msra.gmra.mxu1 %v3918_v21 }
0x1145   :  { %4035 = vmatpush1.bf16.msra.mxu0 %v7398_v50  ;;  %4076 = vmatpush1.bf16.msra.mxu1 %v7400_v32 }
0x1146   :  { %4036 = vmatprep.subr.bf16.mxu0 %v7406_v11  ;;  %4077 = vmatprep.subr.bf16.mxu1 %v7408_v37 }
0x1147   :  { %4066 = vmatprep.mubr.bf16.mxu0 %v8036_v53  ;;  %4107 = vmatprep.mubr.bf16.mxu1 %v8036_v53 }
0x1149   :  { %4037 = vmatpush1.bf16.msra.mxu0 %v7410_v51  ;;  %4078 = vmatpush1.bf16.msra.mxu1 %v7412_v52 }
0x114a   :  { %4038 = vmatprep.subr.bf16.mxu0 %v7418_v54  ;;  %4079 = vmatprep.subr.bf16.mxu1 %v7420_v55 }
0x114d   :  { %4039 = vmatpush1.bf16.msra.mxu0 %v7422_v56  ;;  %4080 = vmatpush1.bf16.msra.mxu1 %v7424_v57 }
0x114e   :  { %4040 = vmatprep.subr.bf16.mxu0 %v7430_v0  ;;  %4081 = vmatprep.subr.bf16.mxu1 %v7432_v58 }
0x1151   :  { %4041 = vmatpush1.bf16.msra.mxu0 %v7434_v34  ;;  %4082 = vmatpush1.bf16.msra.mxu1 %v7436_v31 }
0x1152   :  { %4042 = vmatprep.subr.bf16.mxu0 %v7442_v59  ;;  %4083 = vmatprep.subr.bf16.mxu1 %v7444_v60 }
0x1155   :  { %4043 = vmatpush1.bf16.msra.mxu0 %v7446_v61  ;;  %4084 = vmatpush1.bf16.msra.mxu1 %v7448_v62 }
0x1156   :  { %4044 = vmatprep.subr.bf16.mxu0 %v7454_v36  ;;  %4085 = vmatprep.subr.bf16.mxu1 %v7456_v3 }
0x1159   :  { %4045 = vmatpush1.bf16.msra.mxu0 %v7458_v5  ;;  %4086 = vmatpush1.bf16.msra.mxu1 %v7460_v43 }
0x115a   :  { %4046 = vmatprep.subr.bf16.mxu0 %v7466_v45  ;;  %4087 = vmatprep.subr.bf16.mxu1 %v7468_v42 }
0x115d   :  { %4047 = vmatpush1.bf16.msra.mxu0 %v7470_v2  ;;  %4088 = vmatpush1.bf16.msra.mxu1 %v7472_v46 }
0x115e   :  { %4048 = vmatprep.subr.bf16.mxu0 %v7474_v38  ;;  %4089 = vmatprep.subr.bf16.mxu1 %v7476_v4 }
0x1161   :  { %4049 = vmatpush1.bf16.msra.mxu0 %v7482_v33  ;;  %4090 = vmatpush1.bf16.msra.mxu1 %v7484_v6 }
0x1162   :  { %4149 = vmatprep.subr.bf16.mxu0 %v7394_v12  ;;  %4190 = vmatprep.subr.bf16.mxu1 %v7396_v17 }
0x1204   :  { %v3953_v28 = vpop.f32.mrf.mxu0  ;;  %v3994_v16 = vpop.f32.mrf.mxu1 }
0x1205   :  { %v4001_v29 = vadd.f32 %v3953_v28, %v3469_v63  ;;  %v4003_v22 = vadd.f32 %v3994_v16, %v3542_v19 }
0x1206   :  { %v3955_v44 = vpop.f32.mrf.mxu0  ;;  %v3996_v9 = vpop.f32.mrf.mxu1 }
0x1207   :  { %v5088_v18 = vmul.f32 -1.442695, %v4001_v29  ;;  %v4002_v27 = vadd.f32 %v3955_v44, %v3471_v40  ;;  %v5090_v23 = vmul.f32 -1.442695, %v4003_v22  ;;  %v4004_v48 = vadd.f32 %v3996_v9, %v3544_v39 }
0x1208   :  { %v3957_v8 = vpop.f32.mrf.mxu0  ;;  %v3998_v10 = vpop.f32.mrf.mxu1 }
0x1209   :  { %5730 = vpow2.f32 %v5088_v18  ;;  %v5089_v25 = vmul.f32 -1.442695, %v4002_v27 }
0x120a   :  { %v3958_v1 = vpop.f32.mrf.mxu0  ;;  %v3999_v24 = vpop.f32.mrf.mxu1 }
0x120b   :  { %5732 = vpow2.f32 %v5089_v25  ;;  %v3477_v24 = vadd.f32 %v7552_v30, %v7599_v14 }
0x120c   :  { %5734 = vpow2.f32 %v5090_v23 }
0x120d   :  { %5736 = vtanh.f32 %v4004_v48 }
0x1216   :  { %v5731_v13 = vpop.eup %5730 }
0x1217   :  { %v4014_v26 = vadd.f32 1.0, %v5731_v13 }
0x1218   :  { %v5733_v21 = vpop.eup %5732 }
0x1219   :  { %5738 = vrcp.f32 %v4014_v26  ;;  %v4015_v63 = vadd.f32 1.0, %v5733_v21  ;;  %v5735_v28 = vpop.eup %5734 }
0x121a   :  { %v5737_v40 = vpop.eup %5736  ;;  %v4016_v15 = vadd.f32 1.0, %v5735_v28 }
0x121b   :  { %5740 = vrcp.f32 %v4015_v63 }
0x121c   :  { %5742 = vrcp.f32 %v4016_v15 }
0x1226   :  { %v5739_v29 = vpop.eup %5738 }
0x1227   :  { %v4025_v44 = vmul.f32 %v5739_v29, %v5737_v40  ;;  %v8129_v40 = vld [vmem:[#allocation18_spill] sm:$0xff] }
0x1228   :  { %v5741_v18 = vpop.eup %5740 }
0x1229   :  { %v4024_v16 = vmul.f32 %v5741_v18, %v7615_v7  ;;  %v5743_v49 = vpop.eup %5742  ;;  %v3475_v7 = vadd.f32 %v7548_v47, %v7592_v20  ;;  %v3548_v47 = vadd.f32 %v8129_v40, %v7608_v41  ;;  %v8132_v40 = vld [vmem:[#allocation23_spill] sm:$0xff] }
0x122b   :  { %v7661_v27 = vadd.f32 %v4025_v44, %v4024_v16  ;;  %v8130_v44 = vld [vmem:[#allocation21_spill] sm:$0xff] }
0x122c   :  { %v3550_v18 = vadd.f32 %v8130_v44, %v7612_v35 }
0x122d   :  { %5744 = vtanh.f32 %v7661_v27 }
0x123a   :  { %v5745_v9 = vpop.eup %5744 }
0x123b   :  { %v4028_v8 = vmul.f32 %v5745_v9, %v5743_v49 }
0x123d   :  { %v4033_v10 = vpack.c.bf16 %v4028_v8, %v4028_v8 }
0x123f   :  { %4067 = vmatmul.mubr.bf16.vlgmr.msra.gmra.mxu0 %v4033_v10  ;;  %4108 = vmatmul.mubr.bf16.vlgmr.msra.gmra.mxu1 %v4033_v10 }
0x1240   :  { %4150 = vmatpush1.bf16.msra.mxu0 %v7398_v50  ;;  %4191 = vmatpush1.bf16.msra.mxu1 %v7400_v32 }
0x1241   :  { %4151 = vmatprep.subr.bf16.mxu0 %v7406_v11  ;;  %4192 = vmatprep.subr.bf16.mxu1 %v7408_v37 }
0x1242   :  { %4181 = vmatprep.mubr.bf16.mxu0 %v8036_v53  ;;  %4222 = vmatprep.mubr.bf16.mxu1 %v8036_v53 }
0x1244   :  { %4152 = vmatpush1.bf16.msra.mxu0 %v7410_v51  ;;  %4193 = vmatpush1.bf16.msra.mxu1 %v7412_v52 }
0x1245   :  { %4153 = vmatprep.subr.bf16.mxu0 %v7418_v54  ;;  %4194 = vmatprep.subr.bf16.mxu1 %v7420_v55 }
0x1248   :  { %4154 = vmatpush1.bf16.msra.mxu0 %v7422_v56  ;;  %4195 = vmatpush1.bf16.msra.mxu1 %v7424_v57 }
0x1249   :  { %4155 = vmatprep.subr.bf16.mxu0 %v7430_v0  ;;  %4196 = vmatprep.subr.bf16.mxu1 %v7432_v58 }
0x124c   :  { %4156 = vmatpush1.bf16.msra.mxu0 %v7434_v34  ;;  %4197 = vmatpush1.bf16.msra.mxu1 %v7436_v31 }
0x124d   :  { %4157 = vmatprep.subr.bf16.mxu0 %v7442_v59  ;;  %4198 = vmatprep.subr.bf16.mxu1 %v7444_v60 }
0x1250   :  { %4158 = vmatpush1.bf16.msra.mxu0 %v7446_v61  ;;  %4199 = vmatpush1.bf16.msra.mxu1 %v7448_v62 }
0x1251   :  { %4159 = vmatprep.subr.bf16.mxu0 %v7454_v36  ;;  %4200 = vmatprep.subr.bf16.mxu1 %v7456_v3 }
0x1254   :  { %4160 = vmatpush1.bf16.msra.mxu0 %v7458_v5  ;;  %4201 = vmatpush1.bf16.msra.mxu1 %v7460_v43 }
0x1255   :  { %4161 = vmatprep.subr.bf16.mxu0 %v7466_v45  ;;  %4202 = vmatprep.subr.bf16.mxu1 %v7468_v42 }
0x1258   :  { %4162 = vmatpush1.bf16.msra.mxu0 %v7470_v2  ;;  %4203 = vmatpush1.bf16.msra.mxu1 %v7472_v46 }
0x1259   :  { %4163 = vmatprep.subr.bf16.mxu0 %v7474_v38  ;;  %4204 = vmatprep.subr.bf16.mxu1 %v7476_v4 }
0x125c   :  { %4164 = vmatpush1.bf16.msra.mxu0 %v7482_v33  ;;  %4205 = vmatpush1.bf16.msra.mxu1 %v7484_v6 }
0x125d   :  { %4264 = vmatprep.subr.bf16.mxu0 %v7394_v12  ;;  %4305 = vmatprep.subr.bf16.mxu1 %v7396_v17 }
0x12ff   :  { %v4068_v25 = vpop.f32.mrf.mxu0  ;;  %v4109_v1 = vpop.f32.mrf.mxu1 }
0x1300   :  { %v4116_v19 = vadd.f32 %v4068_v25, %v3475_v7  ;;  %v4118_v29 = vadd.f32 %v4109_v1, %v3548_v47  ;;  %v3481_v47 = vadd.f32 %v8132_v40, %v7599_v14 }
0x1301   :  { %v4070_v22 = vpop.f32.mrf.mxu0  ;;  %v4111_v39 = vpop.f32.mrf.mxu1 }
0x1302   :  { %v5091_v23 = vmul.f32 -1.442695, %v4116_v19  ;;  %v4117_v48 = vadd.f32 %v4070_v22, %v3477_v24  ;;  %v5093_v30 = vmul.f32 -1.442695, %v4118_v29  ;;  %v4119_v15 = vadd.f32 %v4111_v39, %v3550_v18 }
0x1303   :  { %v4072_v13 = vpop.f32.mrf.mxu0  ;;  %v4113_v26 = vpop.f32.mrf.mxu1 }
0x1304   :  { %5746 = vpow2.f32 %v5091_v23  ;;  %v5092_v21 = vmul.f32 -1.442695, %v4117_v48 }
0x1305   :  { %v4073_v63 = vpop.f32.mrf.mxu0  ;;  %v4114_v28 = vpop.f32.mrf.mxu1 }
0x1306   :  { %5748 = vpow2.f32 %v5092_v21 }
0x1307   :  { %5750 = vpow2.f32 %v5093_v30 }
0x1308   :  { %5752 = vtanh.f32 %v4119_v15 }
0x1311   :  { %v5747_v16 = vpop.eup %5746 }
0x1312   :  { %v4129_v49 = vadd.f32 1.0, %v5747_v16 }
0x1313   :  { %v5749_v9 = vpop.eup %5748 }
0x1314   :  { %5754 = vrcp.f32 %v4129_v49  ;;  %v4130_v8 = vadd.f32 1.0, %v5749_v9  ;;  %v5751_v10 = vpop.eup %5750 }
0x1315   :  { %v5753_v7 = vpop.eup %5752  ;;  %v4131_v22 = vadd.f32 1.0, %v5751_v10 }
0x1316   :  { %5756 = vrcp.f32 %v4130_v8 }
0x1317   :  { %5758 = vrcp.f32 %v4131_v22 }
0x1321   :  { %v5755_v25 = vpop.eup %5754 }
0x1322   :  { %v4140_v24 = vmul.f32 %v5755_v25, %v5753_v7  ;;  %v8133_v7 = vld [vmem:[#allocation22_spill] sm:$0xff] }
0x1323   :  { %v5757_v19 = vpop.eup %5756  ;;  %v3552_v25 = vadd.f32 %v8133_v7, %v7608_v41 }
0x1324   :  { %v4139_v1 = vmul.f32 %v5757_v19, %v7661_v27  ;;  %v5759_v39 = vpop.eup %5758  ;;  %v8131_v27 = vld [vmem:[#allocation24_spill] sm:$0xff]  ;;  %v8134_v19 = vld [vmem:[#allocation26_spill] sm:$0xff] }
0x1325   :  { %v3479_v21 = vadd.f32 %v8131_v27, %v7592_v20  ;;  %v3554_v22 = vadd.f32 %v8134_v19, %v7612_v35  ;;  %v7802_v19 = vld [vmem:[#allocation12 + $0xe0] ss:$16 sps:$4 sm:$0xff]  }
0x1326   :  { %v7707_v23 = vadd.f32 %v4140_v24, %v4139_v1 }
0x1328   :  { %5760 = vtanh.f32 %v7707_v23 }
0x1335   :  { %v5761_v48 = vpop.eup %5760 }
0x1336   :  { %v4143_v13 = vmul.f32 %v5761_v48, %v5759_v39 }
0x1338   :  { %v4148_v26 = vpack.c.bf16 %v4143_v13, %v4143_v13 }
0x133a   :  { %4182 = vmatmul.mubr.bf16.vlgmr.msra.gmra.mxu0 %v4148_v26  ;;  %4223 = vmatmul.mubr.bf16.vlgmr.msra.gmra.mxu1 %v4148_v26 }
0x133b   :  { %4265 = vmatpush1.bf16.msra.mxu0 %v7398_v50  ;;  %4306 = vmatpush1.bf16.msra.mxu1 %v7400_v32 }
0x133c   :  { %4266 = vmatprep.subr.bf16.mxu0 %v7406_v11  ;;  %4307 = vmatprep.subr.bf16.mxu1 %v7408_v37 }
0x133d   :  { %4296 = vmatprep.mubr.bf16.mxu0 %v8036_v53  ;;  %4337 = vmatprep.mubr.bf16.mxu1 %v8036_v53 }
0x133f   :  { %4267 = vmatpush1.bf16.msra.mxu0 %v7410_v51  ;;  %4308 = vmatpush1.bf16.msra.mxu1 %v7412_v52 }
0x1340   :  { %4268 = vmatprep.subr.bf16.mxu0 %v7418_v54  ;;  %4309 = vmatprep.subr.bf16.mxu1 %v7420_v55 }
0x1343   :  { %4269 = vmatpush1.bf16.msra.mxu0 %v7422_v56  ;;  %4310 = vmatpush1.bf16.msra.mxu1 %v7424_v57 }
0x1344   :  { %4270 = vmatprep.subr.bf16.mxu0 %v7430_v0  ;;  %4311 = vmatprep.subr.bf16.mxu1 %v7432_v58 }
0x1347   :  { %4271 = vmatpush1.bf16.msra.mxu0 %v7434_v34  ;;  %4312 = vmatpush1.bf16.msra.mxu1 %v7436_v31 }
0x1348   :  { %4272 = vmatprep.subr.bf16.mxu0 %v7442_v59  ;;  %4313 = vmatprep.subr.bf16.mxu1 %v7444_v60 }
0x134b   :  { %4273 = vmatpush1.bf16.msra.mxu0 %v7446_v61  ;;  %4314 = vmatpush1.bf16.msra.mxu1 %v7448_v62 }
0x134c   :  { %4274 = vmatprep.subr.bf16.mxu0 %v7454_v36  ;;  %4315 = vmatprep.subr.bf16.mxu1 %v7456_v3 }
0x134f   :  { %4275 = vmatpush1.bf16.msra.mxu0 %v7458_v5  ;;  %4316 = vmatpush1.bf16.msra.mxu1 %v7460_v43 }
0x1350   :  { %4276 = vmatprep.subr.bf16.mxu0 %v7466_v45  ;;  %4317 = vmatprep.subr.bf16.mxu1 %v7468_v42 }
0x1353   :  { %4277 = vmatpush1.bf16.msra.mxu0 %v7470_v2  ;;  %4318 = vmatpush1.bf16.msra.mxu1 %v7472_v46 }
0x1354   :  { %4278 = vmatprep.subr.bf16.mxu0 %v7474_v38  ;;  %4319 = vmatprep.subr.bf16.mxu1 %v7476_v4 }
0x1357   :  { %4279 = vmatpush1.bf16.msra.mxu0 %v7482_v33  ;;  %4320 = vmatpush1.bf16.msra.mxu1 %v7484_v6 }
0x1358   :  { %4379 = vmatprep.subr.bf16.mxu0 %v7394_v12  ;;  %4420 = vmatprep.subr.bf16.mxu1 %v7396_v17 }
0x13fa   :  { %v4183_v63 = vpop.f32.mrf.mxu0  ;;  %v4224_v28 = vpop.f32.mrf.mxu1 }
0x13fb   :  { %v4231_v29 = vadd.f32 %v4183_v63, %v3479_v21  ;;  %v4233_v24 = vadd.f32 %v4224_v28, %v3552_v25 }
0x13fc   :  { %v4185_v44 = vpop.f32.mrf.mxu0  ;;  %v4226_v18 = vpop.f32.mrf.mxu1 }
0x13fd   :  { %v5094_v30 = vmul.f32 -1.442695, %v4231_v29  ;;  %v4232_v15 = vadd.f32 %v4185_v44, %v3481_v47  ;;  %v5096_v1 = vmul.f32 -1.442695, %v4233_v24  ;;  %v4234_v39 = vadd.f32 %v4226_v18, %v3554_v22  ;;  %v7805_v22 = vld [vmem:[#allocation12 + $0xe8] ss:$16 sps:$4 sm:$0xff]  }
0x13fe   :  { %v4187_v16 = vpop.f32.mrf.mxu0  ;;  %v4228_v49 = vpop.f32.mrf.mxu1 }
0x13ff   :  { %5762 = vpow2.f32 %v5094_v30  ;;  %v5095_v9 = vmul.f32 -1.442695, %v4232_v15 }
0x1400   :  { %v4188_v8 = vpop.f32.mrf.mxu0  ;;  %v4229_v10 = vpop.f32.mrf.mxu1 }
0x1401   :  { %5764 = vpow2.f32 %v5095_v9 }
0x1402   :  { %5766 = vpow2.f32 %v5096_v1  ;;  %v7808_v1 = vld [vmem:[#allocation12 + $0xc4] ss:$16 sps:$4 sm:$0xff]  }
0x1403   :  { %5768 = vtanh.f32 %v4234_v39  ;;  %v7811_v39 = vld [vmem:[#allocation12 + $0xcc] ss:$16 sps:$4 sm:$0xff]  }
0x140c   :  { %v5763_v48 = vpop.eup %5762 }
0x140d   :  { %v4244_v13 = vadd.f32 1.0, %v5763_v48  ;;  %v7816_v48 = vld [vmem:[#allocation12 + $0xc0] ss:$16 sps:$4 sm:$0xff]  }
0x140e   :  { %v5765_v26 = vpop.eup %5764 }
0x140f   :  { %5770 = vrcp.f32 %v4244_v13  ;;  %v4245_v27 = vadd.f32 1.0, %v5765_v26  ;;  %v5767_v21 = vpop.eup %5766  ;;  %v7819_v13 = vld [vmem:[#allocation12 + $0xc8] ss:$16 sps:$4 sm:$0xff]   ;;  %v7822_v26 = vld [vmem:[#allocation12 + $0xa4] ss:$16 sps:$4 sm:$0xff]  }
0x1410   :  { %v5769_v63 = vpop.eup %5768  ;;  %v4246_v44 = vadd.f32 1.0, %v5767_v21  ;;  %v7828_v21 = vld [vmem:[#allocation12 + $0xa0] ss:$16 sps:$4 sm:$0xff]  }
0x1411   :  { %5772 = vrcp.f32 %v4245_v27  ;;  %v7825_v27 = vld [vmem:[#allocation12 + $0xac] ss:$16 sps:$4 sm:$0xff]  }
0x1412   :  { %5774 = vrcp.f32 %v4246_v44  ;;  %v7843_v44 = vld [vmem:[#allocation12 + $0x88] ss:$16 sps:$4 sm:$0xff]  }
0x141c   :  { %v5771_v40 = vpop.eup %5770 }
0x141d   :  { %v4255_v47 = vmul.f32 %v5771_v40, %v5769_v63  ;;  %v7831_v63 = vld [vmem:[#allocation12 + $0xa8] ss:$16 sps:$4 sm:$0xff]   ;;  %v7834_v40 = vld [vmem:[#allocation12 + $0x84] ss:$16 sps:$4 sm:$0xff]  }
0x141e   :  { %v5773_v29 = vpop.eup %5772 }
0x141f   :  { %v4254_v28 = vmul.f32 %v5773_v29, %v7707_v23  ;;  %v5775_v18 = vpop.eup %5774  ;;  %v7840_v29 = vld [vmem:[#allocation12 + $0x80] ss:$16 sps:$4 sm:$0xff]  }
0x1421   :  { %v7753_v30 = vadd.f32 %v4255_v47, %v4254_v28  ;;  %v7837_v47 = vld [vmem:[#allocation12 + $0x8c] ss:$16 sps:$4 sm:$0xff]   ;;  %v7846_v28 = vld [vmem:[#allocation12 + $0x64] ss:$16 sps:$4 sm:$0xff]  }
0x1423   :  { %5776 = vtanh.f32 %v7753_v30 }
0x1430   :  { %v5777_v15 = vpop.eup %5776 }
0x1431   :  { %v4258_v16 = vmul.f32 %v5777_v15, %v5775_v18  ;;  %v7852_v18 = vld [vmem:[#allocation12 + $0x60] ss:$16 sps:$4 sm:$0xff]   ;;  %v7855_v15 = vld [vmem:[#allocation12 + $0x68] ss:$16 sps:$4 sm:$0xff]  }
0x1433   :  { %v4263_v49 = vpack.c.bf16 %v4258_v16, %v4258_v16  ;;  %v7858_v16 = vld [vmem:[#allocation12 + $0x44] ss:$16 sps:$4 sm:$0xff]  }
0x1435   :  { %4297 = vmatmul.mubr.bf16.vlgmr.msra.gmra.mxu0 %v4263_v49  ;;  %4338 = vmatmul.mubr.bf16.vlgmr.msra.gmra.mxu1 %v4263_v49  ;;  %v7861_v49 = vld [vmem:[#allocation12 + $0x4c] ss:$16 sps:$4 sm:$0xff]  }
0x1436   :  { %4380 = vmatpush1.bf16.msra.mxu0 %v7398_v50  ;;  %4421 = vmatpush1.bf16.msra.mxu1 %v7400_v32  ;;  %v8135_v50 = vld [vmem:[#allocation25_spill] sm:$0xff] }
0x1437   :  { %4381 = vmatprep.subr.bf16.mxu0 %v7406_v11  ;;  %4422 = vmatprep.subr.bf16.mxu1 %v7408_v37  ;;  %v3485_v32 = vadd.f32 %v8135_v50, %v7592_v20  ;;  %v7864_v50 = vld [vmem:[#allocation12 + $0x40] ss:$16 sps:$4 sm:$0xff]  }
0x1438   :  { %4411 = vmatprep.mubr.bf16.mxu0 %v8036_v53  ;;  %4452 = vmatprep.mubr.bf16.mxu1 %v8036_v53 }
0x143a   :  { %4382 = vmatpush1.bf16.msra.mxu0 %v7410_v51  ;;  %4423 = vmatpush1.bf16.msra.mxu1 %v7412_v52  ;;  %v8136_v51 = vld [vmem:[#allocation27_spill] sm:$0xff] }
0x143b   :  { %4383 = vmatprep.subr.bf16.mxu0 %v7418_v54  ;;  %4424 = vmatprep.subr.bf16.mxu1 %v7420_v55  ;;  %v3487_v52 = vadd.f32 %v8136_v51, %v7599_v14  ;;  %v7876_v51 = vld [vmem:[#allocation12 + $0x20] ss:$16 sps:$4 sm:$0xff]  }
0x143e   :  { %4384 = vmatpush1.bf16.msra.mxu0 %v7422_v56  ;;  %4425 = vmatpush1.bf16.msra.mxu1 %v7424_v57 }
0x143f   :  { %4385 = vmatprep.subr.bf16.mxu0 %v7430_v0  ;;  %4426 = vmatprep.subr.bf16.mxu1 %v7432_v58 }
0x1442   :  { %4386 = vmatpush1.bf16.msra.mxu0 %v7434_v34  ;;  %4427 = vmatpush1.bf16.msra.mxu1 %v7436_v31 }
0x1443   :  { %4387 = vmatprep.subr.bf16.mxu0 %v7442_v59  ;;  %4428 = vmatprep.subr.bf16.mxu1 %v7444_v60 }
0x1446   :  { %4388 = vmatpush1.bf16.msra.mxu0 %v7446_v61  ;;  %4429 = vmatpush1.bf16.msra.mxu1 %v7448_v62  ;;  %v8138_v62 = vld [vmem:[#allocation32_spill] sm:$0xff] }
0x1447   :  { %4389 = vmatprep.subr.bf16.mxu0 %v7454_v36  ;;  %4430 = vmatprep.subr.bf16.mxu1 %v7456_v3  ;;  %v3560_v36 = vadd.f32 %v8138_v62, %v7612_v35 }
0x144a   :  { %4390 = vmatpush1.bf16.msra.mxu0 %v7458_v5  ;;  %4431 = vmatpush1.bf16.msra.mxu1 %v7460_v43 }
0x144b   :  { %4391 = vmatprep.subr.bf16.mxu0 %v7466_v45  ;;  %4432 = vmatprep.subr.bf16.mxu1 %v7468_v42 }
0x144e   :  { %4392 = vmatpush1.bf16.msra.mxu0 %v7470_v2  ;;  %4433 = vmatpush1.bf16.msra.mxu1 %v7472_v46 }
0x144f   :  { %4393 = vmatprep.subr.bf16.mxu0 %v7474_v38  ;;  %4434 = vmatprep.subr.bf16.mxu1 %v7476_v4 }
0x1452   :  { %4394 = vmatpush1.bf16.msra.mxu0 %v7482_v33  ;;  %4435 = vmatpush1.bf16.msra.mxu1 %v7484_v6 }
0x1453   :  { %4494 = vmatprep.subr.bf16.mxu0 %v7394_v12  ;;  %4535 = vmatprep.subr.bf16.mxu1 %v7396_v17  ;;  %v8137_v17 = vld [vmem:[#allocation28_spill] sm:$0xff] }
0x1454   :  { %v3558_v60 = vadd.f32 %v8137_v17, %v7608_v41  ;;  %v8140_v17 = vld [vmem:[#allocation31_spill] sm:$0xff] }
0x14f5   :  { %v4298_v11 = vpop.f32.mrf.mxu0  ;;  %v4339_v37 = vpop.f32.mrf.mxu1 }
0x14f6   :  { %v4346_v54 = vadd.f32 %v4298_v11, %v3485_v32  ;;  %v4348_v61 = vadd.f32 %v4339_v37, %v3558_v60  ;;  %v7867_v32 = vld [vmem:[#allocation12 + $0x48] ss:$16 sps:$4 sm:$0xff]   ;;  %v7870_v11 = vld [vmem:[#allocation12 + $0x24] ss:$16 sps:$4 sm:$0xff]   ;;  %v7873_v37 = vld [vmem:[#allocation12 + $0x2c] ss:$16 sps:$4 sm:$0xff]   ;;  %v3491_v60 = vadd.f32 %v8140_v17, %v7599_v14 }
0x14f7   :  { %v4300_v55 = vpop.f32.mrf.mxu0  ;;  %v4341_v56 = vpop.f32.mrf.mxu1 }
0x14f8   :  { %v5097_v57 = vmul.f32 -1.442695, %v4346_v54  ;;  %v4347_v0 = vadd.f32 %v4300_v55, %v3487_v52  ;;  %v5099_v3 = vmul.f32 -1.442695, %v4348_v61  ;;  %v4349_v5 = vadd.f32 %v4341_v56, %v3560_v36  ;;  %v7879_v52 = vld [vmem:[#allocation12 + $0x28] ss:$16 sps:$4 sm:$0xff]  }
0x14f9   :  { %v4302_v58 = vpop.f32.mrf.mxu0  ;;  %v4343_v34 = vpop.f32.mrf.mxu1  ;;  %v7882_v54 = vld [vmem:[#allocation12 + $0x4] ss:$16 sps:$4 sm:$0xff]   ;;  %v7885_v55 = vld [vmem:[#allocation12 + $0xc] ss:$16 sps:$4 sm:$0xff]   ;;  %v7888_v56 = vld [vmem:[#allocation12] ss:$16 sps:$4 sm:$0xff]  }
0x14fa   :  { %5778 = vpow2.f32 %v5097_v57  ;;  %v5098_v31 = vmul.f32 -1.442695, %v4347_v0  ;;  %v7891_v57 = vld [vmem:[#allocation12 + $0x8] ss:$16 sps:$4 sm:$0xff]   ;;  %v5936_v0 = vld [vmem:[#allocation12 + $0xe4] ss:$16 sps:$4 sm:$0xff]  }
0x14fb   :  { %v4303_v12 = vpop.f32.mrf.mxu0  ;;  %v4344_v59 = vpop.f32.mrf.mxu1  ;;  %v5937_v58 = vld [vmem:[#allocation12 + $0xec] ss:$16 sps:$4 sm:$0xff]  }
0x14fc   :  { %5780 = vpow2.f32 %v5098_v31  ;;  %v8139_v34 = vld [vmem:[#allocation29_spill] sm:$0xff] }
0x14fd   :  { %5782 = vpow2.f32 %v5099_v3  ;;  %v3489_v31 = vadd.f32 %v8139_v34, %v7592_v20 }
0x14fe   :  { %5784 = vtanh.f32 %v4349_v5 }
0x1507   :  { %v5779_v43 = vpop.eup %5778 }
0x1508   :  { %v4359_v45 = vadd.f32 1.0, %v5779_v43 }
0x1509   :  { %v5781_v42 = vpop.eup %5780 }
0x150a   :  { %5786 = vrcp.f32 %v4359_v45  ;;  %v4360_v2 = vadd.f32 1.0, %v5781_v42  ;;  %v5783_v46 = vpop.eup %5782 }
0x150b   :  { %v5785_v38 = vpop.eup %5784  ;;  %v4361_v23 = vadd.f32 1.0, %v5783_v46 }
0x150c   :  { %5788 = vrcp.f32 %v4360_v2 }
0x150d   :  { %5790 = vrcp.f32 %v4361_v23 }
0x1517   :  { %v5787_v4 = vpop.eup %5786 }
0x1518   :  { %v4370_v33 = vmul.f32 %v5787_v4, %v5785_v38  ;;  %v8141_v38 = vld [vmem:[#allocation30_spill] sm:$0xff] }
0x1519   :  { %v5789_v6 = vpop.eup %5788  ;;  %v3562_v4 = vadd.f32 %v8141_v38, %v7608_v41 }
0x151a   :  { %v4369_v9 = vmul.f32 %v5789_v6, %v7753_v30  ;;  %v5791_v10 = vpop.eup %5790  ;;  %v7849_v30 = vld [vmem:[#allocation12 + $0x6c] ss:$16 sps:$4 sm:$0xff]   ;;  %v8142_v6 = vld [vmem:[#allocation34_spill] sm:$0xff] }
0x151b   :  { %v3564_v23 = vadd.f32 %v8142_v6, %v7612_v35  ;;  %v6075_v6 = vmov 0.0  }
0x151c   :  { %v7799_v8 = vadd.f32 %v4370_v33, %v4369_v9 }
0x151e   :  { %5792 = vtanh.f32 %v7799_v8 }
0x152b   :  { %v5793_v7 = vpop.eup %5792 }
0x152c   :  { %v4373_v25 = vmul.f32 %v5793_v7, %v5791_v10 }
0x152e   :  { %v4378_v24 = vpack.c.bf16 %v4373_v25, %v4373_v25 }
0x1530   :  { %4412 = vmatmul.mubr.bf16.vlgmr.msra.gmra.mxu0 %v4378_v24  ;;  %4453 = vmatmul.mubr.bf16.vlgmr.msra.gmra.mxu1 %v4378_v24 }
0x1531   :  { %4495 = vmatpush1.bf16.msra.mxu0 %v7802_v19  ;;  %4536 = vmatpush1.bf16.msra.mxu1 %v7805_v22 }
0x1532   :  { %4496 = vmatprep.subr.bf16.mxu0 %v7808_v1  ;;  %4537 = vmatprep.subr.bf16.mxu1 %v7811_v39 }
0x1533   :  { %4526 = vmatprep.mubr.bf16.mxu0 %v8036_v53  ;;  %4567 = vmatprep.mubr.bf16.mxu1 %v8036_v53 }
0x1535   :  { %4497 = vmatpush1.bf16.msra.mxu0 %v7816_v48  ;;  %4538 = vmatpush1.bf16.msra.mxu1 %v7819_v13 }
0x1536   :  { %4498 = vmatprep.subr.bf16.mxu0 %v7822_v26  ;;  %4539 = vmatprep.subr.bf16.mxu1 %v7825_v27 }
0x1539   :  { %4499 = vmatpush1.bf16.msra.mxu0 %v7828_v21  ;;  %4540 = vmatpush1.bf16.msra.mxu1 %v7831_v63 }
0x153a   :  { %4500 = vmatprep.subr.bf16.mxu0 %v7834_v40  ;;  %4541 = vmatprep.subr.bf16.mxu1 %v7837_v47 }
0x153d   :  { %4501 = vmatpush1.bf16.msra.mxu0 %v7840_v29  ;;  %4542 = vmatpush1.bf16.msra.mxu1 %v7843_v44 }
0x153e   :  { %4502 = vmatprep.subr.bf16.mxu0 %v7846_v28  ;;  %4543 = vmatprep.subr.bf16.mxu1 %v7849_v30 }
0x1541   :  { %4503 = vmatpush1.bf16.msra.mxu0 %v7852_v18  ;;  %4544 = vmatpush1.bf16.msra.mxu1 %v7855_v15 }
0x1542   :  { %4504 = vmatprep.subr.bf16.mxu0 %v7858_v16  ;;  %4545 = vmatprep.subr.bf16.mxu1 %v7861_v49 }
0x1545   :  { %4505 = vmatpush1.bf16.msra.mxu0 %v7864_v50  ;;  %4546 = vmatpush1.bf16.msra.mxu1 %v7867_v32 }
0x1546   :  { %4506 = vmatprep.subr.bf16.mxu0 %v7870_v11  ;;  %4547 = vmatprep.subr.bf16.mxu1 %v7873_v37 }
0x1549   :  { %4507 = vmatpush1.bf16.msra.mxu0 %v7876_v51  ;;  %4548 = vmatpush1.bf16.msra.mxu1 %v7879_v52 }
0x154a   :  { %4508 = vmatprep.subr.bf16.mxu0 %v7882_v54  ;;  %4549 = vmatprep.subr.bf16.mxu1 %v7885_v55 }
0x154d   :  { %4509 = vmatpush1.bf16.msra.mxu0 %v7888_v56  ;;  %4550 = vmatpush1.bf16.msra.mxu1 %v7891_v57 }
0x154e   :  { %4609 = vmatprep.subr.bf16.mxu0 %v5936_v0  ;;  %4650 = vmatprep.subr.bf16.mxu1 %v5937_v58 }
0x15f0   :  { %v4413_v12 = vpop.f32.mrf.mxu0  ;;  %v4454_v59 = vpop.f32.mrf.mxu1 }
0x15f1   :  { %v4461_v61 = vadd.f32 %v4413_v12, %v3489_v31  ;;  %v4463_v33 = vadd.f32 %v4454_v59, %v3562_v4 }
0x15f2   :  { %v4415_v62 = vpop.f32.mrf.mxu0  ;;  %v4456_v36 = vpop.f32.mrf.mxu1 }
0x15f3   :  { %v5100_v3 = vmul.f32 -1.442695, %v4461_v61  ;;  %v4462_v5 = vadd.f32 %v4415_v62, %v3491_v60  ;;  %v5102_v9 = vmul.f32 -1.442695, %v4463_v33  ;;  %v4464_v7 = vadd.f32 %v4456_v36, %v3564_v23  ;;  %v5450_v33 = vld [vmem:[%s7999_s10 + $0x38] sm:$0xff]   ;;  %v5451_v23 = vld [vmem:[%s7999_s10 + $0x30] sm:$0xff]  }
0x15f4   :  { %v4417_v43 = vpop.f32.mrf.mxu0  ;;  %v4458_v45 = vpop.f32.mrf.mxu1 }
0x15f5   :  { %5794 = vpow2.f32 %v5100_v3  ;;  %v5101_v42 = vmul.f32 -1.442695, %v4462_v5 }
0x15f6   :  { %v4418_v2 = vpop.f32.mrf.mxu0  ;;  %v4459_v46 = vpop.f32.mrf.mxu1 }
0x15f7   :  { %5796 = vpow2.f32 %v5101_v42 }
0x15f8   :  { %5798 = vpow2.f32 %v5102_v9  ;;  %v5452_v9 = vld [vmem:[%s7999_s10 + $0x28] sm:$0xff]  }
0x1602   :  { %v5795_v10 = vpop.eup %5794 }
0x1603   :  { %v4474_v25 = vadd.f32 1.0, %v5795_v10  ;;  %v5453_v10 = vld [vmem:[%s7999_s10 + $0x20] sm:$0xff]  }
0x1604   :  { %v5797_v24 = vpop.eup %5796 }
0x1605   :  { %5800 = vrcp.f32 %v4474_v25  ;;  %v4475_v0 = vadd.f32 1.0, %v5797_v24  ;;  %v5799_v58 = vpop.eup %5798  ;;  %v5455_v25 = vld [vmem:[%s7999_s10 + $0x10] sm:$0xff]   ;;  %v5456_v24 = vld [vmem:[%s7999_s10 + $0x8] sm:$0xff]  }
0x1606   :  { %5802 = vtanh.f32 %v4464_v7  ;;  %v4476_v17 = vadd.f32 1.0, %v5799_v58  ;;  %v5454_v7 = vld [vmem:[%s7999_s10 + $0x18] sm:$0xff]  }
0x1607   :  { %5804 = vrcp.f32 %v4475_v0  ;;  %v5457_v0 = vld [vmem:[%s7999_s10] sm:$0xff]   ;;  %v8147_v58 = vld [vmem:[#allocation37_spill] sm:$0xff] }
0x1608   :  { %5806 = vrcp.f32 %v4476_v17  ;;  %v8148_v17 = vld [vmem:[#allocation39_spill] sm:$0xff] }
0x1612   :  { %v5801_v34 = vpop.eup %5800 }
0x1613   :  { %v5803_v31 = vpop.eup %5802 }
0x1614   :  { %v5805_v12 = vpop.eup %5804  ;;  %v4485_v60 = vmul.f32 %v5803_v31, %v5801_v34  ;;  %v3499_v34 = vadd.f32 %v8147_v58, %v7592_v20 }
0x1615   :  { %v4484_v59 = vmul.f32 %v5805_v12, %v7799_v8  ;;  %v5807_v62 = vpop.eup %5806 }
0x1617   :  { %v7903_v61 = vadd.f32 %v4485_v60, %v4484_v59  ;;  %v3501_v59 = vadd.f32 %v8148_v17, %v7599_v14 }
0x1619   :  { %5808 = vtanh.f32 %v7903_v61 }
0x1626   :  { %v5809_v36 = vpop.eup %5808 }
0x1627   :  { %v4488_v3 = vmul.f32 %v5809_v36, %v5807_v62 }
0x1629   :  { %v4493_v5 = vpack.c.bf16 %v4488_v3, %v4488_v3 }
0x162b   :  { %4527 = vmatmul.mubr.bf16.vlgmr.msra.gmra.mxu0 %v4493_v5  ;;  %4568 = vmatmul.mubr.bf16.vlgmr.msra.gmra.mxu1 %v4493_v5 }
0x162c   :  { %4610 = vmatpush1.bf16.msra.mxu0 %v7802_v19  ;;  %4651 = vmatpush1.bf16.msra.mxu1 %v7805_v22 }
0x162d   :  { %4611 = vmatprep.subr.bf16.mxu0 %v7808_v1  ;;  %4652 = vmatprep.subr.bf16.mxu1 %v7811_v39  ;;  %v8144_v1 = vld [vmem:[#allocation35_spill] sm:$0xff] }
0x162e   :  { %4641 = vmatprep.mubr.bf16.mxu0 %v8036_v53  ;;  %4682 = vmatprep.mubr.bf16.mxu1 %v8036_v53  ;;  %v8143_v53 = vld [vmem:[#allocation33_spill] sm:$0xff]  ;;  %v3497_v39 = vadd.f32 %v8144_v1, %v7599_v14  ;;  %v8149_v1 = vld [vmem:[#allocation38_spill] sm:$0xff] }
0x162f   :  { %v3495_v8 = vadd.f32 %v8143_v53, %v7592_v20  ;;  %v3572_v20 = vadd.f32 %v8149_v1, %v7608_v41 }
0x1630   :  { %4612 = vmatpush1.bf16.msra.mxu0 %v7816_v48  ;;  %4653 = vmatpush1.bf16.msra.mxu1 %v7819_v13 }
0x1631   :  { %4613 = vmatprep.subr.bf16.mxu0 %v7822_v26  ;;  %4654 = vmatprep.subr.bf16.mxu1 %v7825_v27 }
0x1634   :  { %4614 = vmatpush1.bf16.msra.mxu0 %v7828_v21  ;;  %4655 = vmatpush1.bf16.msra.mxu1 %v7831_v63 }
0x1635   :  { %4615 = vmatprep.subr.bf16.mxu0 %v7834_v40  ;;  %4656 = vmatprep.subr.bf16.mxu1 %v7837_v47 }
0x1638   :  { %4616 = vmatpush1.bf16.msra.mxu0 %v7840_v29  ;;  %4657 = vmatpush1.bf16.msra.mxu1 %v7843_v44 }
0x1639   :  { %4617 = vmatprep.subr.bf16.mxu0 %v7846_v28  ;;  %4658 = vmatprep.subr.bf16.mxu1 %v7849_v30  ;;  %v8145_v28 = vld [vmem:[#allocation36_spill] sm:$0xff] }
0x163a   :  { %v3568_v30 = vadd.f32 %v8145_v28, %v7608_v41 }
0x163c   :  { %4618 = vmatpush1.bf16.msra.mxu0 %v7852_v18  ;;  %4659 = vmatpush1.bf16.msra.mxu1 %v7855_v15  ;;  %v8146_v15 = vld [vmem:[#allocation40_spill] sm:$0xff] }
0x163d   :  { %4619 = vmatprep.subr.bf16.mxu0 %v7858_v16  ;;  %4660 = vmatprep.subr.bf16.mxu1 %v7861_v49  ;;  %v3570_v16 = vadd.f32 %v8146_v15, %v7612_v35 }
0x1640   :  { %4620 = vmatpush1.bf16.msra.mxu0 %v7864_v50  ;;  %4661 = vmatpush1.bf16.msra.mxu1 %v7867_v32 }
0x1641   :  { %4621 = vmatprep.subr.bf16.mxu0 %v7870_v11  ;;  %4662 = vmatprep.subr.bf16.mxu1 %v7873_v37 }
0x1644   :  { %4622 = vmatpush1.bf16.msra.mxu0 %v7876_v51  ;;  %4663 = vmatpush1.bf16.msra.mxu1 %v7879_v52 }
0x1645   :  { %4623 = vmatprep.subr.bf16.mxu0 %v7882_v54  ;;  %4664 = vmatprep.subr.bf16.mxu1 %v7885_v55 }
0x1648   :  { %4624 = vmatpush1.bf16.msra.mxu0 %v7888_v56  ;;  %4665 = vmatpush1.bf16.msra.mxu1 %v7891_v57 }
0x1649   :  { %5127 = vmatprep.subr.bf16.mxu0 %v6075_v6 }
0x16eb   :  { %v4528_v19 = vpop.f32.mrf.mxu0  ;;  %v4569_v22 = vpop.f32.mrf.mxu1 }
0x16ec   :  { %v4576_v48 = vadd.f32 %v4528_v19, %v3495_v8  ;;  %v4578_v18 = vadd.f32 %v4569_v22, %v3568_v30 }
0x16ed   :  { %v4530_v13 = vpop.f32.mrf.mxu0  ;;  %v4571_v26 = vpop.f32.mrf.mxu1 }
0x16ee   :  { %v5103_v27 = vmul.f32 -1.442695, %v4576_v48  ;;  %v4577_v21 = vadd.f32 %v4530_v13, %v3497_v39  ;;  %v5105_v49 = vmul.f32 -1.442695, %v4578_v18  ;;  %v4579_v50 = vadd.f32 %v4571_v26, %v3570_v16  ;;  %v8150_v48 = vld [vmem:[#allocation42_spill] sm:$0xff] }
0x16ef   :  { %v4532_v63 = vpop.f32.mrf.mxu0  ;;  %v4573_v40 = vpop.f32.mrf.mxu1  ;;  %v3574_v13 = vadd.f32 %v8150_v48, %v7612_v35 }
0x16f0   :  { %5810 = vpow2.f32 %v5103_v27  ;;  %v5104_v47 = vmul.f32 -1.442695, %v4577_v21 }
0x16f1   :  { %v4533_v29 = vpop.f32.mrf.mxu0  ;;  %v4574_v44 = vpop.f32.mrf.mxu1 }
0x16f2   :  { %5812 = vpow2.f32 %v5104_v47 }
0x16f3   :  { %5814 = vpow2.f32 %v5105_v49 }
0x16f4   :  { %5816 = vtanh.f32 %v4579_v50 }
0x16fd   :  { %v5811_v32 = vpop.eup %5810 }
0x16fe   :  { %v4589_v11 = vadd.f32 1.0, %v5811_v32  ;;  %v5109_v32 = vld [vmem:[%s8000_s11] ss:$0 sm:$0xff] }
0x16ff   :  { %v5813_v37 = vpop.eup %5812 }
0x1700   :  { %5818 = vrcp.f32 %v4589_v11  ;;  %v4590_v51 = vadd.f32 1.0, %v5813_v37  ;;  %v5815_v52 = vpop.eup %5814 }
0x1701   :  { %v5817_v54 = vpop.eup %5816  ;;  %v4591_v43 = vadd.f32 1.0, %v5815_v52 }
0x1702   :  { %5820 = vrcp.f32 %v4590_v51 }
0x1703   :  { %5822 = vrcp.f32 %v4591_v43 }
0x170d   :  { %v5819_v55 = vpop.eup %5818 }
0x170e   :  { %v4600_v56 = vmul.f32 %v5819_v55, %v5817_v54 }
0x170f   :  { %v5821_v57 = vpop.eup %5820 }
0x1710   :  { %v4599_v45 = vmul.f32 %v5821_v57, %v7903_v61  ;;  %v5823_v2 = vpop.eup %5822 }
0x1712   :  { %v7947_v42 = vadd.f32 %v4600_v56, %v4599_v45 }
0x1714   :  { %5824 = vtanh.f32 %v7947_v42 }
0x1721   :  { %v5825_v46 = vpop.eup %5824 }
0x1722   :  { %v4603_v38 = vmul.f32 %v5825_v46, %v5823_v2 }
0x1724   :  { %v4608_v4 = vpack.c.bf16 %v4603_v38, %v4603_v38 }
0x1726   :  { %4642 = vmatmul.mubr.bf16.vlgmr.msra.gmra.mxu0 %v4608_v4  ;;  %4683 = vmatmul.mubr.bf16.vlgmr.msra.gmra.mxu1 %v4608_v4 }
0x1727   :  { %5128 = vmatpush3.bf16.msra.mxu0 %v5450_v33  ;;  %5143 = vmatprep.mubr.msk.bf16.mxu0 %vm6076_vm0, %v6075_v6 }
0x1728   :  { %5129 = vmatprep.subr.bf16.mxu0 %v6075_v6 }
0x172b   :  { %5130 = vmatpush3.bf16.msra.mxu0 %v5451_v23 }
0x172c   :  { %5131 = vmatprep.subr.bf16.mxu0 %v6075_v6 }
0x172f   :  { %5132 = vmatpush3.bf16.msra.mxu0 %v5452_v9 }
0x1730   :  { %5133 = vmatprep.subr.bf16.mxu0 %v6075_v6 }
0x1733   :  { %5134 = vmatpush3.bf16.msra.mxu0 %v5453_v10 }
0x1734   :  { %5135 = vmatprep.subr.bf16.mxu0 %v6075_v6 }
0x1737   :  { %5136 = vmatpush3.bf16.msra.mxu0 %v5454_v7 }
0x1738   :  { %5137 = vmatprep.subr.bf16.mxu0 %v6075_v6 }
0x173b   :  { %5138 = vmatpush3.bf16.msra.mxu0 %v5455_v25 }
0x173c   :  { %5139 = vmatprep.subr.bf16.mxu0 %v6075_v6 }
0x173f   :  { %5140 = vmatpush3.bf16.msra.mxu0 %v5456_v24 }
0x1740   :  { %5141 = vmatprep.subr.bf16.mxu0 %v6075_v6 }
0x1743   :  { %5142 = vmatpush3.bf16.msra.mxu0 %v5457_v0 }
0x17e6   :  { %v4643_v31 = vpop.f32.mrf.mxu0  ;;  %v4684_v12 = vpop.f32.mrf.mxu1 }
0x17e7   :  { %v4691_v60 = vadd.f32 %v4643_v31, %v3499_v34  ;;  %v4693_v39 = vadd.f32 %v4684_v12, %v3572_v20 }
0x17e8   :  { %v4645_v61 = vpop.f32.mrf.mxu0  ;;  %v4686_v62 = vpop.f32.mrf.mxu1 }
0x17e9   :  { %v5106_v36 = vmul.f32 -1.442695, %v4691_v60  ;;  %v4692_v3 = vadd.f32 %v4645_v61, %v3501_v59  ;;  %v5108_v14 = vmul.f32 -1.442695, %v4693_v39  ;;  %v4694_v26 = vadd.f32 %v4686_v62, %v3574_v13 }
0x17ea   :  { %v4647_v5 = vpop.f32.mrf.mxu0  ;;  %v4688_v53 = vpop.f32.mrf.mxu1 }
0x17eb   :  { %5826 = vpow2.f32 %v5106_v36  ;;  %v5107_v8 = vmul.f32 -1.442695, %v4692_v3 }
0x17ec   :  { %v4648_v19 = vpop.f32.mrf.mxu0  ;;  %v4689_v22 = vpop.f32.mrf.mxu1 }
0x17ed   :  { %5828 = vpow2.f32 %v5107_v8 }
0x17ee   :  { %5830 = vpow2.f32 %v5108_v14 }
0x17ef   :  { %5832 = vtanh.f32 %v4694_v26 }
0x17f8   :  { %v5827_v27 = vpop.eup %5826 }
0x17f9   :  { %v4704_v21 = vadd.f32 1.0, %v5827_v27 }
0x17fa   :  { %v5829_v63 = vpop.eup %5828 }
0x17fb   :  { %5834 = vrcp.f32 %v4704_v21  ;;  %v4705_v40 = vadd.f32 1.0, %v5829_v63  ;;  %v5831_v47 = vpop.eup %5830 }
0x17fc   :  { %v5833_v29 = vpop.eup %5832  ;;  %v4706_v41 = vadd.f32 1.0, %v5831_v47 }
0x17fd   :  { %5836 = vrcp.f32 %v4705_v40 }
0x17fe   :  { %5838 = vrcp.f32 %v4706_v41 }
0x1808   :  { %v5835_v44 = vpop.eup %5834 }
0x1809   :  { %v4715_v28 = vmul.f32 %v5835_v44, %v5833_v29 }
0x180a   :  { %v5837_v30 = vpop.eup %5836 }
0x180b   :  { %v4714_v18 = vmul.f32 %v5837_v30, %v7947_v42  ;;  %v5839_v35 = vpop.eup %5838 }
0x180d   :  { %v4716_v15 = vadd.f32 %v4715_v28, %v4714_v18 }
0x180f   :  { %5840 = vtanh.f32 %v4716_v15 }
0x181c   :  { %v5841_v16 = vpop.eup %5840 }
0x181d   :  { %v4718_v49 = vmul.f32 %v5841_v16, %v5839_v35 }
0x181f   :  { %v4719_v50 = vpack.c.bf16 %v4718_v49, %v4718_v49 }
0x1821   :  { %5144 = vmatmul.mubr.bf16.vlgmr.msra.gmra.mxu0 %v4719_v50 }
0x18e1   :  { %v4825_v11 = vpop.f32.mrf.mxu0 }
0x18e2   :  { %v4826_v37 = vadd.f32 %v5109_v32, %v4825_v11 }
0x18e3   :  { %v5145_v51 = vpop.f32.mrf.mxu0 }
0x18e4   :  { %v4831_v52 = vmax.f32 %v4826_v37, 0.0 }
0x18e5   :  { %v4828_v54 = vpop.f32.mrf.mxu0 }
0x18e6   :  { %4832 = vst [vmem:[%s8001_s12] sm:$0xff] %v4831_v52 }
0x18e7   :  { %v5146_v55 = vpop.f32.mrf.mxu0 }
0x18e8   :  { %4837 = vsyncpa [#allocation5], 1 }
0x18e9   :  { %4838 = vsyncpa [#allocation7], 1 }
0x18ea   :  { %4839 = vsyncpa [#allocation10], 1 }
0x18eb   :  { %4840 = vsyncpa [#allocation13], 1 }

</bundles_post_ra>
